<compile_context>
chip_gen: v7x
topology: tpu7x:2x2x1
jax: 0.10.0
libtpu: 0.0.40
codegen_flags: <defaults>
</compile_context>

<pallas_src>
import math
from dataclasses import dataclass
from typing import Any, Optional

import jax
import jax.numpy as jnp
from jax.experimental import pallas as pl
from jax.experimental.pallas import tpu as pltpu

# ----------------------------- small TrOCR config ---------------------------
VOCAB_SIZE = 128
D_MODEL = 32
N_HEADS = 4
HEAD_DIM = D_MODEL // N_HEADS
N_LAYERS = 2
FFN_DIM = 64
MAX_POS = 64
POS_OFFSET = 2            # TrOCR learned positional-embedding offset
SCALE_EMBEDDING = False   # HF TrOCRConfig default
LN_EPS = 1e-5
NEG_INF = -1e9


# ----------------------------- GELU selection --------------------------------
def _gelu_exact(x):
    return 0.5 * x * (1.0 + jax.lax.erf(x * (1.0 / math.sqrt(2.0))))


def _gelu_tanh(x):
    c = math.sqrt(2.0 / math.pi)
    return 0.5 * x * (1.0 + jnp.tanh(c * (x + 0.044715 * x * x * x)))


_GELU = None


def _select_gelu():
    """Probe (eagerly, outside any jit trace) whether exact erf-GELU lowers."""
    def probe(x_ref, o_ref):
        o_ref[...] = _gelu_exact(x_ref[...])

    try:
        r = pl.pallas_call(
            probe, out_shape=jax.ShapeDtypeStruct((8, 128), jnp.float32)
        )(jnp.zeros((8, 128), jnp.float32))
        jax.block_until_ready(r)
        return _gelu_exact
    except Exception:
        # TODO(synk): exact erf-GELU not lowerable on this backend; tanh approx used.
        return _gelu_tanh


def _get_gelu():
    global _GELU
    if _GELU is None:
        _GELU = _select_gelu()
    return _GELU


# ----------------------------- fused forward kernel --------------------------
def _make_kernel(B, T, S, with_loss):
    scaling = HEAD_DIM ** -0.5
    gelu = _GELU if _GELU is not None else _gelu_tanh

    def kernel(h0_ref, enc_ref, lng_ref, lnb_ref,
               sa_q_w, sa_q_b, sa_k_w, sa_k_b, sa_v_w, sa_v_b,
               sa_o_w, sa_o_b, sa_ln_g, sa_ln_b,
               ca_q_w, ca_q_b, ca_k_w, ca_k_b, ca_v_w, ca_v_b,
               ca_o_w, ca_o_b, ca_ln_g, ca_ln_b,
               fc1_w, fc1_b, fc2_w, fc2_b, fln_g, fln_b,
               out_w, *rest):
        if with_loss:
            labels_ref, logits_ref, loss_ref = rest
        else:
            (logits_ref,) = rest

        # --- per-head lane masks (0/1 floats), built in-kernel ---------------
        lane = jax.lax.broadcasted_iota(jnp.int32, (1, D_MODEL), 1)
        head_masks = [
            ((lane >= hh * HEAD_DIM) & (lane < (hh + 1) * HEAD_DIM)).astype(jnp.float32)
            for hh in range(N_HEADS)
        ]

        # --- packed (batch-block [+ causal]) additive attention biases -------
        def block_bias(rows_per_b, cols_per_b, causal):
            R, C = B * rows_per_b, B * cols_per_b
            ri = jax.lax.broadcasted_iota(jnp.int32, (R, C), 0)
            ci = jax.lax.broadcasted_iota(jnp.int32, (R, C), 1)
            allowed = ri < 0                                  # all False
            for b in range(B):
                blk = ((ri >= b * rows_per_b) & (ri < (b + 1) * rows_per_b)
                       & (ci >= b * cols_per_b) & (ci < (b + 1) * cols_per_b))
                if causal:
                    blk = blk & ((ci - b * cols_per_b) <= (ri - b * rows_per_b))
                allowed = allowed | blk
            return jnp.where(allowed, 0.0, NEG_INF).astype(jnp.float32)

        self_bias = block_bias(T, T, causal=True)             # (B*T, B*T)
        cross_bias = block_bias(T, S, causal=False)           # (B*T, B*S)

        def ln(x, g, b):
            mu = jnp.mean(x, axis=-1, keepdims=True)
            var = jnp.mean(jnp.square(x - mu), axis=-1, keepdims=True)
            return (x - mu) * jax.lax.rsqrt(var + LN_EPS) * g + b

        def proj(x, w, b):
            return jnp.dot(x, w, preferred_element_type=jnp.float32) + b

        def attend(q, k, v, bias):
            # All batches & heads in one shot: disjoint lane masks select the
            # head sub-spaces, the additive bias packs the per-batch block
            # structure (and causality), so no slicing/concat is needed.
            ctx = jnp.zeros_like(q)
            for m in head_masks:
                s = jax.lax.dot_general(q * m, k * m, (((1,), (1,)), ((), ())),
                                        preferred_element_type=jnp.float32)
                s = s + bias
                s = s - jnp.max(s, axis=-1, keepdims=True)
                p = jnp.exp(s)
                p = p / jnp.sum(p, axis=-1, keepdims=True)
                ctx = ctx + jnp.dot(p, v * m, preferred_element_type=jnp.float32)
            return ctx

        enc = enc_ref[...]                                     # (B*S, D)
        h = ln(h0_ref[...], lng_ref[...], lnb_ref[...])        # layernorm_embedding

        for li in range(N_LAYERS):
            # --- causal self attention (post-norm residual) ------------------
            q = proj(h, sa_q_w[li], sa_q_b[li]) * scaling
            k = proj(h, sa_k_w[li], sa_k_b[li])
            v = proj(h, sa_v_w[li], sa_v_b[li])
            a = proj(attend(q, k, v, self_bias), sa_o_w[li], sa_o_b[li])
            h = ln(h + a, sa_ln_g[li], sa_ln_b[li])

            # --- cross attention over encoder hidden states -------------------
            q = proj(h, ca_q_w[li], ca_q_b[li]) * scaling
            k = proj(enc, ca_k_w[li], ca_k_b[li])
            v = proj(enc, ca_v_w[li], ca_v_b[li])
            a = proj(attend(q, k, v, cross_bias), ca_o_w[li], ca_o_b[li])
            h = ln(h + a, ca_ln_g[li], ca_ln_b[li])

            # --- feed forward: fc1 -> GELU -> fc2, all in VMEM ----------------
            f = gelu(proj(h, fc1_w[li], fc1_b[li]))
            f = proj(f, fc2_w[li], fc2_b[li])
            h = ln(h + f, fln_g[li], fln_b[li])

        # --- bias-free output projection; lane-dense (B*T, 128) store --------
        logits = jnp.dot(h, out_w[...], preferred_element_type=jnp.float32)
        logits_ref[...] = logits

        if with_loss:
            # torch.nn.CrossEntropyLoss, mean reduction.
            # TODO(synk): ignore_index=-100 not handled (labels never use it here).
            labels = labels_ref[...]                           # (B*T, 1) int32
            m = jnp.max(logits, axis=-1, keepdims=True)
            lse = jnp.log(jnp.sum(jnp.exp(logits - m), axis=-1, keepdims=True)) + m
            col = jax.lax.broadcasted_iota(jnp.int32, logits.shape, 1)
            tgt = jnp.sum(jnp.where(col == labels, logits, 0.0), axis=-1,
                          keepdims=True)
            loss_ref[...] = jnp.mean(lse - tgt).reshape(1, 1)

    return kernel


# ----------------------------- parameter packing ------------------------------
def _pack_params(params):
    layers = params["layers"]

    def st(fn):
        return jnp.stack([fn(lp) for lp in layers], axis=0)

    return [
        params["ln_emb_g"], params["ln_emb_b"],
        st(lambda lp: lp["self_attn"]["q_w"]), st(lambda lp: lp["self_attn"]["q_b"]),
        st(lambda lp: lp["self_attn"]["k_w"]), st(lambda lp: lp["self_attn"]["k_b"]),
        st(lambda lp: lp["self_attn"]["v_w"]), st(lambda lp: lp["self_attn"]["v_b"]),
        st(lambda lp: lp["self_attn"]["o_w"]), st(lambda lp: lp["self_attn"]["o_b"]),
        st(lambda lp: lp["self_ln_g"]), st(lambda lp: lp["self_ln_b"]),
        st(lambda lp: lp["cross_attn"]["q_w"]), st(lambda lp: lp["cross_attn"]["q_b"]),
        st(lambda lp: lp["cross_attn"]["k_w"]), st(lambda lp: lp["cross_attn"]["k_b"]),
        st(lambda lp: lp["cross_attn"]["v_w"]), st(lambda lp: lp["cross_attn"]["v_b"]),
        st(lambda lp: lp["cross_attn"]["o_w"]), st(lambda lp: lp["cross_attn"]["o_b"]),
        st(lambda lp: lp["cross_ln_g"]), st(lambda lp: lp["cross_ln_b"]),
        st(lambda lp: lp["fc1_w"]), st(lambda lp: lp["fc1_b"]),
        st(lambda lp: lp["fc2_w"]), st(lambda lp: lp["fc2_b"]),
        st(lambda lp: lp["final_ln_g"]), st(lambda lp: lp["final_ln_b"]),
        params["out_proj_w"],
    ]


# ----------------------------- forward (one pallas_call) ----------------------
def _forward_impl(params, input_ids, encoder_hidden_states, labels):
    B, T = input_ids.shape
    _, S, _ = encoder_hidden_states.shape
    embed_scale = math.sqrt(D_MODEL) if SCALE_EMBEDDING else 1.0

    # Token / positional embedding gathers stay as (jit-fused) XLA glue.
    x = jnp.take(params["embed_tokens"], input_ids, axis=0) * embed_scale
    pos = jnp.take(params["embed_positions"], jnp.arange(T) + POS_OFFSET, axis=0)
    h0 = (x + pos[None, :, :]).reshape(B * T, D_MODEL).astype(jnp.float32)
    enc = encoder_hidden_states.reshape(B * S, D_MODEL).astype(jnp.float32)

    with_loss = labels is not None
    inputs = [h0, enc] + _pack_params(params)
    out_shape = [jax.ShapeDtypeStruct((B * T, VOCAB_SIZE), jnp.float32)]
    if with_loss:
        inputs.append(labels.reshape(B * T, 1).astype(jnp.int32))
        out_shape.append(jax.ShapeDtypeStruct((1, 1), jnp.float32))

    vmem = pl.BlockSpec(memory_space=pltpu.MemorySpace.VMEM)
    outs = pl.pallas_call(
        _make_kernel(B, T, S, with_loss),
        out_shape=tuple(out_shape),
        in_specs=[vmem] * len(inputs),
        out_specs=tuple([vmem] * len(out_shape)),
    )(*inputs)

    logits = outs[0].reshape(B, T, VOCAB_SIZE)
    loss = outs[1][0, 0] if with_loss else None
    return loss, logits


_forward_jit = jax.jit(_forward_impl)


@dataclass
class CausalLMOutputWithCrossAttentions:
    loss: Optional[jnp.ndarray] = None
    logits: Optional[jnp.ndarray] = None
    past_key_values: Optional[Any] = None
    hidden_states: Optional[Any] = None
    attentions: Optional[Any] = None
    cross_attentions: Optional[Any] = None


def trocr_for_causal_lm(params, input_ids, encoder_hidden_states, labels=None):
    """Mirrors TtTrOCRForCausalLM.forward (use_cache / head_mask paths omitted)."""
    _get_gelu()   # resolve GELU lowering eagerly, outside any jit trace
    loss, logits = _forward_jit(params, input_ids, encoder_hidden_states, labels)
    return CausalLMOutputWithCrossAttentions(loss=loss, logits=logits)


# ----------------------------- deterministic params ---------------------------
def init_params(key):
    keys = iter(jax.random.split(key, 512))

    def nrm(shape, scale=0.02):
        return scale * jax.random.normal(next(keys), shape, jnp.float32)

    def attn_params():
        return {
            "q_w": nrm((D_MODEL, D_MODEL)), "q_b": jnp.zeros((1, D_MODEL), jnp.float32),
            "k_w": nrm((D_MODEL, D_MODEL)), "k_b": jnp.zeros((1, D_MODEL), jnp.float32),
            "v_w": nrm((D_MODEL, D_MODEL)), "v_b": jnp.zeros((1, D_MODEL), jnp.float32),
            "o_w": nrm((D_MODEL, D_MODEL)), "o_b": jnp.zeros((1, D_MODEL), jnp.float32),
        }

    def layer_params():
        return {
            "self_attn": attn_params(),
            "self_ln_g": jnp.ones((1, D_MODEL), jnp.float32),
            "self_ln_b": jnp.zeros((1, D_MODEL), jnp.float32),
            "cross_attn": attn_params(),
            "cross_ln_g": jnp.ones((1, D_MODEL), jnp.float32),
            "cross_ln_b": jnp.zeros((1, D_MODEL), jnp.float32),
            "fc1_w": nrm((D_MODEL, FFN_DIM)), "fc1_b": jnp.zeros((1, FFN_DIM), jnp.float32),
            "fc2_w": nrm((FFN_DIM, D_MODEL)), "fc2_b": jnp.zeros((1, D_MODEL), jnp.float32),
            "final_ln_g": jnp.ones((1, D_MODEL), jnp.float32),
            "final_ln_b": jnp.zeros((1, D_MODEL), jnp.float32),
        }

    return {
        "embed_tokens": nrm((VOCAB_SIZE, D_MODEL)),
        "embed_positions": nrm((MAX_POS + POS_OFFSET, D_MODEL)),
        "ln_emb_g": jnp.ones((1, D_MODEL), jnp.float32),
        "ln_emb_b": jnp.zeros((1, D_MODEL), jnp.float32),
        "layers": [layer_params() for _ in range(N_LAYERS)],
        "out_proj_w": nrm((D_MODEL, VOCAB_SIZE)),
    }


# ----------------------------- main -------------------------------------------
if __name__ == "__main__":
    key = jax.random.PRNGKey(0)
    k_param, k_ids, k_enc, k_lbl = jax.random.split(key, 4)

    B, T, ENC_T = 2, 8, 12
    params = init_params(k_param)
    input_ids = jax.random.randint(k_ids, (B, T), 0, VOCAB_SIZE, dtype=jnp.int32)
    encoder_hidden_states = jax.random.normal(k_enc, (B, ENC_T, D_MODEL), jnp.float32)
    labels = jax.random.randint(k_lbl, (B, T), 0, VOCAB_SIZE, dtype=jnp.int32)

    out = trocr_for_causal_lm(params, input_ids, encoder_hidden_states, labels=labels)
    jax.block_until_ready((out.loss, out.logits))

    assert out.logits.shape == (B, T, VOCAB_SIZE)
    assert out.loss.shape == ()
    assert bool(jnp.isfinite(out.loss)) and bool(jnp.all(jnp.isfinite(out.logits)))
    print("KERNEL_OK")
</pallas_src>

<mosaic_0001>
module attributes {stable_mosaic.version = 11 : i64} {
  func.func @probe(%arg0: memref<8x128xf32, #tpu.memory_space<vmem>>, %arg1: memref<8x128xf32, #tpu.memory_space<vmem>>) attributes {dimension_semantics = [], scalar_prefetch = 0 : i64, scratch_operands = 0 : i64, tpu.core_type = #tpu.core_type<tc>} {
    %c0 = arith.constant 0 : index
    %c0_0 = arith.constant 0 : index
    %0 = vector.load %arg0[%c0, %c0_0] : memref<8x128xf32, #tpu.memory_space<vmem>>, vector<8x128xf32>
    %cst = arith.constant 5.000000e-01 : f32
    %1 = vector.broadcast %cst : f32 to vector<8x128xf32>
    %2 = arith.mulf %1, %0 : vector<8x128xf32>
    %cst_1 = arith.constant 0.707106769 : f32
    %3 = vector.broadcast %cst_1 : f32 to vector<8x128xf32>
    %4 = arith.mulf %0, %3 : vector<8x128xf32>
    %5 = math.erf %4 : vector<8x128xf32>
    %cst_2 = arith.constant 1.000000e+00 : f32
    %6 = vector.broadcast %cst_2 : f32 to vector<8x128xf32>
    %7 = arith.addf %6, %5 : vector<8x128xf32>
    %8 = arith.mulf %2, %7 : vector<8x128xf32>
    %c0_3 = arith.constant 0 : index
    %c0_4 = arith.constant 0 : index
    %9 = vector.load %arg1[%c0_3, %c0_4] : memref<8x128xf32, #tpu.memory_space<vmem>>, vector<8x128xf32>
    tpu.vector_store %arg1[%c0_3, %c0_4], %8 {strides = array<i32>} : memref<8x128xf32, #tpu.memory_space<vmem>>, vector<8x128xf32>,
    return
  }
}

module attributes {stable_mosaic.version = 11 : i64} {
  func.func @kernel(%arg0: memref<16x32xf32, #tpu.memory_space<vmem>>, %arg1: memref<24x32xf32, #tpu.memory_space<vmem>>, %arg2: memref<1x32xf32, #tpu.memory_space<vmem>>, %arg3: memref<1x32xf32, #tpu.memory_space<vmem>>, %arg4: memref<2x32x32xf32, #tpu.memory_space<vmem>>, %arg5: memref<2x1x32xf32, #tpu.memory_space<vmem>>, %arg6: memref<2x32x32xf32, #tpu.memory_space<vmem>>, %arg7: memref<2x1x32xf32, #tpu.memory_space<vmem>>, %arg8: memref<2x32x32xf32, #tpu.memory_space<vmem>>, %arg9: memref<2x1x32xf32, #tpu.memory_space<vmem>>, %arg10: memref<2x32x32xf32, #tpu.memory_space<vmem>>, %arg11: memref<2x1x32xf32, #tpu.memory_space<vmem>>, %arg12: memref<2x1x32xf32, #tpu.memory_space<vmem>>, %arg13: memref<2x1x32xf32, #tpu.memory_space<vmem>>, %arg14: memref<2x32x32xf32, #tpu.memory_space<vmem>>, %arg15: memref<2x1x32xf32, #tpu.memory_space<vmem>>, %arg16: memref<2x32x32xf32, #tpu.memory_space<vmem>>, %arg17: memref<2x1x32xf32, #tpu.memory_space<vmem>>, %arg18: memref<2x32x32xf32, #tpu.memory_space<vmem>>, %arg19: memref<2x1x32xf32, #tpu.memory_space<vmem>>, %arg20: memref<2x32x32xf32, #tpu.memory_space<vmem>>, %arg21: memref<2x1x32xf32, #tpu.memory_space<vmem>>, %arg22: memref<2x1x32xf32, #tpu.memory_space<vmem>>, %arg23: memref<2x1x32xf32, #tpu.memory_space<vmem>>, %arg24: memref<2x32x64xf32, #tpu.memory_space<vmem>>, %arg25: memref<2x1x64xf32, #tpu.memory_space<vmem>>, %arg26: memref<2x64x32xf32, #tpu.memory_space<vmem>>, %arg27: memref<2x1x32xf32, #tpu.memory_space<vmem>>, %arg28: memref<2x1x32xf32, #tpu.memory_space<vmem>>, %arg29: memref<2x1x32xf32, #tpu.memory_space<vmem>>, %arg30: memref<32x128xf32, #tpu.memory_space<vmem>>, %arg31: memref<16x1xi32, #tpu.memory_space<vmem>>, %arg32: memref<16x128xf32, #tpu.memory_space<vmem>>, %arg33: memref<1x1xf32, #tpu.memory_space<vmem>>) attributes {dimension_semantics = [], scalar_prefetch = 0 : i64, scratch_operands = 0 : i64, tpu.core_type = #tpu.core_type<tc>} {
    %0 = tpu.iota {dimensions = array<i32: 1>} : vector<1x32xi32>
    %c0_i32 = arith.constant 0 : i32
    %1 = vector.broadcast %c0_i32 : i32 to vector<1x32xi32>
    %2 = arith.cmpi sge, %0, %1 : vector<1x32xi32>
    %c8_i32 = arith.constant 8 : i32
    %3 = vector.broadcast %c8_i32 : i32 to vector<1x32xi32>
    %4 = arith.cmpi slt, %0, %3 : vector<1x32xi32>
    %5 = arith.andi %2, %4 : vector<1x32xi1>
    %6 = arith.extui %5 : vector<1x32xi1> to vector<1x32xi32>
    %7 = arith.sitofp %6 : vector<1x32xi32> to vector<1x32xf32>
    %c8_i32_0 = arith.constant 8 : i32
    %8 = vector.broadcast %c8_i32_0 : i32 to vector<1x32xi32>
    %9 = arith.cmpi sge, %0, %8 : vector<1x32xi32>
    %c16_i32 = arith.constant 16 : i32
    %10 = vector.broadcast %c16_i32 : i32 to vector<1x32xi32>
    %11 = arith.cmpi slt, %0, %10 : vector<1x32xi32>
    %12 = arith.andi %9, %11 : vector<1x32xi1>
    %13 = arith.extui %12 : vector<1x32xi1> to vector<1x32xi32>
    %14 = arith.sitofp %13 : vector<1x32xi32> to vector<1x32xf32>
    %c16_i32_1 = arith.constant 16 : i32
    %15 = vector.broadcast %c16_i32_1 : i32 to vector<1x32xi32>
    %16 = arith.cmpi sge, %0, %15 : vector<1x32xi32>
    %c24_i32 = arith.constant 24 : i32
    %17 = vector.broadcast %c24_i32 : i32 to vector<1x32xi32>
    %18 = arith.cmpi slt, %0, %17 : vector<1x32xi32>
    %19 = arith.andi %16, %18 : vector<1x32xi1>
    %20 = arith.extui %19 : vector<1x32xi1> to vector<1x32xi32>
    %21 = arith.sitofp %20 : vector<1x32xi32> to vector<1x32xf32>
    %c24_i32_2 = arith.constant 24 : i32
    %22 = vector.broadcast %c24_i32_2 : i32 to vector<1x32xi32>
    %23 = arith.cmpi sge, %0, %22 : vector<1x32xi32>
    %c32_i32 = arith.constant 32 : i32
    %24 = vector.broadcast %c32_i32 : i32 to vector<1x32xi32>
    %25 = arith.cmpi slt, %0, %24 : vector<1x32xi32>
    %26 = arith.andi %23, %25 : vector<1x32xi1>
    %27 = arith.extui %26 : vector<1x32xi1> to vector<1x32xi32>
    %28 = arith.sitofp %27 : vector<1x32xi32> to vector<1x32xf32>
    %29 = tpu.iota {dimensions = array<i32: 0>} : vector<16x16xi32>
    %30 = tpu.iota {dimensions = array<i32: 1>} : vector<16x16xi32>
    %c0_i32_3 = arith.constant 0 : i32
    %31 = vector.broadcast %c0_i32_3 : i32 to vector<16x16xi32>
    %32 = arith.cmpi slt, %29, %31 : vector<16x16xi32>
    %c0_i32_4 = arith.constant 0 : i32
    %33 = vector.broadcast %c0_i32_4 : i32 to vector<16x16xi32>
    %34 = arith.cmpi sge, %29, %33 : vector<16x16xi32>
    %c8_i32_5 = arith.constant 8 : i32
    %35 = vector.broadcast %c8_i32_5 : i32 to vector<16x16xi32>
    %36 = arith.cmpi slt, %29, %35 : vector<16x16xi32>
    %37 = arith.andi %34, %36 : vector<16x16xi1>
    %c0_i32_6 = arith.constant 0 : i32
    %38 = vector.broadcast %c0_i32_6 : i32 to vector<16x16xi32>
    %39 = arith.cmpi sge, %30, %38 : vector<16x16xi32>
    %40 = arith.andi %37, %39 : vector<16x16xi1>
    %c8_i32_7 = arith.constant 8 : i32
    %41 = vector.broadcast %c8_i32_7 : i32 to vector<16x16xi32>
    %42 = arith.cmpi slt, %30, %41 : vector<16x16xi32>
    %43 = arith.andi %40, %42 : vector<16x16xi1>
    %c0_i32_8 = arith.constant 0 : i32
    %44 = vector.broadcast %c0_i32_8 : i32 to vector<16x16xi32>
    %45 = arith.subi %30, %44 : vector<16x16xi32>
    %c0_i32_9 = arith.constant 0 : i32
    %46 = vector.broadcast %c0_i32_9 : i32 to vector<16x16xi32>
    %47 = arith.subi %29, %46 : vector<16x16xi32>
    %48 = arith.cmpi sle, %45, %47 : vector<16x16xi32>
    %49 = arith.andi %43, %48 : vector<16x16xi1>
    %50 = arith.ori %32, %49 : vector<16x16xi1>
    %c8_i32_10 = arith.constant 8 : i32
    %51 = vector.broadcast %c8_i32_10 : i32 to vector<16x16xi32>
    %52 = arith.cmpi sge, %29, %51 : vector<16x16xi32>
    %c16_i32_11 = arith.constant 16 : i32
    %53 = vector.broadcast %c16_i32_11 : i32 to vector<16x16xi32>
    %54 = arith.cmpi slt, %29, %53 : vector<16x16xi32>
    %55 = arith.andi %52, %54 : vector<16x16xi1>
    %c8_i32_12 = arith.constant 8 : i32
    %56 = vector.broadcast %c8_i32_12 : i32 to vector<16x16xi32>
    %57 = arith.cmpi sge, %30, %56 : vector<16x16xi32>
    %58 = arith.andi %55, %57 : vector<16x16xi1>
    %c16_i32_13 = arith.constant 16 : i32
    %59 = vector.broadcast %c16_i32_13 : i32 to vector<16x16xi32>
    %60 = arith.cmpi slt, %30, %59 : vector<16x16xi32>
    %61 = arith.andi %58, %60 : vector<16x16xi1>
    %c8_i32_14 = arith.constant 8 : i32
    %62 = vector.broadcast %c8_i32_14 : i32 to vector<16x16xi32>
    %63 = arith.subi %30, %62 : vector<16x16xi32>
    %c8_i32_15 = arith.constant 8 : i32
    %64 = vector.broadcast %c8_i32_15 : i32 to vector<16x16xi32>
    %65 = arith.subi %29, %64 : vector<16x16xi32>
    %66 = arith.cmpi sle, %63, %65 : vector<16x16xi32>
    %67 = arith.andi %61, %66 : vector<16x16xi1>
    %68 = arith.ori %50, %67 : vector<16x16xi1>
    %cst = arith.constant 0.000000e+00 : f32
    %cst_16 = arith.constant -1.000000e+09 : f32
    %69 = vector.broadcast %cst : f32 to vector<16x16xf32>
    %70 = vector.broadcast %cst_16 : f32 to vector<16x16xf32>
    %71 = arith.select %68, %69, %70 : vector<16x16xi1>, vector<16x16xf32>
    %72 = tpu.iota {dimensions = array<i32: 0>} : vector<16x24xi32>
    %73 = tpu.iota {dimensions = array<i32: 1>} : vector<16x24xi32>
    %c0_i32_17 = arith.constant 0 : i32
    %74 = vector.broadcast %c0_i32_17 : i32 to vector<16x24xi32>
    %75 = arith.cmpi slt, %72, %74 : vector<16x24xi32>
    %c0_i32_18 = arith.constant 0 : i32
    %76 = vector.broadcast %c0_i32_18 : i32 to vector<16x24xi32>
    %77 = arith.cmpi sge, %72, %76 : vector<16x24xi32>
    %c8_i32_19 = arith.constant 8 : i32
    %78 = vector.broadcast %c8_i32_19 : i32 to vector<16x24xi32>
    %79 = arith.cmpi slt, %72, %78 : vector<16x24xi32>
    %80 = arith.andi %77, %79 : vector<16x24xi1>
    %c0_i32_20 = arith.constant 0 : i32
    %81 = vector.broadcast %c0_i32_20 : i32 to vector<16x24xi32>
    %82 = arith.cmpi sge, %73, %81 : vector<16x24xi32>
    %83 = arith.andi %80, %82 : vector<16x24xi1>
    %c12_i32 = arith.constant 12 : i32
    %84 = vector.broadcast %c12_i32 : i32 to vector<16x24xi32>
    %85 = arith.cmpi slt, %73, %84 : vector<16x24xi32>
    %86 = arith.andi %83, %85 : vector<16x24xi1>
    %87 = arith.ori %75, %86 : vector<16x24xi1>
    %c8_i32_21 = arith.constant 8 : i32
    %88 = vector.broadcast %c8_i32_21 : i32 to vector<16x24xi32>
    %89 = arith.cmpi sge, %72, %88 : vector<16x24xi32>
    %c16_i32_22 = arith.constant 16 : i32
    %90 = vector.broadcast %c16_i32_22 : i32 to vector<16x24xi32>
    %91 = arith.cmpi slt, %72, %90 : vector<16x24xi32>
    %92 = arith.andi %89, %91 : vector<16x24xi1>
    %c12_i32_23 = arith.constant 12 : i32
    %93 = vector.broadcast %c12_i32_23 : i32 to vector<16x24xi32>
    %94 = arith.cmpi sge, %73, %93 : vector<16x24xi32>
    %95 = arith.andi %92, %94 : vector<16x24xi1>
    %c24_i32_24 = arith.constant 24 : i32
    %96 = vector.broadcast %c24_i32_24 : i32 to vector<16x24xi32>
    %97 = arith.cmpi slt, %73, %96 : vector<16x24xi32>
    %98 = arith.andi %95, %97 : vector<16x24xi1>
    %99 = arith.ori %87, %98 : vector<16x24xi1>
    %cst_25 = arith.constant 0.000000e+00 : f32
    %cst_26 = arith.constant -1.000000e+09 : f32
    %100 = vector.broadcast %cst_25 : f32 to vector<16x24xf32>
    %101 = vector.broadcast %cst_26 : f32 to vector<16x24xf32>
    %102 = arith.select %99, %100, %101 : vector<16x24xi1>, vector<16x24xf32>
    %c0 = arith.constant 0 : index
    %c0_27 = arith.constant 0 : index
    %103 = vector.load %arg1[%c0, %c0_27] : memref<24x32xf32, #tpu.memory_space<vmem>>, vector<24x32xf32>
    %c0_28 = arith.constant 0 : index
    %c0_29 = arith.constant 0 : index
    %104 = vector.load %arg0[%c0_28, %c0_29] : memref<16x32xf32, #tpu.memory_space<vmem>>, vector<16x32xf32>
    %c0_30 = arith.constant 0 : index
    %c0_31 = arith.constant 0 : index
    %105 = vector.load %arg2[%c0_30, %c0_31] : memref<1x32xf32, #tpu.memory_space<vmem>>, vector<1x32xf32>
    %c0_32 = arith.constant 0 : index
    %c0_33 = arith.constant 0 : index
    %106 = vector.load %arg3[%c0_32, %c0_33] : memref<1x32xf32, #tpu.memory_space<vmem>>, vector<1x32xf32>
    %cst_34 = arith.constant dense<0.000000e+00> : vector<16xf32>
    %107 = vector.multi_reduction <add>, %104, %cst_34 [1] : vector<16x32xf32> to vector<16xf32>
    %108 = vector.shape_cast %107 : vector<16xf32> to vector<16x1xf32>
    %cst_35 = arith.constant 3.200000e+01 : f32
    %109 = vector.broadcast %cst_35 : f32 to vector<16x1xf32>
    %110 = arith.divf %108, %109 : vector<16x1xf32>
    %111 = vector.broadcast %110 : vector<16x1xf32> to vector<16x32xf32>
    %112 = arith.subf %104, %111 : vector<16x32xf32>
    %113 = arith.mulf %112, %112 : vector<16x32xf32>
    %cst_36 = arith.constant dense<0.000000e+00> : vector<16xf32>
    %114 = vector.multi_reduction <add>, %113, %cst_36 [1] : vector<16x32xf32> to vector<16xf32>
    %115 = vector.shape_cast %114 : vector<16xf32> to vector<16x1xf32>
    %cst_37 = arith.constant 3.200000e+01 : f32
    %116 = vector.broadcast %cst_37 : f32 to vector<16x1xf32>
    %117 = arith.divf %115, %116 : vector<16x1xf32>
    %118 = vector.broadcast %110 : vector<16x1xf32> to vector<16x32xf32>
    %119 = arith.subf %104, %118 : vector<16x32xf32>
    %cst_38 = arith.constant 9.99999974E-6 : f32
    %120 = vector.broadcast %cst_38 : f32 to vector<16x1xf32>
    %121 = arith.addf %117, %120 : vector<16x1xf32>
    %122 = math.rsqrt %121 : vector<16x1xf32>
    %123 = vector.broadcast %122 : vector<16x1xf32> to vector<16x32xf32>
    %124 = arith.mulf %119, %123 : vector<16x32xf32>
    %125 = vector.broadcast %105 : vector<1x32xf32> to vector<16x32xf32>
    %126 = arith.mulf %124, %125 : vector<16x32xf32>
    %127 = vector.broadcast %106 : vector<1x32xf32> to vector<16x32xf32>
    %128 = arith.addf %126, %127 : vector<16x32xf32>
    %c0_39 = arith.constant 0 : index
    %c0_40 = arith.constant 0 : index
    %c0_41 = arith.constant 0 : index
    %129 = vector.load %arg4[%c0_39, %c0_40, %c0_41] : memref<2x32x32xf32, #tpu.memory_space<vmem>>, vector<1x32x32xf32>
    %130 = vector.shape_cast %129 : vector<1x32x32xf32> to vector<32x32xf32>
    %c0_42 = arith.constant 0 : index
    %c0_43 = arith.constant 0 : index
    %c0_44 = arith.constant 0 : index
    %131 = vector.load %arg5[%c0_42, %c0_43, %c0_44] : memref<2x1x32xf32, #tpu.memory_space<vmem>>, vector<1x1x32xf32>
    %132 = vector.shape_cast %131 : vector<1x1x32xf32> to vector<1x32xf32>
    %cst_45 = arith.constant dense<0.000000e+00> : vector<16x32xf32>
    %133 = tpu.matmul %128, %130, %cst_45 {dimension_numbers = #tpu.dot_dimension_numbers<[1], [0], [0], [1], [0, 0, 1, 1], [], []>} : vector<16x32xf32>, vector<32x32xf32>, vector<16x32xf32> -> vector<16x32xf32>
    %134 = vector.broadcast %132 : vector<1x32xf32> to vector<16x32xf32>
    %135 = arith.addf %133, %134 : vector<16x32xf32>
    %cst_46 = arith.constant 0.353553385 : f32
    %136 = vector.broadcast %cst_46 : f32 to vector<16x32xf32>
    %137 = arith.mulf %135, %136 : vector<16x32xf32>
    %c0_47 = arith.constant 0 : index
    %c0_48 = arith.constant 0 : index
    %c0_49 = arith.constant 0 : index
    %138 = vector.load %arg6[%c0_47, %c0_48, %c0_49] : memref<2x32x32xf32, #tpu.memory_space<vmem>>, vector<1x32x32xf32>
    %139 = vector.shape_cast %138 : vector<1x32x32xf32> to vector<32x32xf32>
    %c0_50 = arith.constant 0 : index
    %c0_51 = arith.constant 0 : index
    %c0_52 = arith.constant 0 : index
    %140 = vector.load %arg7[%c0_50, %c0_51, %c0_52] : memref<2x1x32xf32, #tpu.memory_space<vmem>>, vector<1x1x32xf32>
    %141 = vector.shape_cast %140 : vector<1x1x32xf32> to vector<1x32xf32>
    %cst_53 = arith.constant dense<0.000000e+00> : vector<16x32xf32>
    %142 = tpu.matmul %128, %139, %cst_53 {dimension_numbers = #tpu.dot_dimension_numbers<[1], [0], [0], [1], [0, 0, 1, 1], [], []>} : vector<16x32xf32>, vector<32x32xf32>, vector<16x32xf32> -> vector<16x32xf32>
    %143 = vector.broadcast %141 : vector<1x32xf32> to vector<16x32xf32>
    %144 = arith.addf %142, %143 : vector<16x32xf32>
    %c0_54 = arith.constant 0 : index
    %c0_55 = arith.constant 0 : index
    %c0_56 = arith.constant 0 : index
    %145 = vector.load %arg8[%c0_54, %c0_55, %c0_56] : memref<2x32x32xf32, #tpu.memory_space<vmem>>, vector<1x32x32xf32>
    %146 = vector.shape_cast %145 : vector<1x32x32xf32> to vector<32x32xf32>
    %c0_57 = arith.constant 0 : index
    %c0_58 = arith.constant 0 : index
    %c0_59 = arith.constant 0 : index
    %147 = vector.load %arg9[%c0_57, %c0_58, %c0_59] : memref<2x1x32xf32, #tpu.memory_space<vmem>>, vector<1x1x32xf32>
    %148 = vector.shape_cast %147 : vector<1x1x32xf32> to vector<1x32xf32>
    %cst_60 = arith.constant dense<0.000000e+00> : vector<16x32xf32>
    %149 = tpu.matmul %128, %146, %cst_60 {dimension_numbers = #tpu.dot_dimension_numbers<[1], [0], [0], [1], [0, 0, 1, 1], [], []>} : vector<16x32xf32>, vector<32x32xf32>, vector<16x32xf32> -> vector<16x32xf32>
    %150 = vector.broadcast %148 : vector<1x32xf32> to vector<16x32xf32>
    %151 = arith.addf %149, %150 : vector<16x32xf32>
    %cst_61 = arith.constant 0.000000e+00 : f32
    %152 = vector.broadcast %cst_61 : f32 to vector<16x32xf32>
    %153 = vector.broadcast %7 : vector<1x32xf32> to vector<16x32xf32>
    %154 = arith.mulf %137, %153 : vector<16x32xf32>
    %155 = vector.broadcast %7 : vector<1x32xf32> to vector<16x32xf32>
    %156 = arith.mulf %144, %155 : vector<16x32xf32>
    %cst_62 = arith.constant dense<0.000000e+00> : vector<16x16xf32>
    %157 = tpu.matmul %154, %156, %cst_62 {dimension_numbers = #tpu.dot_dimension_numbers<[1], [1], [0], [0], [0, 0, 1, 0], [], []>} : vector<16x32xf32>, vector<16x32xf32>, vector<16x16xf32> -> vector<16x16xf32>
    %158 = arith.addf %157, %71 : vector<16x16xf32>
    %cst_63 = arith.constant dense<0xFF800000> : vector<16xf32>
    %159 = vector.multi_reduction <maximumf>, %158, %cst_63 [1] : vector<16x16xf32> to vector<16xf32>
    %160 = vector.shape_cast %159 : vector<16xf32> to vector<16x1xf32>
    %161 = vector.broadcast %160 : vector<16x1xf32> to vector<16x16xf32>
    %162 = arith.subf %158, %161 : vector<16x16xf32>
    %163 = math.exp %162 : vector<16x16xf32>
    %cst_64 = arith.constant dense<0.000000e+00> : vector<16xf32>
    %164 = vector.multi_reduction <add>, %163, %cst_64 [1] : vector<16x16xf32> to vector<16xf32>
    %165 = vector.shape_cast %164 : vector<16xf32> to vector<16x1xf32>
    %166 = vector.broadcast %165 : vector<16x1xf32> to vector<16x16xf32>
    %167 = arith.divf %163, %166 : vector<16x16xf32>
    %168 = vector.broadcast %7 : vector<1x32xf32> to vector<16x32xf32>
    %169 = arith.mulf %151, %168 : vector<16x32xf32>
    %cst_65 = arith.constant dense<0.000000e+00> : vector<16x32xf32>
    %170 = tpu.matmul %167, %169, %cst_65 {dimension_numbers = #tpu.dot_dimension_numbers<[1], [0], [0], [1], [0, 0, 1, 1], [], []>} : vector<16x16xf32>, vector<16x32xf32>, vector<16x32xf32> -> vector<16x32xf32>
    %171 = arith.addf %152, %170 : vector<16x32xf32>
    %172 = vector.broadcast %14 : vector<1x32xf32> to vector<16x32xf32>
    %173 = arith.mulf %137, %172 : vector<16x32xf32>
    %174 = vector.broadcast %14 : vector<1x32xf32> to vector<16x32xf32>
    %175 = arith.mulf %144, %174 : vector<16x32xf32>
    %cst_66 = arith.constant dense<0.000000e+00> : vector<16x16xf32>
    %176 = tpu.matmul %173, %175, %cst_66 {dimension_numbers = #tpu.dot_dimension_numbers<[1], [1], [0], [0], [0, 0, 1, 0], [], []>} : vector<16x32xf32>, vector<16x32xf32>, vector<16x16xf32> -> vector<16x16xf32>
    %177 = arith.addf %176, %71 : vector<16x16xf32>
    %cst_67 = arith.constant dense<0xFF800000> : vector<16xf32>
    %178 = vector.multi_reduction <maximumf>, %177, %cst_67 [1] : vector<16x16xf32> to vector<16xf32>
    %179 = vector.shape_cast %178 : vector<16xf32> to vector<16x1xf32>
    %180 = vector.broadcast %179 : vector<16x1xf32> to vector<16x16xf32>
    %181 = arith.subf %177, %180 : vector<16x16xf32>
    %182 = math.exp %181 : vector<16x16xf32>
    %cst_68 = arith.constant dense<0.000000e+00> : vector<16xf32>
    %183 = vector.multi_reduction <add>, %182, %cst_68 [1] : vector<16x16xf32> to vector<16xf32>
    %184 = vector.shape_cast %183 : vector<16xf32> to vector<16x1xf32>
    %185 = vector.broadcast %184 : vector<16x1xf32> to vector<16x16xf32>
    %186 = arith.divf %182, %185 : vector<16x16xf32>
    %187 = vector.broadcast %14 : vector<1x32xf32> to vector<16x32xf32>
    %188 = arith.mulf %151, %187 : vector<16x32xf32>
    %cst_69 = arith.constant dense<0.000000e+00> : vector<16x32xf32>
    %189 = tpu.matmul %186, %188, %cst_69 {dimension_numbers = #tpu.dot_dimension_numbers<[1], [0], [0], [1], [0, 0, 1, 1], [], []>} : vector<16x16xf32>, vector<16x32xf32>, vector<16x32xf32> -> vector<16x32xf32>
    %190 = arith.addf %171, %189 : vector<16x32xf32>
    %191 = vector.broadcast %21 : vector<1x32xf32> to vector<16x32xf32>
    %192 = arith.mulf %137, %191 : vector<16x32xf32>
    %193 = vector.broadcast %21 : vector<1x32xf32> to vector<16x32xf32>
    %194 = arith.mulf %144, %193 : vector<16x32xf32>
    %cst_70 = arith.constant dense<0.000000e+00> : vector<16x16xf32>
    %195 = tpu.matmul %192, %194, %cst_70 {dimension_numbers = #tpu.dot_dimension_numbers<[1], [1], [0], [0], [0, 0, 1, 0], [], []>} : vector<16x32xf32>, vector<16x32xf32>, vector<16x16xf32> -> vector<16x16xf32>
    %196 = arith.addf %195, %71 : vector<16x16xf32>
    %cst_71 = arith.constant dense<0xFF800000> : vector<16xf32>
    %197 = vector.multi_reduction <maximumf>, %196, %cst_71 [1] : vector<16x16xf32> to vector<16xf32>
    %198 = vector.shape_cast %197 : vector<16xf32> to vector<16x1xf32>
    %199 = vector.broadcast %198 : vector<16x1xf32> to vector<16x16xf32>
    %200 = arith.subf %196, %199 : vector<16x16xf32>
    %201 = math.exp %200 : vector<16x16xf32>
    %cst_72 = arith.constant dense<0.000000e+00> : vector<16xf32>
    %202 = vector.multi_reduction <add>, %201, %cst_72 [1] : vector<16x16xf32> to vector<16xf32>
    %203 = vector.shape_cast %202 : vector<16xf32> to vector<16x1xf32>
    %204 = vector.broadcast %203 : vector<16x1xf32> to vector<16x16xf32>
    %205 = arith.divf %201, %204 : vector<16x16xf32>
    %206 = vector.broadcast %21 : vector<1x32xf32> to vector<16x32xf32>
    %207 = arith.mulf %151, %206 : vector<16x32xf32>
    %cst_73 = arith.constant dense<0.000000e+00> : vector<16x32xf32>
    %208 = tpu.matmul %205, %207, %cst_73 {dimension_numbers = #tpu.dot_dimension_numbers<[1], [0], [0], [1], [0, 0, 1, 1], [], []>} : vector<16x16xf32>, vector<16x32xf32>, vector<16x32xf32> -> vector<16x32xf32>
    %209 = arith.addf %190, %208 : vector<16x32xf32>
    %210 = vector.broadcast %28 : vector<1x32xf32> to vector<16x32xf32>
    %211 = arith.mulf %137, %210 : vector<16x32xf32>
    %212 = vector.broadcast %28 : vector<1x32xf32> to vector<16x32xf32>
    %213 = arith.mulf %144, %212 : vector<16x32xf32>
    %cst_74 = arith.constant dense<0.000000e+00> : vector<16x16xf32>
    %214 = tpu.matmul %211, %213, %cst_74 {dimension_numbers = #tpu.dot_dimension_numbers<[1], [1], [0], [0], [0, 0, 1, 0], [], []>} : vector<16x32xf32>, vector<16x32xf32>, vector<16x16xf32> -> vector<16x16xf32>
    %215 = arith.addf %214, %71 : vector<16x16xf32>
    %cst_75 = arith.constant dense<0xFF800000> : vector<16xf32>
    %216 = vector.multi_reduction <maximumf>, %215, %cst_75 [1] : vector<16x16xf32> to vector<16xf32>
    %217 = vector.shape_cast %216 : vector<16xf32> to vector<16x1xf32>
    %218 = vector.broadcast %217 : vector<16x1xf32> to vector<16x16xf32>
    %219 = arith.subf %215, %218 : vector<16x16xf32>
    %220 = math.exp %219 : vector<16x16xf32>
    %cst_76 = arith.constant dense<0.000000e+00> : vector<16xf32>
    %221 = vector.multi_reduction <add>, %220, %cst_76 [1] : vector<16x16xf32> to vector<16xf32>
    %222 = vector.shape_cast %221 : vector<16xf32> to vector<16x1xf32>
    %223 = vector.broadcast %222 : vector<16x1xf32> to vector<16x16xf32>
    %224 = arith.divf %220, %223 : vector<16x16xf32>
    %225 = vector.broadcast %28 : vector<1x32xf32> to vector<16x32xf32>
    %226 = arith.mulf %151, %225 : vector<16x32xf32>
    %cst_77 = arith.constant dense<0.000000e+00> : vector<16x32xf32>
    %227 = tpu.matmul %224, %226, %cst_77 {dimension_numbers = #tpu.dot_dimension_numbers<[1], [0], [0], [1], [0, 0, 1, 1], [], []>} : vector<16x16xf32>, vector<16x32xf32>, vector<16x32xf32> -> vector<16x32xf32>
    %228 = arith.addf %209, %227 : vector<16x32xf32>
    %c0_78 = arith.constant 0 : index
    %c0_79 = arith.constant 0 : index
    %c0_80 = arith.constant 0 : index
    %229 = vector.load %arg10[%c0_78, %c0_79, %c0_80] : memref<2x32x32xf32, #tpu.memory_space<vmem>>, vector<1x32x32xf32>
    %230 = vector.shape_cast %229 : vector<1x32x32xf32> to vector<32x32xf32>
    %c0_81 = arith.constant 0 : index
    %c0_82 = arith.constant 0 : index
    %c0_83 = arith.constant 0 : index
    %231 = vector.load %arg11[%c0_81, %c0_82, %c0_83] : memref<2x1x32xf32, #tpu.memory_space<vmem>>, vector<1x1x32xf32>
    %232 = vector.shape_cast %231 : vector<1x1x32xf32> to vector<1x32xf32>
    %cst_84 = arith.constant dense<0.000000e+00> : vector<16x32xf32>
    %233 = tpu.matmul %228, %230, %cst_84 {dimension_numbers = #tpu.dot_dimension_numbers<[1], [0], [0], [1], [0, 0, 1, 1], [], []>} : vector<16x32xf32>, vector<32x32xf32>, vector<16x32xf32> -> vector<16x32xf32>
    %234 = vector.broadcast %232 : vector<1x32xf32> to vector<16x32xf32>
    %235 = arith.addf %233, %234 : vector<16x32xf32>
    %236 = arith.addf %128, %235 : vector<16x32xf32>
    %c0_85 = arith.constant 0 : index
    %c0_86 = arith.constant 0 : index
    %c0_87 = arith.constant 0 : index
    %237 = vector.load %arg12[%c0_85, %c0_86, %c0_87] : memref<2x1x32xf32, #tpu.memory_space<vmem>>, vector<1x1x32xf32>
    %238 = vector.shape_cast %237 : vector<1x1x32xf32> to vector<1x32xf32>
    %c0_88 = arith.constant 0 : index
    %c0_89 = arith.constant 0 : index
    %c0_90 = arith.constant 0 : index
    %239 = vector.load %arg13[%c0_88, %c0_89, %c0_90] : memref<2x1x32xf32, #tpu.memory_space<vmem>>, vector<1x1x32xf32>
    %240 = vector.shape_cast %239 : vector<1x1x32xf32> to vector<1x32xf32>
    %cst_91 = arith.constant dense<0.000000e+00> : vector<16xf32>
    %241 = vector.multi_reduction <add>, %236, %cst_91 [1] : vector<16x32xf32> to vector<16xf32>
    %242 = vector.shape_cast %241 : vector<16xf32> to vector<16x1xf32>
    %cst_92 = arith.constant 3.200000e+01 : f32
    %243 = vector.broadcast %cst_92 : f32 to vector<16x1xf32>
    %244 = arith.divf %242, %243 : vector<16x1xf32>
    %245 = vector.broadcast %244 : vector<16x1xf32> to vector<16x32xf32>
    %246 = arith.subf %236, %245 : vector<16x32xf32>
    %247 = arith.mulf %246, %246 : vector<16x32xf32>
    %cst_93 = arith.constant dense<0.000000e+00> : vector<16xf32>
    %248 = vector.multi_reduction <add>, %247, %cst_93 [1] : vector<16x32xf32> to vector<16xf32>
    %249 = vector.shape_cast %248 : vector<16xf32> to vector<16x1xf32>
    %cst_94 = arith.constant 3.200000e+01 : f32
    %250 = vector.broadcast %cst_94 : f32 to vector<16x1xf32>
    %251 = arith.divf %249, %250 : vector<16x1xf32>
    %252 = vector.broadcast %244 : vector<16x1xf32> to vector<16x32xf32>
    %253 = arith.subf %236, %252 : vector<16x32xf32>
    %cst_95 = arith.constant 9.99999974E-6 : f32
    %254 = vector.broadcast %cst_95 : f32 to vector<16x1xf32>
    %255 = arith.addf %251, %254 : vector<16x1xf32>
    %256 = math.rsqrt %255 : vector<16x1xf32>
    %257 = vector.broadcast %256 : vector<16x1xf32> to vector<16x32xf32>
    %258 = arith.mulf %253, %257 : vector<16x32xf32>
    %259 = vector.broadcast %238 : vector<1x32xf32> to vector<16x32xf32>
    %260 = arith.mulf %258, %259 : vector<16x32xf32>
    %261 = vector.broadcast %240 : vector<1x32xf32> to vector<16x32xf32>
    %262 = arith.addf %260, %261 : vector<16x32xf32>
    %c0_96 = arith.constant 0 : index
    %c0_97 = arith.constant 0 : index
    %c0_98 = arith.constant 0 : index
    %263 = vector.load %arg14[%c0_96, %c0_97, %c0_98] : memref<2x32x32xf32, #tpu.memory_space<vmem>>, vector<1x32x32xf32>
    %264 = vector.shape_cast %263 : vector<1x32x32xf32> to vector<32x32xf32>
    %c0_99 = arith.constant 0 : index
    %c0_100 = arith.constant 0 : index
    %c0_101 = arith.constant 0 : index
    %265 = vector.load %arg15[%c0_99, %c0_100, %c0_101] : memref<2x1x32xf32, #tpu.memory_space<vmem>>, vector<1x1x32xf32>
    %266 = vector.shape_cast %265 : vector<1x1x32xf32> to vector<1x32xf32>
    %cst_102 = arith.constant dense<0.000000e+00> : vector<16x32xf32>
    %267 = tpu.matmul %262, %264, %cst_102 {dimension_numbers = #tpu.dot_dimension_numbers<[1], [0], [0], [1], [0, 0, 1, 1], [], []>} : vector<16x32xf32>, vector<32x32xf32>, vector<16x32xf32> -> vector<16x32xf32>
    %268 = vector.broadcast %266 : vector<1x32xf32> to vector<16x32xf32>
    %269 = arith.addf %267, %268 : vector<16x32xf32>
    %cst_103 = arith.constant 0.353553385 : f32
    %270 = vector.broadcast %cst_103 : f32 to vector<16x32xf32>
    %271 = arith.mulf %269, %270 : vector<16x32xf32>
    %c0_104 = arith.constant 0 : index
    %c0_105 = arith.constant 0 : index
    %c0_106 = arith.constant 0 : index
    %272 = vector.load %arg16[%c0_104, %c0_105, %c0_106] : memref<2x32x32xf32, #tpu.memory_space<vmem>>, vector<1x32x32xf32>
    %273 = vector.shape_cast %272 : vector<1x32x32xf32> to vector<32x32xf32>
    %c0_107 = arith.constant 0 : index
    %c0_108 = arith.constant 0 : index
    %c0_109 = arith.constant 0 : index
    %274 = vector.load %arg17[%c0_107, %c0_108, %c0_109] : memref<2x1x32xf32, #tpu.memory_space<vmem>>, vector<1x1x32xf32>
    %275 = vector.shape_cast %274 : vector<1x1x32xf32> to vector<1x32xf32>
    %cst_110 = arith.constant dense<0.000000e+00> : vector<24x32xf32>
    %276 = tpu.matmul %103, %273, %cst_110 {dimension_numbers = #tpu.dot_dimension_numbers<[1], [0], [0], [1], [0, 0, 1, 1], [], []>} : vector<24x32xf32>, vector<32x32xf32>, vector<24x32xf32> -> vector<24x32xf32>
    %277 = vector.broadcast %275 : vector<1x32xf32> to vector<24x32xf32>
    %278 = arith.addf %276, %277 : vector<24x32xf32>
    %c0_111 = arith.constant 0 : index
    %c0_112 = arith.constant 0 : index
    %c0_113 = arith.constant 0 : index
    %279 = vector.load %arg18[%c0_111, %c0_112, %c0_113] : memref<2x32x32xf32, #tpu.memory_space<vmem>>, vector<1x32x32xf32>
    %280 = vector.shape_cast %279 : vector<1x32x32xf32> to vector<32x32xf32>
    %c0_114 = arith.constant 0 : index
    %c0_115 = arith.constant 0 : index
    %c0_116 = arith.constant 0 : index
    %281 = vector.load %arg19[%c0_114, %c0_115, %c0_116] : memref<2x1x32xf32, #tpu.memory_space<vmem>>, vector<1x1x32xf32>
    %282 = vector.shape_cast %281 : vector<1x1x32xf32> to vector<1x32xf32>
    %cst_117 = arith.constant dense<0.000000e+00> : vector<24x32xf32>
    %283 = tpu.matmul %103, %280, %cst_117 {dimension_numbers = #tpu.dot_dimension_numbers<[1], [0], [0], [1], [0, 0, 1, 1], [], []>} : vector<24x32xf32>, vector<32x32xf32>, vector<24x32xf32> -> vector<24x32xf32>
    %284 = vector.broadcast %282 : vector<1x32xf32> to vector<24x32xf32>
    %285 = arith.addf %283, %284 : vector<24x32xf32>
    %cst_118 = arith.constant 0.000000e+00 : f32
    %286 = vector.broadcast %cst_118 : f32 to vector<16x32xf32>
    %287 = vector.broadcast %7 : vector<1x32xf32> to vector<16x32xf32>
    %288 = arith.mulf %271, %287 : vector<16x32xf32>
    %289 = vector.broadcast %7 : vector<1x32xf32> to vector<24x32xf32>
    %290 = arith.mulf %278, %289 : vector<24x32xf32>
    %cst_119 = arith.constant dense<0.000000e+00> : vector<16x24xf32>
    %291 = tpu.matmul %288, %290, %cst_119 {dimension_numbers = #tpu.dot_dimension_numbers<[1], [1], [0], [0], [0, 0, 1, 0], [], []>} : vector<16x32xf32>, vector<24x32xf32>, vector<16x24xf32> -> vector<16x24xf32>
    %292 = arith.addf %291, %102 : vector<16x24xf32>
    %cst_120 = arith.constant dense<0xFF800000> : vector<16xf32>
    %293 = vector.multi_reduction <maximumf>, %292, %cst_120 [1] : vector<16x24xf32> to vector<16xf32>
    %294 = vector.shape_cast %293 : vector<16xf32> to vector<16x1xf32>
    %295 = vector.broadcast %294 : vector<16x1xf32> to vector<16x24xf32>
    %296 = arith.subf %292, %295 : vector<16x24xf32>
    %297 = math.exp %296 : vector<16x24xf32>
    %cst_121 = arith.constant dense<0.000000e+00> : vector<16xf32>
    %298 = vector.multi_reduction <add>, %297, %cst_121 [1] : vector<16x24xf32> to vector<16xf32>
    %299 = vector.shape_cast %298 : vector<16xf32> to vector<16x1xf32>
    %300 = vector.broadcast %299 : vector<16x1xf32> to vector<16x24xf32>
    %301 = arith.divf %297, %300 : vector<16x24xf32>
    %302 = vector.broadcast %7 : vector<1x32xf32> to vector<24x32xf32>
    %303 = arith.mulf %285, %302 : vector<24x32xf32>
    %cst_122 = arith.constant dense<0.000000e+00> : vector<16x32xf32>
    %304 = tpu.matmul %301, %303, %cst_122 {dimension_numbers = #tpu.dot_dimension_numbers<[1], [0], [0], [1], [0, 0, 1, 1], [], []>} : vector<16x24xf32>, vector<24x32xf32>, vector<16x32xf32> -> vector<16x32xf32>
    %305 = arith.addf %286, %304 : vector<16x32xf32>
    %306 = vector.broadcast %14 : vector<1x32xf32> to vector<16x32xf32>
    %307 = arith.mulf %271, %306 : vector<16x32xf32>
    %308 = vector.broadcast %14 : vector<1x32xf32> to vector<24x32xf32>
    %309 = arith.mulf %278, %308 : vector<24x32xf32>
    %cst_123 = arith.constant dense<0.000000e+00> : vector<16x24xf32>
    %310 = tpu.matmul %307, %309, %cst_123 {dimension_numbers = #tpu.dot_dimension_numbers<[1], [1], [0], [0], [0, 0, 1, 0], [], []>} : vector<16x32xf32>, vector<24x32xf32>, vector<16x24xf32> -> vector<16x24xf32>
    %311 = arith.addf %310, %102 : vector<16x24xf32>
    %cst_124 = arith.constant dense<0xFF800000> : vector<16xf32>
    %312 = vector.multi_reduction <maximumf>, %311, %cst_124 [1] : vector<16x24xf32> to vector<16xf32>
    %313 = vector.shape_cast %312 : vector<16xf32> to vector<16x1xf32>
    %314 = vector.broadcast %313 : vector<16x1xf32> to vector<16x24xf32>
    %315 = arith.subf %311, %314 : vector<16x24xf32>
    %316 = math.exp %315 : vector<16x24xf32>
    %cst_125 = arith.constant dense<0.000000e+00> : vector<16xf32>
    %317 = vector.multi_reduction <add>, %316, %cst_125 [1] : vector<16x24xf32> to vector<16xf32>
    %318 = vector.shape_cast %317 : vector<16xf32> to vector<16x1xf32>
    %319 = vector.broadcast %318 : vector<16x1xf32> to vector<16x24xf32>
    %320 = arith.divf %316, %319 : vector<16x24xf32>
    %321 = vector.broadcast %14 : vector<1x32xf32> to vector<24x32xf32>
    %322 = arith.mulf %285, %321 : vector<24x32xf32>
    %cst_126 = arith.constant dense<0.000000e+00> : vector<16x32xf32>
    %323 = tpu.matmul %320, %322, %cst_126 {dimension_numbers = #tpu.dot_dimension_numbers<[1], [0], [0], [1], [0, 0, 1, 1], [], []>} : vector<16x24xf32>, vector<24x32xf32>, vector<16x32xf32> -> vector<16x32xf32>
    %324 = arith.addf %305, %323 : vector<16x32xf32>
    %325 = vector.broadcast %21 : vector<1x32xf32> to vector<16x32xf32>
    %326 = arith.mulf %271, %325 : vector<16x32xf32>
    %327 = vector.broadcast %21 : vector<1x32xf32> to vector<24x32xf32>
    %328 = arith.mulf %278, %327 : vector<24x32xf32>
    %cst_127 = arith.constant dense<0.000000e+00> : vector<16x24xf32>
    %329 = tpu.matmul %326, %328, %cst_127 {dimension_numbers = #tpu.dot_dimension_numbers<[1], [1], [0], [0], [0, 0, 1, 0], [], []>} : vector<16x32xf32>, vector<24x32xf32>, vector<16x24xf32> -> vector<16x24xf32>
    %330 = arith.addf %329, %102 : vector<16x24xf32>
    %cst_128 = arith.constant dense<0xFF800000> : vector<16xf32>
    %331 = vector.multi_reduction <maximumf>, %330, %cst_128 [1] : vector<16x24xf32> to vector<16xf32>
    %332 = vector.shape_cast %331 : vector<16xf32> to vector<16x1xf32>
    %333 = vector.broadcast %332 : vector<16x1xf32> to vector<16x24xf32>
    %334 = arith.subf %330, %333 : vector<16x24xf32>
    %335 = math.exp %334 : vector<16x24xf32>
    %cst_129 = arith.constant dense<0.000000e+00> : vector<16xf32>
    %336 = vector.multi_reduction <add>, %335, %cst_129 [1] : vector<16x24xf32> to vector<16xf32>
    %337 = vector.shape_cast %336 : vector<16xf32> to vector<16x1xf32>
    %338 = vector.broadcast %337 : vector<16x1xf32> to vector<16x24xf32>
    %339 = arith.divf %335, %338 : vector<16x24xf32>
    %340 = vector.broadcast %21 : vector<1x32xf32> to vector<24x32xf32>
    %341 = arith.mulf %285, %340 : vector<24x32xf32>
    %cst_130 = arith.constant dense<0.000000e+00> : vector<16x32xf32>
    %342 = tpu.matmul %339, %341, %cst_130 {dimension_numbers = #tpu.dot_dimension_numbers<[1], [0], [0], [1], [0, 0, 1, 1], [], []>} : vector<16x24xf32>, vector<24x32xf32>, vector<16x32xf32> -> vector<16x32xf32>
    %343 = arith.addf %324, %342 : vector<16x32xf32>
    %344 = vector.broadcast %28 : vector<1x32xf32> to vector<16x32xf32>
    %345 = arith.mulf %271, %344 : vector<16x32xf32>
    %346 = vector.broadcast %28 : vector<1x32xf32> to vector<24x32xf32>
    %347 = arith.mulf %278, %346 : vector<24x32xf32>
    %cst_131 = arith.constant dense<0.000000e+00> : vector<16x24xf32>
    %348 = tpu.matmul %345, %347, %cst_131 {dimension_numbers = #tpu.dot_dimension_numbers<[1], [1], [0], [0], [0, 0, 1, 0], [], []>} : vector<16x32xf32>, vector<24x32xf32>, vector<16x24xf32> -> vector<16x24xf32>
    %349 = arith.addf %348, %102 : vector<16x24xf32>
    %cst_132 = arith.constant dense<0xFF800000> : vector<16xf32>
    %350 = vector.multi_reduction <maximumf>, %349, %cst_132 [1] : vector<16x24xf32> to vector<16xf32>
    %351 = vector.shape_cast %350 : vector<16xf32> to vector<16x1xf32>
    %352 = vector.broadcast %351 : vector<16x1xf32> to vector<16x24xf32>
    %353 = arith.subf %349, %352 : vector<16x24xf32>
    %354 = math.exp %353 : vector<16x24xf32>
    %cst_133 = arith.constant dense<0.000000e+00> : vector<16xf32>
    %355 = vector.multi_reduction <add>, %354, %cst_133 [1] : vector<16x24xf32> to vector<16xf32>
    %356 = vector.shape_cast %355 : vector<16xf32> to vector<16x1xf32>
    %357 = vector.broadcast %356 : vector<16x1xf32> to vector<16x24xf32>
    %358 = arith.divf %354, %357 : vector<16x24xf32>
    %359 = vector.broadcast %28 : vector<1x32xf32> to vector<24x32xf32>
    %360 = arith.mulf %285, %359 : vector<24x32xf32>
    %cst_134 = arith.constant dense<0.000000e+00> : vector<16x32xf32>
    %361 = tpu.matmul %358, %360, %cst_134 {dimension_numbers = #tpu.dot_dimension_numbers<[1], [0], [0], [1], [0, 0, 1, 1], [], []>} : vector<16x24xf32>, vector<24x32xf32>, vector<16x32xf32> -> vector<16x32xf32>
    %362 = arith.addf %343, %361 : vector<16x32xf32>
    %c0_135 = arith.constant 0 : index
    %c0_136 = arith.constant 0 : index
    %c0_137 = arith.constant 0 : index
    %363 = vector.load %arg20[%c0_135, %c0_136, %c0_137] : memref<2x32x32xf32, #tpu.memory_space<vmem>>, vector<1x32x32xf32>
    %364 = vector.shape_cast %363 : vector<1x32x32xf32> to vector<32x32xf32>
    %c0_138 = arith.constant 0 : index
    %c0_139 = arith.constant 0 : index
    %c0_140 = arith.constant 0 : index
    %365 = vector.load %arg21[%c0_138, %c0_139, %c0_140] : memref<2x1x32xf32, #tpu.memory_space<vmem>>, vector<1x1x32xf32>
    %366 = vector.shape_cast %365 : vector<1x1x32xf32> to vector<1x32xf32>
    %cst_141 = arith.constant dense<0.000000e+00> : vector<16x32xf32>
    %367 = tpu.matmul %362, %364, %cst_141 {dimension_numbers = #tpu.dot_dimension_numbers<[1], [0], [0], [1], [0, 0, 1, 1], [], []>} : vector<16x32xf32>, vector<32x32xf32>, vector<16x32xf32> -> vector<16x32xf32>
    %368 = vector.broadcast %366 : vector<1x32xf32> to vector<16x32xf32>
    %369 = arith.addf %367, %368 : vector<16x32xf32>
    %370 = arith.addf %262, %369 : vector<16x32xf32>
    %c0_142 = arith.constant 0 : index
    %c0_143 = arith.constant 0 : index
    %c0_144 = arith.constant 0 : index
    %371 = vector.load %arg22[%c0_142, %c0_143, %c0_144] : memref<2x1x32xf32, #tpu.memory_space<vmem>>, vector<1x1x32xf32>
    %372 = vector.shape_cast %371 : vector<1x1x32xf32> to vector<1x32xf32>
    %c0_145 = arith.constant 0 : index
    %c0_146 = arith.constant 0 : index
    %c0_147 = arith.constant 0 : index
    %373 = vector.load %arg23[%c0_145, %c0_146, %c0_147] : memref<2x1x32xf32, #tpu.memory_space<vmem>>, vector<1x1x32xf32>
    %374 = vector.shape_cast %373 : vector<1x1x32xf32> to vector<1x32xf32>
    %cst_148 = arith.constant dense<0.000000e+00> : vector<16xf32>
    %375 = vector.multi_reduction <add>, %370, %cst_148 [1] : vector<16x32xf32> to vector<16xf32>
    %376 = vector.shape_cast %375 : vector<16xf32> to vector<16x1xf32>
    %cst_149 = arith.constant 3.200000e+01 : f32
    %377 = vector.broadcast %cst_149 : f32 to vector<16x1xf32>
    %378 = arith.divf %376, %377 : vector<16x1xf32>
    %379 = vector.broadcast %378 : vector<16x1xf32> to vector<16x32xf32>
    %380 = arith.subf %370, %379 : vector<16x32xf32>
    %381 = arith.mulf %380, %380 : vector<16x32xf32>
    %cst_150 = arith.constant dense<0.000000e+00> : vector<16xf32>
    %382 = vector.multi_reduction <add>, %381, %cst_150 [1] : vector<16x32xf32> to vector<16xf32>
    %383 = vector.shape_cast %382 : vector<16xf32> to vector<16x1xf32>
    %cst_151 = arith.constant 3.200000e+01 : f32
    %384 = vector.broadcast %cst_151 : f32 to vector<16x1xf32>
    %385 = arith.divf %383, %384 : vector<16x1xf32>
    %386 = vector.broadcast %378 : vector<16x1xf32> to vector<16x32xf32>
    %387 = arith.subf %370, %386 : vector<16x32xf32>
    %cst_152 = arith.constant 9.99999974E-6 : f32
    %388 = vector.broadcast %cst_152 : f32 to vector<16x1xf32>
    %389 = arith.addf %385, %388 : vector<16x1xf32>
    %390 = math.rsqrt %389 : vector<16x1xf32>
    %391 = vector.broadcast %390 : vector<16x1xf32> to vector<16x32xf32>
    %392 = arith.mulf %387, %391 : vector<16x32xf32>
    %393 = vector.broadcast %372 : vector<1x32xf32> to vector<16x32xf32>
    %394 = arith.mulf %392, %393 : vector<16x32xf32>
    %395 = vector.broadcast %374 : vector<1x32xf32> to vector<16x32xf32>
    %396 = arith.addf %394, %395 : vector<16x32xf32>
    %c0_153 = arith.constant 0 : index
    %c0_154 = arith.constant 0 : index
    %c0_155 = arith.constant 0 : index
    %397 = vector.load %arg24[%c0_153, %c0_154, %c0_155] : memref<2x32x64xf32, #tpu.memory_space<vmem>>, vector<1x32x64xf32>
    %398 = vector.shape_cast %397 : vector<1x32x64xf32> to vector<32x64xf32>
    %c0_156 = arith.constant 0 : index
    %c0_157 = arith.constant 0 : index
    %c0_158 = arith.constant 0 : index
    %399 = vector.load %arg25[%c0_156, %c0_157, %c0_158] : memref<2x1x64xf32, #tpu.memory_space<vmem>>, vector<1x1x64xf32>
    %400 = vector.shape_cast %399 : vector<1x1x64xf32> to vector<1x64xf32>
    %cst_159 = arith.constant dense<0.000000e+00> : vector<16x64xf32>
    %401 = tpu.matmul %396, %398, %cst_159 {dimension_numbers = #tpu.dot_dimension_numbers<[1], [0], [0], [1], [0, 0, 1, 1], [], []>} : vector<16x32xf32>, vector<32x64xf32>, vector<16x64xf32> -> vector<16x64xf32>
    %402 = vector.broadcast %400 : vector<1x64xf32> to vector<16x64xf32>
    %403 = arith.addf %401, %402 : vector<16x64xf32>
    %cst_160 = arith.constant 5.000000e-01 : f32
    %404 = vector.broadcast %cst_160 : f32 to vector<16x64xf32>
    %405 = arith.mulf %404, %403 : vector<16x64xf32>
    %cst_161 = arith.constant 4.471500e-02 : f32
    %406 = vector.broadcast %cst_161 : f32 to vector<16x64xf32>
    %407 = arith.mulf %406, %403 : vector<16x64xf32>
    %408 = arith.mulf %407, %403 : vector<16x64xf32>
    %409 = arith.mulf %408, %403 : vector<16x64xf32>
    %410 = arith.addf %403, %409 : vector<16x64xf32>
    %cst_162 = arith.constant 0.797884583 : f32
    %411 = vector.broadcast %cst_162 : f32 to vector<16x64xf32>
    %412 = arith.mulf %411, %410 : vector<16x64xf32>
    %413 = math.tanh %412 : vector<16x64xf32>
    %cst_163 = arith.constant 1.000000e+00 : f32
    %414 = vector.broadcast %cst_163 : f32 to vector<16x64xf32>
    %415 = arith.addf %414, %413 : vector<16x64xf32>
    %416 = arith.mulf %405, %415 : vector<16x64xf32>
    %c0_164 = arith.constant 0 : index
    %c0_165 = arith.constant 0 : index
    %c0_166 = arith.constant 0 : index
    %417 = vector.load %arg26[%c0_164, %c0_165, %c0_166] : memref<2x64x32xf32, #tpu.memory_space<vmem>>, vector<1x64x32xf32>
    %418 = vector.shape_cast %417 : vector<1x64x32xf32> to vector<64x32xf32>
    %c0_167 = arith.constant 0 : index
    %c0_168 = arith.constant 0 : index
    %c0_169 = arith.constant 0 : index
    %419 = vector.load %arg27[%c0_167, %c0_168, %c0_169] : memref<2x1x32xf32, #tpu.memory_space<vmem>>, vector<1x1x32xf32>
    %420 = vector.shape_cast %419 : vector<1x1x32xf32> to vector<1x32xf32>
    %cst_170 = arith.constant dense<0.000000e+00> : vector<16x32xf32>
    %421 = tpu.matmul %416, %418, %cst_170 {dimension_numbers = #tpu.dot_dimension_numbers<[1], [0], [0], [1], [0, 0, 1, 1], [], []>} : vector<16x64xf32>, vector<64x32xf32>, vector<16x32xf32> -> vector<16x32xf32>
    %422 = vector.broadcast %420 : vector<1x32xf32> to vector<16x32xf32>
    %423 = arith.addf %421, %422 : vector<16x32xf32>
    %424 = arith.addf %396, %423 : vector<16x32xf32>
    %c0_171 = arith.constant 0 : index
    %c0_172 = arith.constant 0 : index
    %c0_173 = arith.constant 0 : index
    %425 = vector.load %arg28[%c0_171, %c0_172, %c0_173] : memref<2x1x32xf32, #tpu.memory_space<vmem>>, vector<1x1x32xf32>
    %426 = vector.shape_cast %425 : vector<1x1x32xf32> to vector<1x32xf32>
    %c0_174 = arith.constant 0 : index
    %c0_175 = arith.constant 0 : index
    %c0_176 = arith.constant 0 : index
    %427 = vector.load %arg29[%c0_174, %c0_175, %c0_176] : memref<2x1x32xf32, #tpu.memory_space<vmem>>, vector<1x1x32xf32>
    %428 = vector.shape_cast %427 : vector<1x1x32xf32> to vector<1x32xf32>
    %cst_177 = arith.constant dense<0.000000e+00> : vector<16xf32>
    %429 = vector.multi_reduction <add>, %424, %cst_177 [1] : vector<16x32xf32> to vector<16xf32>
    %430 = vector.shape_cast %429 : vector<16xf32> to vector<16x1xf32>
    %cst_178 = arith.constant 3.200000e+01 : f32
    %431 = vector.broadcast %cst_178 : f32 to vector<16x1xf32>
    %432 = arith.divf %430, %431 : vector<16x1xf32>
    %433 = vector.broadcast %432 : vector<16x1xf32> to vector<16x32xf32>
    %434 = arith.subf %424, %433 : vector<16x32xf32>
    %435 = arith.mulf %434, %434 : vector<16x32xf32>
    %cst_179 = arith.constant dense<0.000000e+00> : vector<16xf32>
    %436 = vector.multi_reduction <add>, %435, %cst_179 [1] : vector<16x32xf32> to vector<16xf32>
    %437 = vector.shape_cast %436 : vector<16xf32> to vector<16x1xf32>
    %cst_180 = arith.constant 3.200000e+01 : f32
    %438 = vector.broadcast %cst_180 : f32 to vector<16x1xf32>
    %439 = arith.divf %437, %438 : vector<16x1xf32>
    %440 = vector.broadcast %432 : vector<16x1xf32> to vector<16x32xf32>
    %441 = arith.subf %424, %440 : vector<16x32xf32>
    %cst_181 = arith.constant 9.99999974E-6 : f32
    %442 = vector.broadcast %cst_181 : f32 to vector<16x1xf32>
    %443 = arith.addf %439, %442 : vector<16x1xf32>
    %444 = math.rsqrt %443 : vector<16x1xf32>
    %445 = vector.broadcast %444 : vector<16x1xf32> to vector<16x32xf32>
    %446 = arith.mulf %441, %445 : vector<16x32xf32>
    %447 = vector.broadcast %426 : vector<1x32xf32> to vector<16x32xf32>
    %448 = arith.mulf %446, %447 : vector<16x32xf32>
    %449 = vector.broadcast %428 : vector<1x32xf32> to vector<16x32xf32>
    %450 = arith.addf %448, %449 : vector<16x32xf32>
    %c1 = arith.constant 1 : index
    %c0_182 = arith.constant 0 : index
    %c0_183 = arith.constant 0 : index
    %451 = vector.load %arg4[%c1, %c0_182, %c0_183] : memref<2x32x32xf32, #tpu.memory_space<vmem>>, vector<1x32x32xf32>
    %452 = vector.shape_cast %451 : vector<1x32x32xf32> to vector<32x32xf32>
    %c1_184 = arith.constant 1 : index
    %c0_185 = arith.constant 0 : index
    %c0_186 = arith.constant 0 : index
    %453 = vector.load %arg5[%c1_184, %c0_185, %c0_186] : memref<2x1x32xf32, #tpu.memory_space<vmem>>, vector<1x1x32xf32>
    %454 = vector.shape_cast %453 : vector<1x1x32xf32> to vector<1x32xf32>
    %cst_187 = arith.constant dense<0.000000e+00> : vector<16x32xf32>
    %455 = tpu.matmul %450, %452, %cst_187 {dimension_numbers = #tpu.dot_dimension_numbers<[1], [0], [0], [1], [0, 0, 1, 1], [], []>} : vector<16x32xf32>, vector<32x32xf32>, vector<16x32xf32> -> vector<16x32xf32>
    %456 = vector.broadcast %454 : vector<1x32xf32> to vector<16x32xf32>
    %457 = arith.addf %455, %456 : vector<16x32xf32>
    %cst_188 = arith.constant 0.353553385 : f32
    %458 = vector.broadcast %cst_188 : f32 to vector<16x32xf32>
    %459 = arith.mulf %457, %458 : vector<16x32xf32>
    %c1_189 = arith.constant 1 : index
    %c0_190 = arith.constant 0 : index
    %c0_191 = arith.constant 0 : index
    %460 = vector.load %arg6[%c1_189, %c0_190, %c0_191] : memref<2x32x32xf32, #tpu.memory_space<vmem>>, vector<1x32x32xf32>
    %461 = vector.shape_cast %460 : vector<1x32x32xf32> to vector<32x32xf32>
    %c1_192 = arith.constant 1 : index
    %c0_193 = arith.constant 0 : index
    %c0_194 = arith.constant 0 : index
    %462 = vector.load %arg7[%c1_192, %c0_193, %c0_194] : memref<2x1x32xf32, #tpu.memory_space<vmem>>, vector<1x1x32xf32>
    %463 = vector.shape_cast %462 : vector<1x1x32xf32> to vector<1x32xf32>
    %cst_195 = arith.constant dense<0.000000e+00> : vector<16x32xf32>
    %464 = tpu.matmul %450, %461, %cst_195 {dimension_numbers = #tpu.dot_dimension_numbers<[1], [0], [0], [1], [0, 0, 1, 1], [], []>} : vector<16x32xf32>, vector<32x32xf32>, vector<16x32xf32> -> vector<16x32xf32>
    %465 = vector.broadcast %463 : vector<1x32xf32> to vector<16x32xf32>
    %466 = arith.addf %464, %465 : vector<16x32xf32>
    %c1_196 = arith.constant 1 : index
    %c0_197 = arith.constant 0 : index
    %c0_198 = arith.constant 0 : index
    %467 = vector.load %arg8[%c1_196, %c0_197, %c0_198] : memref<2x32x32xf32, #tpu.memory_space<vmem>>, vector<1x32x32xf32>
    %468 = vector.shape_cast %467 : vector<1x32x32xf32> to vector<32x32xf32>
    %c1_199 = arith.constant 1 : index
    %c0_200 = arith.constant 0 : index
    %c0_201 = arith.constant 0 : index
    %469 = vector.load %arg9[%c1_199, %c0_200, %c0_201] : memref<2x1x32xf32, #tpu.memory_space<vmem>>, vector<1x1x32xf32>
    %470 = vector.shape_cast %469 : vector<1x1x32xf32> to vector<1x32xf32>
    %cst_202 = arith.constant dense<0.000000e+00> : vector<16x32xf32>
    %471 = tpu.matmul %450, %468, %cst_202 {dimension_numbers = #tpu.dot_dimension_numbers<[1], [0], [0], [1], [0, 0, 1, 1], [], []>} : vector<16x32xf32>, vector<32x32xf32>, vector<16x32xf32> -> vector<16x32xf32>
    %472 = vector.broadcast %470 : vector<1x32xf32> to vector<16x32xf32>
    %473 = arith.addf %471, %472 : vector<16x32xf32>
    %cst_203 = arith.constant 0.000000e+00 : f32
    %474 = vector.broadcast %cst_203 : f32 to vector<16x32xf32>
    %475 = vector.broadcast %7 : vector<1x32xf32> to vector<16x32xf32>
    %476 = arith.mulf %459, %475 : vector<16x32xf32>
    %477 = vector.broadcast %7 : vector<1x32xf32> to vector<16x32xf32>
    %478 = arith.mulf %466, %477 : vector<16x32xf32>
    %cst_204 = arith.constant dense<0.000000e+00> : vector<16x16xf32>
    %479 = tpu.matmul %476, %478, %cst_204 {dimension_numbers = #tpu.dot_dimension_numbers<[1], [1], [0], [0], [0, 0, 1, 0], [], []>} : vector<16x32xf32>, vector<16x32xf32>, vector<16x16xf32> -> vector<16x16xf32>
    %480 = arith.addf %479, %71 : vector<16x16xf32>
    %cst_205 = arith.constant dense<0xFF800000> : vector<16xf32>
    %481 = vector.multi_reduction <maximumf>, %480, %cst_205 [1] : vector<16x16xf32> to vector<16xf32>
    %482 = vector.shape_cast %481 : vector<16xf32> to vector<16x1xf32>
    %483 = vector.broadcast %482 : vector<16x1xf32> to vector<16x16xf32>
    %484 = arith.subf %480, %483 : vector<16x16xf32>
    %485 = math.exp %484 : vector<16x16xf32>
    %cst_206 = arith.constant dense<0.000000e+00> : vector<16xf32>
    %486 = vector.multi_reduction <add>, %485, %cst_206 [1] : vector<16x16xf32> to vector<16xf32>
    %487 = vector.shape_cast %486 : vector<16xf32> to vector<16x1xf32>
    %488 = vector.broadcast %487 : vector<16x1xf32> to vector<16x16xf32>
    %489 = arith.divf %485, %488 : vector<16x16xf32>
    %490 = vector.broadcast %7 : vector<1x32xf32> to vector<16x32xf32>
    %491 = arith.mulf %473, %490 : vector<16x32xf32>
    %cst_207 = arith.constant dense<0.000000e+00> : vector<16x32xf32>
    %492 = tpu.matmul %489, %491, %cst_207 {dimension_numbers = #tpu.dot_dimension_numbers<[1], [0], [0], [1], [0, 0, 1, 1], [], []>} : vector<16x16xf32>, vector<16x32xf32>, vector<16x32xf32> -> vector<16x32xf32>
    %493 = arith.addf %474, %492 : vector<16x32xf32>
    %494 = vector.broadcast %14 : vector<1x32xf32> to vector<16x32xf32>
    %495 = arith.mulf %459, %494 : vector<16x32xf32>
    %496 = vector.broadcast %14 : vector<1x32xf32> to vector<16x32xf32>
    %497 = arith.mulf %466, %496 : vector<16x32xf32>
    %cst_208 = arith.constant dense<0.000000e+00> : vector<16x16xf32>
    %498 = tpu.matmul %495, %497, %cst_208 {dimension_numbers = #tpu.dot_dimension_numbers<[1], [1], [0], [0], [0, 0, 1, 0], [], []>} : vector<16x32xf32>, vector<16x32xf32>, vector<16x16xf32> -> vector<16x16xf32>
    %499 = arith.addf %498, %71 : vector<16x16xf32>
    %cst_209 = arith.constant dense<0xFF800000> : vector<16xf32>
    %500 = vector.multi_reduction <maximumf>, %499, %cst_209 [1] : vector<16x16xf32> to vector<16xf32>
    %501 = vector.shape_cast %500 : vector<16xf32> to vector<16x1xf32>
    %502 = vector.broadcast %501 : vector<16x1xf32> to vector<16x16xf32>
    %503 = arith.subf %499, %502 : vector<16x16xf32>
    %504 = math.exp %503 : vector<16x16xf32>
    %cst_210 = arith.constant dense<0.000000e+00> : vector<16xf32>
    %505 = vector.multi_reduction <add>, %504, %cst_210 [1] : vector<16x16xf32> to vector<16xf32>
    %506 = vector.shape_cast %505 : vector<16xf32> to vector<16x1xf32>
    %507 = vector.broadcast %506 : vector<16x1xf32> to vector<16x16xf32>
    %508 = arith.divf %504, %507 : vector<16x16xf32>
    %509 = vector.broadcast %14 : vector<1x32xf32> to vector<16x32xf32>
    %510 = arith.mulf %473, %509 : vector<16x32xf32>
    %cst_211 = arith.constant dense<0.000000e+00> : vector<16x32xf32>
    %511 = tpu.matmul %508, %510, %cst_211 {dimension_numbers = #tpu.dot_dimension_numbers<[1], [0], [0], [1], [0, 0, 1, 1], [], []>} : vector<16x16xf32>, vector<16x32xf32>, vector<16x32xf32> -> vector<16x32xf32>
    %512 = arith.addf %493, %511 : vector<16x32xf32>
    %513 = vector.broadcast %21 : vector<1x32xf32> to vector<16x32xf32>
    %514 = arith.mulf %459, %513 : vector<16x32xf32>
    %515 = vector.broadcast %21 : vector<1x32xf32> to vector<16x32xf32>
    %516 = arith.mulf %466, %515 : vector<16x32xf32>
    %cst_212 = arith.constant dense<0.000000e+00> : vector<16x16xf32>
    %517 = tpu.matmul %514, %516, %cst_212 {dimension_numbers = #tpu.dot_dimension_numbers<[1], [1], [0], [0], [0, 0, 1, 0], [], []>} : vector<16x32xf32>, vector<16x32xf32>, vector<16x16xf32> -> vector<16x16xf32>
    %518 = arith.addf %517, %71 : vector<16x16xf32>
    %cst_213 = arith.constant dense<0xFF800000> : vector<16xf32>
    %519 = vector.multi_reduction <maximumf>, %518, %cst_213 [1] : vector<16x16xf32> to vector<16xf32>
    %520 = vector.shape_cast %519 : vector<16xf32> to vector<16x1xf32>
    %521 = vector.broadcast %520 : vector<16x1xf32> to vector<16x16xf32>
    %522 = arith.subf %518, %521 : vector<16x16xf32>
    %523 = math.exp %522 : vector<16x16xf32>
    %cst_214 = arith.constant dense<0.000000e+00> : vector<16xf32>
    %524 = vector.multi_reduction <add>, %523, %cst_214 [1] : vector<16x16xf32> to vector<16xf32>
    %525 = vector.shape_cast %524 : vector<16xf32> to vector<16x1xf32>
    %526 = vector.broadcast %525 : vector<16x1xf32> to vector<16x16xf32>
    %527 = arith.divf %523, %526 : vector<16x16xf32>
    %528 = vector.broadcast %21 : vector<1x32xf32> to vector<16x32xf32>
    %529 = arith.mulf %473, %528 : vector<16x32xf32>
    %cst_215 = arith.constant dense<0.000000e+00> : vector<16x32xf32>
    %530 = tpu.matmul %527, %529, %cst_215 {dimension_numbers = #tpu.dot_dimension_numbers<[1], [0], [0], [1], [0, 0, 1, 1], [], []>} : vector<16x16xf32>, vector<16x32xf32>, vector<16x32xf32> -> vector<16x32xf32>
    %531 = arith.addf %512, %530 : vector<16x32xf32>
    %532 = vector.broadcast %28 : vector<1x32xf32> to vector<16x32xf32>
    %533 = arith.mulf %459, %532 : vector<16x32xf32>
    %534 = vector.broadcast %28 : vector<1x32xf32> to vector<16x32xf32>
    %535 = arith.mulf %466, %534 : vector<16x32xf32>
    %cst_216 = arith.constant dense<0.000000e+00> : vector<16x16xf32>
    %536 = tpu.matmul %533, %535, %cst_216 {dimension_numbers = #tpu.dot_dimension_numbers<[1], [1], [0], [0], [0, 0, 1, 0], [], []>} : vector<16x32xf32>, vector<16x32xf32>, vector<16x16xf32> -> vector<16x16xf32>
    %537 = arith.addf %536, %71 : vector<16x16xf32>
    %cst_217 = arith.constant dense<0xFF800000> : vector<16xf32>
    %538 = vector.multi_reduction <maximumf>, %537, %cst_217 [1] : vector<16x16xf32> to vector<16xf32>
    %539 = vector.shape_cast %538 : vector<16xf32> to vector<16x1xf32>
    %540 = vector.broadcast %539 : vector<16x1xf32> to vector<16x16xf32>
    %541 = arith.subf %537, %540 : vector<16x16xf32>
    %542 = math.exp %541 : vector<16x16xf32>
    %cst_218 = arith.constant dense<0.000000e+00> : vector<16xf32>
    %543 = vector.multi_reduction <add>, %542, %cst_218 [1] : vector<16x16xf32> to vector<16xf32>
    %544 = vector.shape_cast %543 : vector<16xf32> to vector<16x1xf32>
    %545 = vector.broadcast %544 : vector<16x1xf32> to vector<16x16xf32>
    %546 = arith.divf %542, %545 : vector<16x16xf32>
    %547 = vector.broadcast %28 : vector<1x32xf32> to vector<16x32xf32>
    %548 = arith.mulf %473, %547 : vector<16x32xf32>
    %cst_219 = arith.constant dense<0.000000e+00> : vector<16x32xf32>
    %549 = tpu.matmul %546, %548, %cst_219 {dimension_numbers = #tpu.dot_dimension_numbers<[1], [0], [0], [1], [0, 0, 1, 1], [], []>} : vector<16x16xf32>, vector<16x32xf32>, vector<16x32xf32> -> vector<16x32xf32>
    %550 = arith.addf %531, %549 : vector<16x32xf32>
    %c1_220 = arith.constant 1 : index
    %c0_221 = arith.constant 0 : index
    %c0_222 = arith.constant 0 : index
    %551 = vector.load %arg10[%c1_220, %c0_221, %c0_222] : memref<2x32x32xf32, #tpu.memory_space<vmem>>, vector<1x32x32xf32>
    %552 = vector.shape_cast %551 : vector<1x32x32xf32> to vector<32x32xf32>
    %c1_223 = arith.constant 1 : index
    %c0_224 = arith.constant 0 : index
    %c0_225 = arith.constant 0 : index
    %553 = vector.load %arg11[%c1_223, %c0_224, %c0_225] : memref<2x1x32xf32, #tpu.memory_space<vmem>>, vector<1x1x32xf32>
    %554 = vector.shape_cast %553 : vector<1x1x32xf32> to vector<1x32xf32>
    %cst_226 = arith.constant dense<0.000000e+00> : vector<16x32xf32>
    %555 = tpu.matmul %550, %552, %cst_226 {dimension_numbers = #tpu.dot_dimension_numbers<[1], [0], [0], [1], [0, 0, 1, 1], [], []>} : vector<16x32xf32>, vector<32x32xf32>, vector<16x32xf32> -> vector<16x32xf32>
    %556 = vector.broadcast %554 : vector<1x32xf32> to vector<16x32xf32>
    %557 = arith.addf %555, %556 : vector<16x32xf32>
    %558 = arith.addf %450, %557 : vector<16x32xf32>
    %c1_227 = arith.constant 1 : index
    %c0_228 = arith.constant 0 : index
    %c0_229 = arith.constant 0 : index
    %559 = vector.load %arg12[%c1_227, %c0_228, %c0_229] : memref<2x1x32xf32, #tpu.memory_space<vmem>>, vector<1x1x32xf32>
    %560 = vector.shape_cast %559 : vector<1x1x32xf32> to vector<1x32xf32>
    %c1_230 = arith.constant 1 : index
    %c0_231 = arith.constant 0 : index
    %c0_232 = arith.constant 0 : index
    %561 = vector.load %arg13[%c1_230, %c0_231, %c0_232] : memref<2x1x32xf32, #tpu.memory_space<vmem>>, vector<1x1x32xf32>
    %562 = vector.shape_cast %561 : vector<1x1x32xf32> to vector<1x32xf32>
    %cst_233 = arith.constant dense<0.000000e+00> : vector<16xf32>
    %563 = vector.multi_reduction <add>, %558, %cst_233 [1] : vector<16x32xf32> to vector<16xf32>
    %564 = vector.shape_cast %563 : vector<16xf32> to vector<16x1xf32>
    %cst_234 = arith.constant 3.200000e+01 : f32
    %565 = vector.broadcast %cst_234 : f32 to vector<16x1xf32>
    %566 = arith.divf %564, %565 : vector<16x1xf32>
    %567 = vector.broadcast %566 : vector<16x1xf32> to vector<16x32xf32>
    %568 = arith.subf %558, %567 : vector<16x32xf32>
    %569 = arith.mulf %568, %568 : vector<16x32xf32>
    %cst_235 = arith.constant dense<0.000000e+00> : vector<16xf32>
    %570 = vector.multi_reduction <add>, %569, %cst_235 [1] : vector<16x32xf32> to vector<16xf32>
    %571 = vector.shape_cast %570 : vector<16xf32> to vector<16x1xf32>
    %cst_236 = arith.constant 3.200000e+01 : f32
    %572 = vector.broadcast %cst_236 : f32 to vector<16x1xf32>
    %573 = arith.divf %571, %572 : vector<16x1xf32>
    %574 = vector.broadcast %566 : vector<16x1xf32> to vector<16x32xf32>
    %575 = arith.subf %558, %574 : vector<16x32xf32>
    %cst_237 = arith.constant 9.99999974E-6 : f32
    %576 = vector.broadcast %cst_237 : f32 to vector<16x1xf32>
    %577 = arith.addf %573, %576 : vector<16x1xf32>
    %578 = math.rsqrt %577 : vector<16x1xf32>
    %579 = vector.broadcast %578 : vector<16x1xf32> to vector<16x32xf32>
    %580 = arith.mulf %575, %579 : vector<16x32xf32>
    %581 = vector.broadcast %560 : vector<1x32xf32> to vector<16x32xf32>
    %582 = arith.mulf %580, %581 : vector<16x32xf32>
    %583 = vector.broadcast %562 : vector<1x32xf32> to vector<16x32xf32>
    %584 = arith.addf %582, %583 : vector<16x32xf32>
    %c1_238 = arith.constant 1 : index
    %c0_239 = arith.constant 0 : index
    %c0_240 = arith.constant 0 : index
    %585 = vector.load %arg14[%c1_238, %c0_239, %c0_240] : memref<2x32x32xf32, #tpu.memory_space<vmem>>, vector<1x32x32xf32>
    %586 = vector.shape_cast %585 : vector<1x32x32xf32> to vector<32x32xf32>
    %c1_241 = arith.constant 1 : index
    %c0_242 = arith.constant 0 : index
    %c0_243 = arith.constant 0 : index
    %587 = vector.load %arg15[%c1_241, %c0_242, %c0_243] : memref<2x1x32xf32, #tpu.memory_space<vmem>>, vector<1x1x32xf32>
    %588 = vector.shape_cast %587 : vector<1x1x32xf32> to vector<1x32xf32>
    %cst_244 = arith.constant dense<0.000000e+00> : vector<16x32xf32>
    %589 = tpu.matmul %584, %586, %cst_244 {dimension_numbers = #tpu.dot_dimension_numbers<[1], [0], [0], [1], [0, 0, 1, 1], [], []>} : vector<16x32xf32>, vector<32x32xf32>, vector<16x32xf32> -> vector<16x32xf32>
    %590 = vector.broadcast %588 : vector<1x32xf32> to vector<16x32xf32>
    %591 = arith.addf %589, %590 : vector<16x32xf32>
    %cst_245 = arith.constant 0.353553385 : f32
    %592 = vector.broadcast %cst_245 : f32 to vector<16x32xf32>
    %593 = arith.mulf %591, %592 : vector<16x32xf32>
    %c1_246 = arith.constant 1 : index
    %c0_247 = arith.constant 0 : index
    %c0_248 = arith.constant 0 : index
    %594 = vector.load %arg16[%c1_246, %c0_247, %c0_248] : memref<2x32x32xf32, #tpu.memory_space<vmem>>, vector<1x32x32xf32>
    %595 = vector.shape_cast %594 : vector<1x32x32xf32> to vector<32x32xf32>
    %c1_249 = arith.constant 1 : index
    %c0_250 = arith.constant 0 : index
    %c0_251 = arith.constant 0 : index
    %596 = vector.load %arg17[%c1_249, %c0_250, %c0_251] : memref<2x1x32xf32, #tpu.memory_space<vmem>>, vector<1x1x32xf32>
    %597 = vector.shape_cast %596 : vector<1x1x32xf32> to vector<1x32xf32>
    %cst_252 = arith.constant dense<0.000000e+00> : vector<24x32xf32>
    %598 = tpu.matmul %103, %595, %cst_252 {dimension_numbers = #tpu.dot_dimension_numbers<[1], [0], [0], [1], [0, 0, 1, 1], [], []>} : vector<24x32xf32>, vector<32x32xf32>, vector<24x32xf32> -> vector<24x32xf32>
    %599 = vector.broadcast %597 : vector<1x32xf32> to vector<24x32xf32>
    %600 = arith.addf %598, %599 : vector<24x32xf32>
    %c1_253 = arith.constant 1 : index
    %c0_254 = arith.constant 0 : index
    %c0_255 = arith.constant 0 : index
    %601 = vector.load %arg18[%c1_253, %c0_254, %c0_255] : memref<2x32x32xf32, #tpu.memory_space<vmem>>, vector<1x32x32xf32>
    %602 = vector.shape_cast %601 : vector<1x32x32xf32> to vector<32x32xf32>
    %c1_256 = arith.constant 1 : index
    %c0_257 = arith.constant 0 : index
    %c0_258 = arith.constant 0 : index
    %603 = vector.load %arg19[%c1_256, %c0_257, %c0_258] : memref<2x1x32xf32, #tpu.memory_space<vmem>>, vector<1x1x32xf32>
    %604 = vector.shape_cast %603 : vector<1x1x32xf32> to vector<1x32xf32>
    %cst_259 = arith.constant dense<0.000000e+00> : vector<24x32xf32>
    %605 = tpu.matmul %103, %602, %cst_259 {dimension_numbers = #tpu.dot_dimension_numbers<[1], [0], [0], [1], [0, 0, 1, 1], [], []>} : vector<24x32xf32>, vector<32x32xf32>, vector<24x32xf32> -> vector<24x32xf32>
    %606 = vector.broadcast %604 : vector<1x32xf32> to vector<24x32xf32>
    %607 = arith.addf %605, %606 : vector<24x32xf32>
    %cst_260 = arith.constant 0.000000e+00 : f32
    %608 = vector.broadcast %cst_260 : f32 to vector<16x32xf32>
    %609 = vector.broadcast %7 : vector<1x32xf32> to vector<16x32xf32>
    %610 = arith.mulf %593, %609 : vector<16x32xf32>
    %611 = vector.broadcast %7 : vector<1x32xf32> to vector<24x32xf32>
    %612 = arith.mulf %600, %611 : vector<24x32xf32>
    %cst_261 = arith.constant dense<0.000000e+00> : vector<16x24xf32>
    %613 = tpu.matmul %610, %612, %cst_261 {dimension_numbers = #tpu.dot_dimension_numbers<[1], [1], [0], [0], [0, 0, 1, 0], [], []>} : vector<16x32xf32>, vector<24x32xf32>, vector<16x24xf32> -> vector<16x24xf32>
    %614 = arith.addf %613, %102 : vector<16x24xf32>
    %cst_262 = arith.constant dense<0xFF800000> : vector<16xf32>
    %615 = vector.multi_reduction <maximumf>, %614, %cst_262 [1] : vector<16x24xf32> to vector<16xf32>
    %616 = vector.shape_cast %615 : vector<16xf32> to vector<16x1xf32>
    %617 = vector.broadcast %616 : vector<16x1xf32> to vector<16x24xf32>
    %618 = arith.subf %614, %617 : vector<16x24xf32>
    %619 = math.exp %618 : vector<16x24xf32>
    %cst_263 = arith.constant dense<0.000000e+00> : vector<16xf32>
    %620 = vector.multi_reduction <add>, %619, %cst_263 [1] : vector<16x24xf32> to vector<16xf32>
    %621 = vector.shape_cast %620 : vector<16xf32> to vector<16x1xf32>
    %622 = vector.broadcast %621 : vector<16x1xf32> to vector<16x24xf32>
    %623 = arith.divf %619, %622 : vector<16x24xf32>
    %624 = vector.broadcast %7 : vector<1x32xf32> to vector<24x32xf32>
    %625 = arith.mulf %607, %624 : vector<24x32xf32>
    %cst_264 = arith.constant dense<0.000000e+00> : vector<16x32xf32>
    %626 = tpu.matmul %623, %625, %cst_264 {dimension_numbers = #tpu.dot_dimension_numbers<[1], [0], [0], [1], [0, 0, 1, 1], [], []>} : vector<16x24xf32>, vector<24x32xf32>, vector<16x32xf32> -> vector<16x32xf32>
    %627 = arith.addf %608, %626 : vector<16x32xf32>
    %628 = vector.broadcast %14 : vector<1x32xf32> to vector<16x32xf32>
    %629 = arith.mulf %593, %628 : vector<16x32xf32>
    %630 = vector.broadcast %14 : vector<1x32xf32> to vector<24x32xf32>
    %631 = arith.mulf %600, %630 : vector<24x32xf32>
    %cst_265 = arith.constant dense<0.000000e+00> : vector<16x24xf32>
    %632 = tpu.matmul %629, %631, %cst_265 {dimension_numbers = #tpu.dot_dimension_numbers<[1], [1], [0], [0], [0, 0, 1, 0], [], []>} : vector<16x32xf32>, vector<24x32xf32>, vector<16x24xf32> -> vector<16x24xf32>
    %633 = arith.addf %632, %102 : vector<16x24xf32>
    %cst_266 = arith.constant dense<0xFF800000> : vector<16xf32>
    %634 = vector.multi_reduction <maximumf>, %633, %cst_266 [1] : vector<16x24xf32> to vector<16xf32>
    %635 = vector.shape_cast %634 : vector<16xf32> to vector<16x1xf32>
    %636 = vector.broadcast %635 : vector<16x1xf32> to vector<16x24xf32>
    %637 = arith.subf %633, %636 : vector<16x24xf32>
    %638 = math.exp %637 : vector<16x24xf32>
    %cst_267 = arith.constant dense<0.000000e+00> : vector<16xf32>
    %639 = vector.multi_reduction <add>, %638, %cst_267 [1] : vector<16x24xf32> to vector<16xf32>
    %640 = vector.shape_cast %639 : vector<16xf32> to vector<16x1xf32>
    %641 = vector.broadcast %640 : vector<16x1xf32> to vector<16x24xf32>
    %642 = arith.divf %638, %641 : vector<16x24xf32>
    %643 = vector.broadcast %14 : vector<1x32xf32> to vector<24x32xf32>
    %644 = arith.mulf %607, %643 : vector<24x32xf32>
    %cst_268 = arith.constant dense<0.000000e+00> : vector<16x32xf32>
    %645 = tpu.matmul %642, %644, %cst_268 {dimension_numbers = #tpu.dot_dimension_numbers<[1], [0], [0], [1], [0, 0, 1, 1], [], []>} : vector<16x24xf32>, vector<24x32xf32>, vector<16x32xf32> -> vector<16x32xf32>
    %646 = arith.addf %627, %645 : vector<16x32xf32>
    %647 = vector.broadcast %21 : vector<1x32xf32> to vector<16x32xf32>
    %648 = arith.mulf %593, %647 : vector<16x32xf32>
    %649 = vector.broadcast %21 : vector<1x32xf32> to vector<24x32xf32>
    %650 = arith.mulf %600, %649 : vector<24x32xf32>
    %cst_269 = arith.constant dense<0.000000e+00> : vector<16x24xf32>
    %651 = tpu.matmul %648, %650, %cst_269 {dimension_numbers = #tpu.dot_dimension_numbers<[1], [1], [0], [0], [0, 0, 1, 0], [], []>} : vector<16x32xf32>, vector<24x32xf32>, vector<16x24xf32> -> vector<16x24xf32>
    %652 = arith.addf %651, %102 : vector<16x24xf32>
    %cst_270 = arith.constant dense<0xFF800000> : vector<16xf32>
    %653 = vector.multi_reduction <maximumf>, %652, %cst_270 [1] : vector<16x24xf32> to vector<16xf32>
    %654 = vector.shape_cast %653 : vector<16xf32> to vector<16x1xf32>
    %655 = vector.broadcast %654 : vector<16x1xf32> to vector<16x24xf32>
    %656 = arith.subf %652, %655 : vector<16x24xf32>
    %657 = math.exp %656 : vector<16x24xf32>
    %cst_271 = arith.constant dense<0.000000e+00> : vector<16xf32>
    %658 = vector.multi_reduction <add>, %657, %cst_271 [1] : vector<16x24xf32> to vector<16xf32>
    %659 = vector.shape_cast %658 : vector<16xf32> to vector<16x1xf32>
    %660 = vector.broadcast %659 : vector<16x1xf32> to vector<16x24xf32>
    %661 = arith.divf %657, %660 : vector<16x24xf32>
    %662 = vector.broadcast %21 : vector<1x32xf32> to vector<24x32xf32>
    %663 = arith.mulf %607, %662 : vector<24x32xf32>
    %cst_272 = arith.constant dense<0.000000e+00> : vector<16x32xf32>
    %664 = tpu.matmul %661, %663, %cst_272 {dimension_numbers = #tpu.dot_dimension_numbers<[1], [0], [0], [1], [0, 0, 1, 1], [], []>} : vector<16x24xf32>, vector<24x32xf32>, vector<16x32xf32> -> vector<16x32xf32>
    %665 = arith.addf %646, %664 : vector<16x32xf32>
    %666 = vector.broadcast %28 : vector<1x32xf32> to vector<16x32xf32>
    %667 = arith.mulf %593, %666 : vector<16x32xf32>
    %668 = vector.broadcast %28 : vector<1x32xf32> to vector<24x32xf32>
    %669 = arith.mulf %600, %668 : vector<24x32xf32>
    %cst_273 = arith.constant dense<0.000000e+00> : vector<16x24xf32>
    %670 = tpu.matmul %667, %669, %cst_273 {dimension_numbers = #tpu.dot_dimension_numbers<[1], [1], [0], [0], [0, 0, 1, 0], [], []>} : vector<16x32xf32>, vector<24x32xf32>, vector<16x24xf32> -> vector<16x24xf32>
    %671 = arith.addf %670, %102 : vector<16x24xf32>
    %cst_274 = arith.constant dense<0xFF800000> : vector<16xf32>
    %672 = vector.multi_reduction <maximumf>, %671, %cst_274 [1] : vector<16x24xf32> to vector<16xf32>
    %673 = vector.shape_cast %672 : vector<16xf32> to vector<16x1xf32>
    %674 = vector.broadcast %673 : vector<16x1xf32> to vector<16x24xf32>
    %675 = arith.subf %671, %674 : vector<16x24xf32>
    %676 = math.exp %675 : vector<16x24xf32>
    %cst_275 = arith.constant dense<0.000000e+00> : vector<16xf32>
    %677 = vector.multi_reduction <add>, %676, %cst_275 [1] : vector<16x24xf32> to vector<16xf32>
    %678 = vector.shape_cast %677 : vector<16xf32> to vector<16x1xf32>
    %679 = vector.broadcast %678 : vector<16x1xf32> to vector<16x24xf32>
    %680 = arith.divf %676, %679 : vector<16x24xf32>
    %681 = vector.broadcast %28 : vector<1x32xf32> to vector<24x32xf32>
    %682 = arith.mulf %607, %681 : vector<24x32xf32>
    %cst_276 = arith.constant dense<0.000000e+00> : vector<16x32xf32>
    %683 = tpu.matmul %680, %682, %cst_276 {dimension_numbers = #tpu.dot_dimension_numbers<[1], [0], [0], [1], [0, 0, 1, 1], [], []>} : vector<16x24xf32>, vector<24x32xf32>, vector<16x32xf32> -> vector<16x32xf32>
    %684 = arith.addf %665, %683 : vector<16x32xf32>
    %c1_277 = arith.constant 1 : index
    %c0_278 = arith.constant 0 : index
    %c0_279 = arith.constant 0 : index
    %685 = vector.load %arg20[%c1_277, %c0_278, %c0_279] : memref<2x32x32xf32, #tpu.memory_space<vmem>>, vector<1x32x32xf32>
    %686 = vector.shape_cast %685 : vector<1x32x32xf32> to vector<32x32xf32>
    %c1_280 = arith.constant 1 : index
    %c0_281 = arith.constant 0 : index
    %c0_282 = arith.constant 0 : index
    %687 = vector.load %arg21[%c1_280, %c0_281, %c0_282] : memref<2x1x32xf32, #tpu.memory_space<vmem>>, vector<1x1x32xf32>
    %688 = vector.shape_cast %687 : vector<1x1x32xf32> to vector<1x32xf32>
    %cst_283 = arith.constant dense<0.000000e+00> : vector<16x32xf32>
    %689 = tpu.matmul %684, %686, %cst_283 {dimension_numbers = #tpu.dot_dimension_numbers<[1], [0], [0], [1], [0, 0, 1, 1], [], []>} : vector<16x32xf32>, vector<32x32xf32>, vector<16x32xf32> -> vector<16x32xf32>
    %690 = vector.broadcast %688 : vector<1x32xf32> to vector<16x32xf32>
    %691 = arith.addf %689, %690 : vector<16x32xf32>
    %692 = arith.addf %584, %691 : vector<16x32xf32>
    %c1_284 = arith.constant 1 : index
    %c0_285 = arith.constant 0 : index
    %c0_286 = arith.constant 0 : index
    %693 = vector.load %arg22[%c1_284, %c0_285, %c0_286] : memref<2x1x32xf32, #tpu.memory_space<vmem>>, vector<1x1x32xf32>
    %694 = vector.shape_cast %693 : vector<1x1x32xf32> to vector<1x32xf32>
    %c1_287 = arith.constant 1 : index
    %c0_288 = arith.constant 0 : index
    %c0_289 = arith.constant 0 : index
    %695 = vector.load %arg23[%c1_287, %c0_288, %c0_289] : memref<2x1x32xf32, #tpu.memory_space<vmem>>, vector<1x1x32xf32>
    %696 = vector.shape_cast %695 : vector<1x1x32xf32> to vector<1x32xf32>
    %cst_290 = arith.constant dense<0.000000e+00> : vector<16xf32>
    %697 = vector.multi_reduction <add>, %692, %cst_290 [1] : vector<16x32xf32> to vector<16xf32>
    %698 = vector.shape_cast %697 : vector<16xf32> to vector<16x1xf32>
    %cst_291 = arith.constant 3.200000e+01 : f32
    %699 = vector.broadcast %cst_291 : f32 to vector<16x1xf32>
    %700 = arith.divf %698, %699 : vector<16x1xf32>
    %701 = vector.broadcast %700 : vector<16x1xf32> to vector<16x32xf32>
    %702 = arith.subf %692, %701 : vector<16x32xf32>
    %703 = arith.mulf %702, %702 : vector<16x32xf32>
    %cst_292 = arith.constant dense<0.000000e+00> : vector<16xf32>
    %704 = vector.multi_reduction <add>, %703, %cst_292 [1] : vector<16x32xf32> to vector<16xf32>
    %705 = vector.shape_cast %704 : vector<16xf32> to vector<16x1xf32>
    %cst_293 = arith.constant 3.200000e+01 : f32
    %706 = vector.broadcast %cst_293 : f32 to vector<16x1xf32>
    %707 = arith.divf %705, %706 : vector<16x1xf32>
    %708 = vector.broadcast %700 : vector<16x1xf32> to vector<16x32xf32>
    %709 = arith.subf %692, %708 : vector<16x32xf32>
    %cst_294 = arith.constant 9.99999974E-6 : f32
    %710 = vector.broadcast %cst_294 : f32 to vector<16x1xf32>
    %711 = arith.addf %707, %710 : vector<16x1xf32>
    %712 = math.rsqrt %711 : vector<16x1xf32>
    %713 = vector.broadcast %712 : vector<16x1xf32> to vector<16x32xf32>
    %714 = arith.mulf %709, %713 : vector<16x32xf32>
    %715 = vector.broadcast %694 : vector<1x32xf32> to vector<16x32xf32>
    %716 = arith.mulf %714, %715 : vector<16x32xf32>
    %717 = vector.broadcast %696 : vector<1x32xf32> to vector<16x32xf32>
    %718 = arith.addf %716, %717 : vector<16x32xf32>
    %c1_295 = arith.constant 1 : index
    %c0_296 = arith.constant 0 : index
    %c0_297 = arith.constant 0 : index
    %719 = vector.load %arg24[%c1_295, %c0_296, %c0_297] : memref<2x32x64xf32, #tpu.memory_space<vmem>>, vector<1x32x64xf32>
    %720 = vector.shape_cast %719 : vector<1x32x64xf32> to vector<32x64xf32>
    %c1_298 = arith.constant 1 : index
    %c0_299 = arith.constant 0 : index
    %c0_300 = arith.constant 0 : index
    %721 = vector.load %arg25[%c1_298, %c0_299, %c0_300] : memref<2x1x64xf32, #tpu.memory_space<vmem>>, vector<1x1x64xf32>
    %722 = vector.shape_cast %721 : vector<1x1x64xf32> to vector<1x64xf32>
    %cst_301 = arith.constant dense<0.000000e+00> : vector<16x64xf32>
    %723 = tpu.matmul %718, %720, %cst_301 {dimension_numbers = #tpu.dot_dimension_numbers<[1], [0], [0], [1], [0, 0, 1, 1], [], []>} : vector<16x32xf32>, vector<32x64xf32>, vector<16x64xf32> -> vector<16x64xf32>
    %724 = vector.broadcast %722 : vector<1x64xf32> to vector<16x64xf32>
    %725 = arith.addf %723, %724 : vector<16x64xf32>
    %cst_302 = arith.constant 5.000000e-01 : f32
    %726 = vector.broadcast %cst_302 : f32 to vector<16x64xf32>
    %727 = arith.mulf %726, %725 : vector<16x64xf32>
    %cst_303 = arith.constant 4.471500e-02 : f32
    %728 = vector.broadcast %cst_303 : f32 to vector<16x64xf32>
    %729 = arith.mulf %728, %725 : vector<16x64xf32>
    %730 = arith.mulf %729, %725 : vector<16x64xf32>
    %731 = arith.mulf %730, %725 : vector<16x64xf32>
    %732 = arith.addf %725, %731 : vector<16x64xf32>
    %cst_304 = arith.constant 0.797884583 : f32
    %733 = vector.broadcast %cst_304 : f32 to vector<16x64xf32>
    %734 = arith.mulf %733, %732 : vector<16x64xf32>
    %735 = math.tanh %734 : vector<16x64xf32>
    %cst_305 = arith.constant 1.000000e+00 : f32
    %736 = vector.broadcast %cst_305 : f32 to vector<16x64xf32>
    %737 = arith.addf %736, %735 : vector<16x64xf32>
    %738 = arith.mulf %727, %737 : vector<16x64xf32>
    %c1_306 = arith.constant 1 : index
    %c0_307 = arith.constant 0 : index
    %c0_308 = arith.constant 0 : index
    %739 = vector.load %arg26[%c1_306, %c0_307, %c0_308] : memref<2x64x32xf32, #tpu.memory_space<vmem>>, vector<1x64x32xf32>
    %740 = vector.shape_cast %739 : vector<1x64x32xf32> to vector<64x32xf32>
    %c1_309 = arith.constant 1 : index
    %c0_310 = arith.constant 0 : index
    %c0_311 = arith.constant 0 : index
    %741 = vector.load %arg27[%c1_309, %c0_310, %c0_311] : memref<2x1x32xf32, #tpu.memory_space<vmem>>, vector<1x1x32xf32>
    %742 = vector.shape_cast %741 : vector<1x1x32xf32> to vector<1x32xf32>
    %cst_312 = arith.constant dense<0.000000e+00> : vector<16x32xf32>
    %743 = tpu.matmul %738, %740, %cst_312 {dimension_numbers = #tpu.dot_dimension_numbers<[1], [0], [0], [1], [0, 0, 1, 1], [], []>} : vector<16x64xf32>, vector<64x32xf32>, vector<16x32xf32> -> vector<16x32xf32>
    %744 = vector.broadcast %742 : vector<1x32xf32> to vector<16x32xf32>
    %745 = arith.addf %743, %744 : vector<16x32xf32>
    %746 = arith.addf %718, %745 : vector<16x32xf32>
    %c1_313 = arith.constant 1 : index
    %c0_314 = arith.constant 0 : index
    %c0_315 = arith.constant 0 : index
    %747 = vector.load %arg28[%c1_313, %c0_314, %c0_315] : memref<2x1x32xf32, #tpu.memory_space<vmem>>, vector<1x1x32xf32>
    %748 = vector.shape_cast %747 : vector<1x1x32xf32> to vector<1x32xf32>
    %c1_316 = arith.constant 1 : index
    %c0_317 = arith.constant 0 : index
    %c0_318 = arith.constant 0 : index
    %749 = vector.load %arg29[%c1_316, %c0_317, %c0_318] : memref<2x1x32xf32, #tpu.memory_space<vmem>>, vector<1x1x32xf32>
    %750 = vector.shape_cast %749 : vector<1x1x32xf32> to vector<1x32xf32>
    %cst_319 = arith.constant dense<0.000000e+00> : vector<16xf32>
    %751 = vector.multi_reduction <add>, %746, %cst_319 [1] : vector<16x32xf32> to vector<16xf32>
    %752 = vector.shape_cast %751 : vector<16xf32> to vector<16x1xf32>
    %cst_320 = arith.constant 3.200000e+01 : f32
    %753 = vector.broadcast %cst_320 : f32 to vector<16x1xf32>
    %754 = arith.divf %752, %753 : vector<16x1xf32>
    %755 = vector.broadcast %754 : vector<16x1xf32> to vector<16x32xf32>
    %756 = arith.subf %746, %755 : vector<16x32xf32>
    %757 = arith.mulf %756, %756 : vector<16x32xf32>
    %cst_321 = arith.constant dense<0.000000e+00> : vector<16xf32>
    %758 = vector.multi_reduction <add>, %757, %cst_321 [1] : vector<16x32xf32> to vector<16xf32>
    %759 = vector.shape_cast %758 : vector<16xf32> to vector<16x1xf32>
    %cst_322 = arith.constant 3.200000e+01 : f32
    %760 = vector.broadcast %cst_322 : f32 to vector<16x1xf32>
    %761 = arith.divf %759, %760 : vector<16x1xf32>
    %762 = vector.broadcast %754 : vector<16x1xf32> to vector<16x32xf32>
    %763 = arith.subf %746, %762 : vector<16x32xf32>
    %cst_323 = arith.constant 9.99999974E-6 : f32
    %764 = vector.broadcast %cst_323 : f32 to vector<16x1xf32>
    %765 = arith.addf %761, %764 : vector<16x1xf32>
    %766 = math.rsqrt %765 : vector<16x1xf32>
    %767 = vector.broadcast %766 : vector<16x1xf32> to vector<16x32xf32>
    %768 = arith.mulf %763, %767 : vector<16x32xf32>
    %769 = vector.broadcast %748 : vector<1x32xf32> to vector<16x32xf32>
    %770 = arith.mulf %768, %769 : vector<16x32xf32>
    %771 = vector.broadcast %750 : vector<1x32xf32> to vector<16x32xf32>
    %772 = arith.addf %770, %771 : vector<16x32xf32>
    %c0_324 = arith.constant 0 : index
    %c0_325 = arith.constant 0 : index
    %773 = vector.load %arg30[%c0_324, %c0_325] : memref<32x128xf32, #tpu.memory_space<vmem>>, vector<32x128xf32>
    %cst_326 = arith.constant dense<0.000000e+00> : vector<16x128xf32>
    %774 = tpu.matmul %772, %773, %cst_326 {dimension_numbers = #tpu.dot_dimension_numbers<[1], [0], [0], [1], [0, 0, 1, 1], [], []>} : vector<16x32xf32>, vector<32x128xf32>, vector<16x128xf32> -> vector<16x128xf32>
    %c0_327 = arith.constant 0 : index
    %c0_328 = arith.constant 0 : index
    %775 = vector.load %arg32[%c0_327, %c0_328] : memref<16x128xf32, #tpu.memory_space<vmem>>, vector<16x128xf32>
    tpu.vector_store %arg32[%c0_327, %c0_328], %774 {strides = array<i32>} : memref<16x128xf32, #tpu.memory_space<vmem>>, vector<16x128xf32>,
    %c0_329 = arith.constant 0 : index
    %c0_330 = arith.constant 0 : index
    %776 = vector.load %arg31[%c0_329, %c0_330] : memref<16x1xi32, #tpu.memory_space<vmem>>, vector<16x1xi32>
    %cst_331 = arith.constant dense<0xFF800000> : vector<16xf32>
    %777 = vector.multi_reduction <maximumf>, %774, %cst_331 [1] : vector<16x128xf32> to vector<16xf32>
    %778 = vector.shape_cast %777 : vector<16xf32> to vector<16x1xf32>
    %779 = vector.broadcast %778 : vector<16x1xf32> to vector<16x128xf32>
    %780 = arith.subf %774, %779 : vector<16x128xf32>
    %781 = math.exp %780 : vector<16x128xf32>
    %cst_332 = arith.constant dense<0.000000e+00> : vector<16xf32>
    %782 = vector.multi_reduction <add>, %781, %cst_332 [1] : vector<16x128xf32> to vector<16xf32>
    %783 = vector.shape_cast %782 : vector<16xf32> to vector<16x1xf32>
    %784 = math.log %783 : vector<16x1xf32>
    %785 = arith.addf %784, %778 : vector<16x1xf32>
    %786 = tpu.iota {dimensions = array<i32: 1>} : vector<16x128xi32>
    %787 = vector.broadcast %776 : vector<16x1xi32> to vector<16x128xi32>
    %788 = arith.cmpi eq, %786, %787 : vector<16x128xi32>
    %cst_333 = arith.constant 0.000000e+00 : f32
    %789 = vector.broadcast %cst_333 : f32 to vector<16x128xf32>
    %790 = arith.select %788, %774, %789 : vector<16x128xi1>, vector<16x128xf32>
    %cst_334 = arith.constant dense<0.000000e+00> : vector<16xf32>
    %791 = vector.multi_reduction <add>, %790, %cst_334 [1] : vector<16x128xf32> to vector<16xf32>
    %792 = vector.shape_cast %791 : vector<16xf32> to vector<16x1xf32>
    %793 = arith.subf %785, %792 : vector<16x1xf32>
    %794 = vector.shape_cast %793 : vector<16x1xf32> to vector<1x16x1xf32>
    %cst_335 = arith.constant dense<0.000000e+00> : vector<1xf32>
    %795 = vector.multi_reduction <add>, %794, %cst_335 [1, 2] : vector<1x16x1xf32> to vector<1xf32>
    %796 = vector.shape_cast %795 : vector<1xf32> to vector<1x1x1xf32>
    %797 = vector.extract %796[0, 0, 0] : f32 from vector<1x1x1xf32>
    %cst_336 = arith.constant 1.600000e+01 : f32
    %798 = arith.divf %797, %cst_336 : f32
    %799 = vector.broadcast %798 : f32 to vector<1x1xf32>
    %c0_337 = arith.constant 0 : index
    %c0_338 = arith.constant 0 : index
    %800 = vector.load %arg33[%c0_337, %c0_338] : memref<1x1xf32, #tpu.memory_space<vmem>>, vector<1x1xf32>
    tpu.vector_store %arg33[%c0_337, %c0_338], %799 {strides = array<i32>} : memref<1x1xf32, #tpu.memory_space<vmem>>, vector<1x1xf32>,
    return
  }
}

</mosaic_0001>

<bundles_post_ra>
// kernel: tpu_custom_call.1
= control target key start
LH: loop header
LB: loop body
LE: loop exit
PB: predicated region body
PF: predicated region fallthrough
CT: control target
= control target key end

     0   :  { %6 = vsyncpa [#allocation3], 0  ;;  %s131_s0 = inlined_call_operand.hbm [shape: f32[8,128], index: 0, kind: input, shape index: {}]   ;;  %s132_s1 = inlined_call_operand.hbm [shape: f32[8,128], index: 1, kind: output, shape index: {}]  }
   0x1   :  { %7 = vsyncpa [#allocation4], 0  ;;  %s95_s6 = smov [#allocation2]   ;;  %s47_s10 = scalar_lea.hbm %s131_s0, 128 }
   0x2   :  { %s14_s7 = sshll.u32 %s95_s6, 4  ;;  %p48_p0 = scmp.ne.s32.totalorder %s131_s0, %s47_s10  ;;  %s15_s7 = int_to_ptr.vmem [resolvable:$true] %s14_s7 }
   0x3   :  { %p51_p1 = scmp.lt.u32.totalorder %s47_s10, %s131_s0 }
   0x5   :  { %p53_p2 = pnand %p51_p1, %p48_p0 }
   0x7   :  { %56 = shalt.err (!%p53_p2)
}
   0x8   :  { %s57_s15 = scalar_lea.vmem %s15_s7, 128  ;;  %p62_p4 = scmp.lt.s32.totalorder %s15_s7, %s15_s7 }
   0x9   :  { %p58_p3 = scmp.ne.s32.totalorder %s15_s7, %s57_s15  ;;  %p63_p5 = scmp.lt.s32.totalorder %s57_s15, %s57_s15 }
   0xb   :  { %p64_p6 = por %p63_p5, %p62_p4 }
   0xd   :  { %p65_p7 = pnand %p64_p6, %p58_p3 }
   0xf   :  { %68 = shalt.err (!%p65_p7)
}
  0x10   :  { %17 = dma.hbm_to_vmem [thread:$0]  %s131_s0, 128, %s15_s7, [#allocation3]  }
  0x11   :  { %91 = dma.done.wait [#allocation3], 128  }
  0x12   :  { %92 = vsyncadd [#allocation3], 4294967168  ;;  %v21_v0 = vld [vmem:[#allocation2] sm:$0xff]  ;;  %s96_s18 = smov [#allocation5]  }
  0x13   :  { %v23_v1 = vmul.f32 0.70710677, %v21_v0  ;;  %v22_v2 = vmul.f32 0.5, %v21_v0  ;;  %s34_s19 = sshll.u32 %s96_s18, 4  ;;  %s35_s19 = int_to_ptr.vmem [resolvable:$true] %s34_s19 }
  0x14   :  { %s69_s20 = scalar_lea.vmem %s35_s19, 128  ;;  %p74_p9 = scmp.lt.s32.totalorder %s35_s19, %s35_s19 }
  0x15   :  { %45 = verf.f32 %v23_v1  ;;  %p70_p8 = scmp.ne.s32.totalorder %s35_s19, %s69_s20  ;;  %p75_p10 = scmp.lt.s32.totalorder %s69_s20, %s69_s20 }
  0x17   :  { %p76_p11 = por %p75_p10, %p74_p9 }
  0x19   :  { %p77_p12 = pnand %p76_p11, %p70_p8 }
  0x1f   :  { %v46_v3 = vpop.eup %45 }
  0x20   :  { %v25_v4 = vadd.f32 1.0, %v46_v3 }
  0x22   :  { %v26_v5 = vmul.f32 %v25_v4, %v22_v2 }
  0x24   :  { %27 = vst [vmem:[#allocation5] sm:$0xff] %v26_v5 }
  0x25   :  { %80 = shalt.err (!%p77_p12)
}
  0x26   :  { %s81_s22 = scalar_lea.hbm %s132_s1, 128 }
  0x27   :  { %p82_p13 = scmp.ne.s32.totalorder %s132_s1, %s81_s22  ;;  %p85_p0 = scmp.lt.u32.totalorder %s81_s22, %s132_s1 }
  0x29   :  { %p87_p1 = pnand %p85_p0, %p82_p13 }
  0x2b   :  { %90 = shalt.err (!%p87_p1)
}
  0x2c   :  { %37 = dma.vmem_to_hbm [thread:$0]  %s35_s19, 128, %s132_s1, [#allocation4]  }
  0x2d   :  { %93 = dma.done.wait [#allocation4], 128  }
  0x2e   :  { %94 = vsyncadd [#allocation4], 4294967168 }
  0x2f   :  { %41 = vsyncpa [#allocation3], 1 }
  0x30   :  { %42 = vsyncpa [#allocation4], 1 }

// kernel: _forward_impl.1
= control target key start
LH: loop header
LB: loop body
LE: loop exit
PB: predicated region body
PF: predicated region fallthrough
CT: control target
= control target key end

     0   :  { %s7532_s6 = smov 1   ;;  %s7533_s10 = smov 2   ;;  %s8630_s0 = inlined_call_operand.smem [shape: u32[34], index: -1, kind: input, shape index: {}] }
   0x1   :  { %s7582_s5 = sld [smem:[%s8630_s0]]   ;;  %s7534_s14 = smov 3  }
   0x2   :  { %s7587_s9 = sld [smem:[%s8630_s0 + %s7532_s6]]   ;;  %s7535_s18 = smov 4  }
   0x3   :  { %s7592_s13 = sld [smem:[%s8630_s0 + %s7533_s10]]   ;;  %s7536_s22 = smov 5  }
   0x4   :  { %s7597_s17 = sld [smem:[%s8630_s0 + %s7534_s14]]   ;;  %s7537_s26 = smov 6  }
   0x5   :  { %s7602_s21 = sld [smem:[%s8630_s0 + %s7535_s18]]   ;;  %s7538_s30 = smov 7  }
   0x6   :  { %s7607_s25 = sld [smem:[%s8630_s0 + %s7536_s22]]   ;;  %s7539_s4 = smov 8  }
   0x7   :  { %s7612_s29 = sld [smem:[%s8630_s0 + %s7537_s26]]   ;;  %s7540_s10 = smov 9  }
   0x8   :  { %s7617_s3 = sld [smem:[%s8630_s0 + %s7538_s30]]   ;;  %s7541_s15 = smov 10  }
   0x9   :  { %s7622_s8 = sld [smem:[%s8630_s0 + %s7539_s4]]   ;;  %s7542_s20 = smov 11  }
   0xa   :  { %s7627_s14 = sld [smem:[%s8630_s0 + %s7540_s10]]   ;;  %s7543_s26 = smov 12  }
   0xb   :  { %s7632_s19 = sld [smem:[%s8630_s0 + %s7541_s15]]   ;;  %s7544_s1 = smov 13  }
   0xc   :  { %s7637_s24 = sld [smem:[%s8630_s0 + %s7542_s20]]   ;;  %s7545_s7 = smov 14  }
   0xd   :  { %s7642_s30 = sld [smem:[%s8630_s0 + %s7543_s26]]   ;;  %s7546_s15 = smov 15  }
   0xe   :  { %s7647_s6 = sld [smem:[%s8630_s0 + %s7544_s1]]   ;;  %s7547_s22 = smov 16  }
   0xf   :  { %s7652_s12 = sld [smem:[%s8630_s0 + %s7545_s7]]   ;;  %s7548_s28 = smov 17  }
  0x10   :  { %s7657_s20 = sld [smem:[%s8630_s0 + %s7546_s15]]   ;;  %s7549_s7 = smov 18  }
  0x11   :  { %s7662_s27 = sld [smem:[%s8630_s0 + %s7547_s22]]   ;;  %s7550_s15 = smov 19  }
  0x12   :  { %s7667_s4 = sld [smem:[%s8630_s0 + %s7548_s28]]   ;;  %s7551_s22 = smov 20  }
  0x13   :  { %8647 = sst [smem:[#allocation8_spill]] %s7642_s30  ;;  %s7552_s28 = smov 21  }
  0x14   :  { %8648 = sst [smem:[#allocation9_spill]] %s7647_s6 }
  0x15   :  { %s7672_s6 = sld [smem:[%s8630_s0 + %s7549_s7]]   ;;  %s7553_s7 = smov 22  }
  0x16   :  { %8649 = sst [smem:[#allocation10_spill]] %s7657_s20 }
  0x17   :  { %s7677_s20 = sld [smem:[%s8630_s0 + %s7550_s15]]   ;;  %s7554_s15 = smov 23  }
  0x18   :  { %8650 = sst [smem:[#allocation11_spill]] %s7667_s4 }
  0x19   :  { %s7682_s30 = sld [smem:[%s8630_s0 + %s7551_s22]]   ;;  %s7555_s22 = smov 24  }
  0x1a   :  { %s7687_s4 = sld [smem:[%s8630_s0 + %s7552_s28]]   ;;  %s7556_s28 = smov 25  }
  0x1b   :  { %8651 = sst [smem:[#allocation12_spill]] %s7672_s6 }
  0x1c   :  { %s7692_s6 = sld [smem:[%s8630_s0 + %s7553_s7]]   ;;  %s7557_s7 = smov 26  }
  0x1d   :  { %8652 = sst [smem:[#allocation13_spill]] %s7677_s20 }
  0x1e   :  { %s7697_s20 = sld [smem:[%s8630_s0 + %s7554_s15]]   ;;  %s7558_s15 = smov 27  }
  0x1f   :  { %8653 = sst [smem:[#allocation14_spill]] %s7682_s30 }
  0x20   :  { %8654 = sst [smem:[#allocation15_spill]] %s7687_s4 }
  0x21   :  { %s7702_s30 = sld [smem:[%s8630_s0 + %s7555_s22]]   ;;  %s7559_s22 = smov 28  }
  0x22   :  { %8655 = sst [smem:[#allocation16_spill]] %s7692_s6 }
  0x23   :  { %s7707_s4 = sld [smem:[%s8630_s0 + %s7556_s28]]   ;;  %s7560_s28 = smov 29  }
  0x24   :  { %8656 = sst [smem:[#allocation17_spill]] %s7697_s20 }
  0x25   :  { %s7712_s6 = sld [smem:[%s8630_s0 + %s7557_s7]]   ;;  %s7561_s7 = smov 30  }
  0x26   :  { %s7717_s20 = sld [smem:[%s8630_s0 + %s7558_s15]]   ;;  %s7562_s15 = smov 31  }
  0x27   :  { %8657 = sst [smem:[#allocation18_spill]] %s7702_s30 }
  0x28   :  { %s7722_s30 = sld [smem:[%s8630_s0 + %s7559_s22]]   ;;  %s7563_s22 = smov 32  }
  0x29   :  { %8658 = sst [smem:[#allocation19_spill]] %s7707_s4 }
  0x2a   :  { %s7727_s4 = sld [smem:[%s8630_s0 + %s7560_s28]]   ;;  %s7564_s28 = smov 33  }
  0x2b   :  { %8659 = sst [smem:[#allocation20_spill]] %s7712_s6 }
  0x2c   :  { %8660 = sst [smem:[#allocation21_spill]] %s7717_s20 }
  0x2d   :  { %s7732_s6 = sld [smem:[%s8630_s0 + %s7561_s7]]  }
  0x2e   :  { %8661 = sst [smem:[#allocation22_spill]] %s7722_s30 }
  0x2f   :  { %s7737_s20 = sld [smem:[%s8630_s0 + %s7562_s15]]  }
  0x30   :  { %8662 = sst [smem:[#allocation23_spill]] %s7727_s4 }
  0x31   :  { %s7742_s30 = sld [smem:[%s8630_s0 + %s7563_s22]]  }
  0x32   :  { %s7747_s4 = sld [smem:[%s8630_s0 + %s7564_s28]]  }
  0x33   :  { %73 = vsyncpa [#allocation3], 0  ;;  %v219_v0 = vld [vmem:[%s7582_s5] sm:$0xff]  ;;  %vm223_vm0 = vcmask 261120   ;;  %v220_v1 = vld [vmem:[%s7582_s5 + $0x8] sm:$0xff] }
  0x34   :  { %74 = vsyncpa [#allocation5], 0  ;;  %v224_v2 = vsel %vm223_vm0, %v219_v0, 0.0  ;;  %v227_v3 = vsel %vm223_vm0, %v220_v1, 0.0  ;;  %v267_v14 = vld [vmem:[%s7602_s21] sm:$0xff]  ;;  %v268_v15 = vld [vmem:[%s7602_s21 + $0x8] sm:$0xff]  ;;  %v139_v48 = vlaneseq }
  0x35   :  { %225 = vadd.xlane.f32.xlu0 %v224_v2  ;;  %v361_v16 = vld [vmem:[%s7612_s29] sm:$0xff]  ;;  %v6903_v17 = vpack.c.bf16 %v268_v15, %v267_v14  ;;  %v362_v18 = vld [vmem:[%s7612_s29 + $0x8] sm:$0xff]  ;;  %v269_v19 = vld [vmem:[%s7602_s21 + $0x10] sm:$0xff]  ;;  %v7565_v53 = vmov 0.0   ;;  %s8667_s0 = sld [smem:[#allocation11_spill]]  ;;  %s8668_s5 = sld [smem:[#allocation8_spill]] }
  0x36   :  { %v270_v20 = vld [vmem:[%s7602_s21 + $0x18] sm:$0xff]  ;;  %v6911_v21 = vpack.c.bf16 %v362_v18, %v361_v16  ;;  %v363_v23 = vld [vmem:[%s7612_s29 + $0x10] sm:$0xff]  ;;  %v447_v26 = vld [vmem:[%s7622_s8] sm:$0xff]  ;;  %v7786_v49 = vand.u32 127, %v139_v48  ;;  %s8671_s7 = sld [smem:[#allocation10_spill]]  ;;  %s8672_s10 = sld [smem:[#allocation13_spill]] }
  0x37   :  { %v6907_v22 = vpack.c.bf16 %v270_v20, %v269_v19  ;;  %6904 = vmatprep.subr.bf16.mxu0 %v6903_v17  ;;  %v364_v24 = vld [vmem:[%s7612_s29 + $0x18] sm:$0xff]  ;;  %v448_v27 = vld [vmem:[%s7622_s8 + $0x8] sm:$0xff]  ;;  %v5850_v36 = vld [vmem:[%s7592_s13] ss:$0 sm:$0xff]  ;;  %s8669_s13 = sld [smem:[#allocation9_spill]]  ;;  %s8673_s11 = sld [smem:[#allocation14_spill]] }
  0x38   :  { %6906 = vmatpush3.bf16.msra.mxu0 %v6903_v17  ;;  %6912 = vmatprep.subr.bf16.mxu1 %v6911_v21  ;;  %v6915_v25 = vpack.c.bf16 %v364_v24, %v363_v23  ;;  %v6919_v28 = vpack.c.bf16 %v448_v27, %v447_v26  ;;  %v5851_v38 = vld [vmem:[%s7597_s17] ss:$0 sm:$0xff]  ;;  %v449_v43 = vld [vmem:[%s7622_s8 + $0x10] sm:$0xff]  ;;  %v450_v44 = vld [vmem:[%s7622_s8 + $0x18] sm:$0xff]  ;;  %vm146_vm1 = vcmp.ge.s32.totalorder %v7786_v49, 8  ;;  %vm147_vm2 = vcmp.lt.s32.totalorder %v7786_v49, 16 }
  0x39   :  { %228 = vadd.xlane.f32.xlu0 %v227_v3  ;;  %6914 = vmatpush3.bf16.msra.mxu1 %v6911_v21  ;;  %v6923_v47 = vpack.c.bf16 %v450_v44, %v449_v43  ;;  %vm151_vm3 = vcmp.ge.s32.totalorder %v7786_v49, 16  ;;  %vm152_vm4 = vcmp.lt.s32.totalorder %v7786_v49, 24  ;;  %vm156_vm5 = vcmp.ge.s32.totalorder %v7786_v49, 24  ;;  %vm7794_vm7 = vmand %vm146_vm1, %vm147_vm2  ;;  %v5855_v51 = vld [vmem:[%s7617_s3] ss:$0 sm:$0xff]  ;;  %s8670_s17 = sld [smem:[#allocation12_spill]] }
  0x3a   :  { %6908 = vmatprep.subr.bf16.mxu0 %v6907_v22  ;;  %6916 = vmatprep.subr.bf16.mxu1 %v6915_v25  ;;  %vm157_vm6 = vcmp.lt.s32.totalorder %v7786_v49, 32  ;;  %vm142_vm8 = vcmp.lt.s32.totalorder %v7786_v49, 8  ;;  %vm153_vm9 = vmand %vm151_vm3, %vm152_vm4  ;;  %v5852_v52 = vld [vmem:[%s7607_s25] ss:$0 sm:$0xff]  ;;  %v7811_v55 = vsel %vm7794_vm7, 1.0, %v7565_v53  ;;  %vm624_vm1 = vcmask 130048  }
  0x3b   :  { %vm158_vm10 = vmand %vm156_vm5, %vm157_vm6  ;;  %v7806_v54 = vsel %vm142_vm8, 1.0, %v7565_v53  ;;  %v7814_v56 = vsel %vm153_vm9, 1.0, %v7565_v53  ;;  %v7566_v43 = vmov -1e+09   ;;  %vm7568_vm2 = vmmov 0   ;;  %s8674_s15 = sld [smem:[#allocation15_spill]] }
  0x3c   :  { %6910 = vmatpush3.bf16.msra.mxu0 %v6907_v22  ;;  %v7817_v59 = vsel %vm158_vm10, 1.0, %v7565_v53  ;;  %vm7829_vm11 = vmpackc.low %vm223_vm0, %vm223_vm0  ;;  %vm207_vm3 = vcmp.ge.s32.totalorder %v7786_v49, 12  ;;  %vm202_vm6 = vcmp.lt.s32.totalorder %v7786_v49, 12  ;;  %s8675_s16 = sld [smem:[#allocation18_spill]]  ;;  %s8676_s18 = sld [smem:[#allocation16_spill]]  ;;  %vm5762_vm9 = vcmask 7168  }
  0x3d   :  { %6918 = vmatpush3.bf16.msra.mxu1 %v6915_v25  ;;  %6920 = vmatprep.subr.bf16.mxu0 %v6919_v28  ;;  %vm211_vm5 = vmand %vm207_vm3, %vm152_vm4  ;;  %s8677_s22 = sld [smem:[#allocation17_spill]]  ;;  %s8678_s23 = sld [smem:[#allocation20_spill]]  ;;  %vm2817_vm4 = vcmask 523264  }
  0x3e   :  { %s8679_s26 = sld [smem:[#allocation19_spill]]  ;;  %s8680_s28 = sld [smem:[#allocation21_spill]] }
  0x3f   :  { %s8681_s1 = sld [smem:[#allocation22_spill]]  ;;  %s8682_s2 = sld [smem:[#allocation23_spill]] }
  0xc2   :  { %v226_v4 = vpop.xlane.xlu0 %225 }
  0xc3   :  { %v231_v5 = vmul.f32 0.03125, %v226_v4 }
  0xc5   :  { %v233_v6 = vsub.f32 %v219_v0, %v231_v5 }
  0xc6   :  { %v229_v7 = vpop.xlane.xlu0 %228 }
  0xc7   :  { %v232_v8 = vmul.f32 0.03125, %v229_v7  ;;  %v235_v9 = vmul.f32 %v233_v6, %v233_v6 }
  0xc9   :  { %v234_v10 = vsub.f32 %v220_v1, %v232_v8  ;;  %v237_v11 = vsel %vm223_vm0, %v235_v9, 0.0 }
  0xca   :  { %238 = vadd.xlane.f32.xlu1 %v237_v11 }
  0xcb   :  { %v236_v12 = vmul.f32 %v234_v10, %v234_v10 }
  0xcd   :  { %v240_v13 = vsel %vm223_vm0, %v236_v12, 0.0  ;;  %v5858_v12 = vld [vmem:[%s7627_s14] ss:$0 sm:$0xff] }
  0xce   :  { %241 = vadd.xlane.f32.xlu1 %v240_v13 }
 0x157   :  { %v239_v29 = vpop.xlane.xlu1 %238 }
 0x158   :  { %v243_v30 = vmul.f32 0.03125, %v239_v29 }
 0x15a   :  { %v245_v31 = vadd.f32 1e-05, %v243_v30 }
 0x15b   :  { %v242_v32 = vpop.xlane.xlu1 %241 }
 0x15c   :  { %7309 = vrsqrt.f32 %v245_v31  ;;  %v244_v33 = vmul.f32 0.03125, %v242_v32 }
 0x15e   :  { %v246_v34 = vadd.f32 1e-05, %v244_v33 }
 0x160   :  { %7311 = vrsqrt.f32 %v246_v34 }
 0x166   :  { %v7310_v35 = vpop.eup %7309 }
 0x167   :  { %v249_v37 = vmul.f32 %v7310_v35, %v233_v6 }
 0x169   :  { %v257_v39 = vmul.f32 %v5850_v36, %v249_v37 }
 0x16a   :  { %v7312_v40 = vpop.eup %7311 }
 0x16b   :  { %v7767_v41 = vadd.f32 %v5851_v38, %v257_v39  ;;  %v250_v42 = vmul.f32 %v7312_v40, %v234_v10  ;;  %v162_v40 = vshrl.u32 %v139_v48, 7 }
 0x16d   :  { %6384 = vmatprep.mubr.msk.f32.mxu0 %vm223_vm0, %v7767_v41  ;;  %6395 = vmatprep.mubr.msk.f32.mxu1 %vm223_vm0, %v7767_v41  ;;  %v258_v45 = vmul.f32 %v5850_v36, %v250_v42  ;;  %v5848_v42 = vadd.s32 4294967288, %v7786_v49  ;;  %vm176_vm13 = vcmp.le.s32.totalorder %v7786_v49, %v162_v40 }
 0x16e   :  { %vm178_vm15 = vmand %vm142_vm8, %vm176_vm13 }
 0x16f   :  { %v7775_v46 = vadd.f32 %v5851_v38, %v258_v45  ;;  %vm195_vm12 = vcmp.le.s32.totalorder %v5848_v42, %v162_v40  ;;  %v7896_v45 = vsel %vm178_vm15, 0.0, %v7566_v43 }
 0x170   :  { %vm197_vm14 = vmand %vm7794_vm7, %vm195_vm12  ;;  %vm1840_vm7 = vcmask 195584  }
 0x171   :  { %6385 = vmatmul.mubr.msk.f32.vlgmr.msra.gmra.mrb[0].mxu0 %vm223_vm0, %v7775_v46  ;;  %6396 = vmatmul.mubr.msk.f32.vlgmr.msra.gmra.mrb[0].mxu1 %vm223_vm0, %v7775_v46  ;;  %v7893_v44 = vsel %vm197_vm14, 0.0, %v7566_v43 }
 0x172   :  { %6922 = vmatpush3.bf16.msra.mxu0 %v6919_v28  ;;  %6406 = vmatprep.mubr.msk.f32.mxu0 %vm223_vm0, %v7767_v41 }
 0x173   :  { %6924 = vmatprep.subr.bf16.mxu0 %v6923_v47 }
 0x176   :  { %6926 = vmatpush3.bf16.msra.mxu0 %v6923_v47 }
 0x179   :  { %6407 = vmatmul.mubr.msk.f32.vlgmr.msra.gmra.mrb[2].mxu0 %vm223_vm0, %v7775_v46 }
 0x244   :  { %v6386_v57 = vpop.f32.mrb[0].mxu0  ;;  %v6397_v58 = vpop.f32.mrb[0].mxu1 }
 0x245   :  { %v444_v60 = vadd.f32 %v6397_v58, %v5855_v51  ;;  %v350_v61 = vpop.f32.mrb[1].mxu0  ;;  %v438_v62 = vpop.f32.mrb[1].mxu1  ;;  %v356_v8 = vadd.f32 %v6386_v57, %v5852_v52 }
 0x246   :  { %v351_v63 = vadd.f32 %v5852_v52, %v350_v61  ;;  %v439_v0 = vadd.f32 %v5855_v51, %v438_v62 }
 0x247   :  { %v536_v1 = vmul.f32 %v7806_v54, %v444_v60  ;;  %v652_v2 = vmul.f32 %v7811_v55, %v444_v60  ;;  %v929_v3 = vmul.f32 %v7814_v56, %v444_v60  ;;  %v1127_v4 = vmul.f32 %v7817_v59, %v444_v60 }
 0x248   :  { %v7823_v5 = vmul.f32 0.35355338, %v351_v63  ;;  %v535_v6 = vmul.f32 %v7806_v54, %v439_v0  ;;  %v651_v7 = vmul.f32 %v7811_v55, %v439_v0  ;;  %v928_v10 = vmul.f32 %v7814_v56, %v439_v0 }
 0x249   :  { %v1126_v11 = vmul.f32 %v7817_v59, %v439_v0  ;;  %v7848_v22 = vmul.f32 0.35355338, %v356_v8 }
 0x24a   :  { %v6927_v13 = vpack.c.bf16 %v536_v1, %v535_v6  ;;  %v533_v14 = vmul.f32 %v7806_v54, %v7823_v5  ;;  %v6933_v15 = vpack.c.bf16 %v652_v2, %v651_v7  ;;  %v649_v16 = vmul.f32 %v7811_v55, %v7823_v5 }
 0x24b   :  { %v6947_v18 = vpack.c.bf16 %v929_v3, %v928_v10  ;;  %v7843_v19 = vpack.c.bf16 %v1127_v4, %v1126_v11  ;;  %v534_v36 = vmul.f32 %v7806_v54, %v7848_v22  ;;  %v650_v37 = vmul.f32 %v7811_v55, %v7848_v22 }
 0x24c   :  { %v6408_v17 = vpop.f32.mrb[2].mxu0  ;;  %6929 = vmatprep.subr.msk.bf16.mxu1 %vm7829_vm11, %v6927_v13  ;;  %6413 = vmatprep.mubr.msk.f32.mxu1 %vm223_vm0, %v533_v14  ;;  %v926_v38 = vmul.f32 %v7814_v56, %v7823_v5  ;;  %v927_v39 = vmul.f32 %v7814_v56, %v7848_v22 }
 0x24d   :  { %v530_v20 = vadd.f32 %v6408_v17, %v5858_v12  ;;  %v524_v21 = vpop.f32.mrb[3].mxu0  ;;  %6935 = vmatprep.subr.msk.bf16.mxu0 %vm7829_vm11, %v6933_v15  ;;  %6420 = vmatprep.mubr.msk.f32.mxu0 %vm223_vm0, %v649_v16 }
 0x24e   :  { %v525_v23 = vadd.f32 %v5858_v12, %v524_v21  ;;  %6932 = vmatpush3.bf16.xpose.msk.msra.mxu1 %vm7829_vm11, %v6927_v13  ;;  %6938 = vmatpush3.bf16.xpose.msk.msra.mxu0 %vm7829_vm11, %v6933_v15 }
 0x24f   :  { %6949 = vmatprep.subr.msk.bf16.mxu0 %vm7829_vm11, %v6947_v18  ;;  %v763_v24 = vmul.f32 %v7811_v55, %v530_v20  ;;  %v648_v25 = vmul.f32 %v7806_v54, %v530_v20  ;;  %v1040_v26 = vmul.f32 %v7814_v56, %v530_v20  ;;  %v1238_v27 = vmul.f32 %v7817_v59, %v530_v20 }
 0x250   :  { %v762_v28 = vmul.f32 %v7811_v55, %v525_v23  ;;  %v647_v29 = vmul.f32 %v7806_v54, %v525_v23  ;;  %v1039_v30 = vmul.f32 %v7814_v56, %v525_v23  ;;  %v1237_v31 = vmul.f32 %v7817_v59, %v525_v23 }
 0x252   :  { %v6939_v32 = vpack.c.bf16 %v763_v24, %v762_v28  ;;  %v7864_v33 = vpack.c.bf16 %v648_v25, %v647_v29  ;;  %v7866_v34 = vpack.c.bf16 %v1040_v26, %v1039_v30  ;;  %v7868_v35 = vpack.c.bf16 %v1238_v27, %v1237_v31 }
 0x254   :  { %6940 = vmatprep.subr.bf16.mxu1 %v6939_v32 }
 0x255   :  { %6414 = vmatmul.mubr.msk.f32.vlgmr.msra.gmra.mrb[2].mxu1 %vm223_vm0, %v534_v36  ;;  %6421 = vmatmul.mubr.msk.f32.vlgmr.msra.gmra.mrb[4].mxu0 %vm223_vm0, %v650_v37 }
 0x256   :  { %6942 = vmatpush3.bf16.msra.mxu1 %v6939_v32  ;;  %6952 = vmatpush3.bf16.xpose.msk.msra.mxu0 %vm7829_vm11, %v6947_v18 }
 0x257   :  { %6441 = vmatprep.mubr.msk.f32.mxu0 %vm223_vm0, %v926_v38  ;;  %6944 = vmatprep.subr.bf16.mxu1 %v7864_v33 }
 0x25d   :  { %6442 = vmatmul.mubr.msk.f32.vlgmr.msra.gmra.mrb[6].mxu0 %vm223_vm0, %v927_v39 }
 0x328   :  { %v6415_v47 = vpop.f32.mrb[2].mxu1  ;;  %v6422_v48 = vpop.f32.mrb[4].mxu0 }
 0x329   :  { %v737_v51 = vadd.f32 %v6422_v48, %v7893_v44  ;;  %v615_v52 = vpop.f32.mrb[3].mxu1  ;;  %v731_v57 = vpop.f32.mrb[5].mxu0  ;;  %v621_v58 = vadd.f32 %v6415_v47, %v7893_v44 }
 0x32a   :  { %v732_v50 = vadd.f32 %v731_v57, %v7896_v45  ;;  %v616_v61 = vadd.f32 %v615_v52, %v7896_v45 }
 0x32b   :  { %v743_v60 = vsel %vm624_vm1, %v737_v51, -inf  ;;  %v628_v63 = vsel %vm624_vm1, %v621_v58, -inf }
 0x32c   :  { %744 = vmax.xlane.f32.xlu1 %v743_v60  ;;  %v740_v62 = vsel %vm624_vm1, %v732_v50, -inf  ;;  %v625_v1 = vsel %vm624_vm1, %v616_v61, -inf }
 0x32d   :  { %741 = vmax.xlane.f32.xlu0 %v740_v62 }
 0x330   :  { %v6443_v0 = vpop.f32.mrb[6].mxu0  ;;  %629 = vmax.xlane.f32.xlu1 %v628_v63 }
 0x331   :  { %v1014_v2 = vadd.f32 %v6443_v0, %v7893_v44  ;;  %v1008_v3 = vpop.f32.mrb[7].mxu0  ;;  %626 = vmax.xlane.f32.xlu0 %v625_v1 }
 0x332   :  { %v1009_v4 = vadd.f32 %v1008_v3, %v7896_v45 }
 0x333   :  { %v1020_v6 = vsel %vm624_vm1, %v1014_v2, -inf }
 0x334   :  { %1021 = vmax.xlane.f32.xlu1 %v1020_v6  ;;  %v1017_v7 = vsel %vm624_vm1, %v1009_v4, -inf }
 0x335   :  { %1018 = vmax.xlane.f32.xlu0 %v1017_v7 }
 0x3b9   :  { %v745_v8 = vpop.xlane.xlu1 %744 }
 0x3ba   :  { %v747_v10 = vsub.f32 %v737_v51, %v745_v8  ;;  %v742_v11 = vpop.xlane.xlu0 %741 }
 0x3bb   :  { %v746_v12 = vsub.f32 %v732_v50, %v742_v11 }
 0x3bc   :  { %v750_v13 = vmul.f32 1.442695, %v747_v10  ;;  %v1124_v10 = vmul.f32 %v7817_v59, %v7823_v5 }
 0x3bd   :  { %v748_v14 = vmul.f32 1.442695, %v746_v12  ;;  %v630_v15 = vpop.xlane.xlu1 %629 }
 0x3be   :  { %7313 = vpow2.f32 %v750_v13  ;;  %v632_v16 = vsub.f32 %v621_v58, %v630_v15  ;;  %v627_v17 = vpop.xlane.xlu0 %626 }
 0x3bf   :  { %7315 = vpow2.f32 %v748_v14  ;;  %v631_v18 = vsub.f32 %v616_v61, %v627_v17 }
 0x3c0   :  { %v635_v20 = vmul.f32 1.442695, %v632_v16 }
 0x3c1   :  { %v633_v21 = vmul.f32 1.442695, %v631_v18  ;;  %v1022_v23 = vpop.xlane.xlu1 %1021 }
 0x3c2   :  { %7317 = vpow2.f32 %v635_v20  ;;  %v1024_v24 = vsub.f32 %v1014_v2, %v1022_v23  ;;  %v1019_v25 = vpop.xlane.xlu0 %1018 }
 0x3c3   :  { %7319 = vpow2.f32 %v633_v21  ;;  %v1023_v26 = vsub.f32 %v1009_v4, %v1019_v25  ;;  %v1322_v25 = vld [vmem:[%s7632_s19] sm:$0xff] }
 0x3c4   :  { %v1027_v27 = vmul.f32 1.442695, %v1024_v24 }
 0x3c5   :  { %v1025_v28 = vmul.f32 1.442695, %v1023_v26  ;;  %v1323_v26 = vld [vmem:[%s7632_s19 + $0x8] sm:$0xff] }
 0x3c6   :  { %7321 = vpow2.f32 %v1027_v27  ;;  %v1324_v27 = vld [vmem:[%s7632_s19 + $0x10] sm:$0xff] }
 0x3c7   :  { %7323 = vpow2.f32 %v1025_v28  ;;  %v6967_v28 = vpack.c.bf16 %v1323_v26, %v1322_v25 }
 0x3c8   :  { %v7314_v29 = vpop.eup %7313 }
 0x3c9   :  { %v7316_v30 = vpop.eup %7315  ;;  %v755_v31 = vsel %vm624_vm1, %v7314_v29, 0.0  ;;  %6968 = vmatprep.subr.bf16.mxu0 %v6967_v28 }
 0x3ca   :  { %756 = vadd.xlane.f32.xlu1 %v755_v31  ;;  %v752_v32 = vsel %vm624_vm1, %v7316_v30, 0.0  ;;  %6970 = vmatpush3.bf16.msra.mxu0 %v6967_v28 }
 0x3cb   :  { %753 = vadd.xlane.f32.xlu0 %v752_v32 }
 0x3cc   :  { %v7318_v36 = vpop.eup %7317 }
 0x3cd   :  { %v7320_v37 = vpop.eup %7319  ;;  %v640_v38 = vsel %vm624_vm1, %v7318_v36, 0.0 }
 0x3ce   :  { %641 = vadd.xlane.f32.xlu1 %v640_v38  ;;  %v637_v39 = vsel %vm624_vm1, %v7320_v37, 0.0 }
 0x3cf   :  { %638 = vadd.xlane.f32.xlu0 %v637_v39 }
 0x3d0   :  { %v7322_v40 = vpop.eup %7321 }
 0x3d1   :  { %v7324_v42 = vpop.eup %7323  ;;  %v1032_v47 = vsel %vm624_vm1, %v7322_v40, 0.0 }
 0x3d2   :  { %1033 = vadd.xlane.f32.xlu1 %v1032_v47  ;;  %v1029_v48 = vsel %vm624_vm1, %v7324_v42, 0.0  ;;  %v5885_v47 = vld [vmem:[%s7637_s24] ss:$0 sm:$0xff] }
 0x3d3   :  { %1030 = vadd.xlane.f32.xlu0 %v1029_v48 }
 0x457   :  { %v757_v51 = vpop.xlane.xlu1 %756 }
 0x458   :  { %7325 = vrcp.f32 %v757_v51  ;;  %v754_v52 = vpop.xlane.xlu0 %753 }
 0x459   :  { %7327 = vrcp.f32 %v754_v52 }
 0x45b   :  { %v642_v50 = vpop.xlane.xlu1 %641 }
 0x45c   :  { %v639_v57 = vpop.xlane.xlu0 %638 }
 0x45d   :  { %7329 = vrcp.f32 %v639_v57 }
 0x45e   :  { %7331 = vrcp.f32 %v642_v50 }
 0x45f   :  { %v1034_v0 = vpop.xlane.xlu1 %1033 }
 0x460   :  { %v1031_v58 = vpop.xlane.xlu0 %1030 }
 0x461   :  { %7333 = vrcp.f32 %v1031_v58 }
 0x462   :  { %v7326_v60 = vpop.eup %7325  ;;  %7335 = vrcp.f32 %v1034_v0  ;;  %v1556_v0 = vld [vmem:[%s7662_s27 + $0x10] sm:$0xff] }
 0x463   :  { %v7328_v61 = vpop.eup %7327  ;;  %v761_v63 = vmul.f32 %v7326_v60, %v7314_v29  ;;  %v1325_v29 = vld [vmem:[%s7632_s19 + $0x18] sm:$0xff] }
 0x464   :  { %v759_v62 = vmul.f32 %v7328_v61, %v7316_v30  ;;  %v6971_v30 = vpack.c.bf16 %v1325_v29, %v1324_v27 }
 0x466   :  { %6427 = vmatprep.mubr.msk.f32.mxu1 %vm624_vm1, %v759_v62  ;;  %6972 = vmatprep.subr.bf16.mxu0 %v6971_v30  ;;  %v1554_v62 = vld [vmem:[%s7662_s27] sm:$0xff] }
 0x467   :  { %v7330_v1 = vpop.eup %7329  ;;  %6428 = vmatmul.mubr.msk.f32.vlgmr.msra.gmra.mrb[4].mxu1 %vm624_vm1, %v761_v63  ;;  %6974 = vmatpush3.bf16.msra.mxu0 %v6971_v30  ;;  %v1555_v63 = vld [vmem:[%s7662_s27 + $0x8] sm:$0xff] }
 0x468   :  { %6946 = vmatpush3.bf16.msra.mxu1 %v7864_v33  ;;  %v644_v2 = vmul.f32 %v7330_v1, %v7320_v37  ;;  %v7332_v3 = vpop.eup %7331  ;;  %v7567_v1 = vmov 0.0|0.0  }
 0x469   :  { %6954 = vmatprep.subr.bf16.mxu1 %v7866_v34  ;;  %v646_v6 = vmul.f32 %v7332_v3, %v7318_v36  ;;  %v1557_v3 = vld [vmem:[%s7662_s27 + $0x18] sm:$0xff] }
 0x46a   :  { %6434 = vmatprep.mubr.msk.f32.mxu1 %vm624_vm1, %v644_v2  ;;  %v6984_v2 = vpack.c.bf16 %v1555_v63, %v1554_v62  ;;  %v1654_v63 = vld [vmem:[%s8670_s17] sm:$0xff] }
 0x46b   :  { %v7334_v4 = vpop.eup %7333 }
 0x46c   :  { %v1036_v7 = vmul.f32 %v7334_v4, %v7324_v42  ;;  %v7336_v33 = vpop.eup %7335  ;;  %v7974_v4 = vld [vmem:[%s7587_s9 + $0x8] sm:$0xff] }
 0x46d   :  { %v1038_v8 = vmul.f32 %v7336_v33, %v7322_v40 }
 0x46f   :  { %6435 = vmatmul.mubr.msk.f32.vlgmr.msra.gmra.mrb[4].mxu1 %vm624_vm1, %v646_v6 }
 0x470   :  { %6956 = vmatpush3.bf16.msra.mxu1 %v7866_v34  ;;  %6448 = vmatprep.mubr.msk.f32.mxu1 %vm624_vm1, %v1036_v7  ;;  %v1125_v34 = vmul.f32 %v7817_v59, %v7848_v22 }
 0x471   :  { %6959 = vmatprep.subr.msk.bf16.mxu1 %vm7829_vm11, %v7843_v19 }
 0x477   :  { %6449 = vmatmul.mubr.msk.f32.vlgmr.msra.gmra.mrb[4].mxu1 %vm624_vm1, %v1038_v8 }
 0x478   :  { %6455 = vmatprep.mubr.msk.f32.mxu1 %vm223_vm0, %v1124_v10 }
 0x479   :  { %6962 = vmatpush3.bf16.xpose.msk.msra.mxu1 %vm7829_vm11, %v7843_v19 }
 0x47a   :  { %6964 = vmatprep.subr.bf16.mxu1 %v7868_v35 }
 0x480   :  { %6456 = vmatmul.mubr.msk.f32.vlgmr.msra.gmra.mrb[6].mxu1 %vm223_vm0, %v1125_v34 }
 0x481   :  { %6966 = vmatpush3.bf16.msra.mxu1 %v7868_v35 }
 0x482   :  { %6983 = vmatprep.subr.bf16.mxu1 %v7567_v1 }
 0x553   :  { %v6457_v11 = vpop.f32.mrb[6].mxu1 }
 0x554   :  { %v1212_v5 = vadd.f32 %v6457_v11, %v7893_v44  ;;  %v1206_v12 = vpop.f32.mrb[7].mxu1 }
 0x555   :  { %v1207_v13 = vadd.f32 %v1206_v12, %v7896_v45 }
 0x556   :  { %v1218_v14 = vsel %vm624_vm1, %v1212_v5, -inf }
 0x557   :  { %1219 = vmax.xlane.f32.xlu1 %v1218_v14  ;;  %v1215_v19 = vsel %vm624_vm1, %v1207_v13, -inf  ;;  %v7983_v14 = vld [vmem:[%s7587_s9 + $0x10] sm:$0xff] }
 0x558   :  { %1216 = vmax.xlane.f32.xlu0 %v1215_v19  ;;  %v1460_v19 = vld [vmem:[%s7652_s12] sm:$0xff] }
 0x5e4   :  { %v1220_v15 = vpop.xlane.xlu1 %1219 }
 0x5e5   :  { %v1222_v22 = vsub.f32 %v1212_v5, %v1220_v15  ;;  %v1217_v16 = vpop.xlane.xlu0 %1216  ;;  %v1461_v15 = vld [vmem:[%s7652_s12 + $0x8] sm:$0xff] }
 0x5e6   :  { %v1221_v35 = vsub.f32 %v1207_v13, %v1217_v16  ;;  %v1462_v16 = vld [vmem:[%s7652_s12 + $0x10] sm:$0xff] }
 0x5e7   :  { %v1225_v17 = vmul.f32 1.442695, %v1222_v22  ;;  %v6975_v22 = vpack.c.bf16 %v1461_v15, %v1460_v19 }
 0x5e8   :  { %v1223_v18 = vmul.f32 1.442695, %v1221_v35  ;;  %v1463_v35 = vld [vmem:[%s7652_s12 + $0x18] sm:$0xff] }
 0x5e9   :  { %7337 = vpow2.f32 %v1225_v17  ;;  %6976 = vmatprep.subr.bf16.mxu0 %v6975_v22  ;;  %v6979_v17 = vpack.c.bf16 %v1463_v35, %v1462_v16 }
 0x5ea   :  { %7339 = vpow2.f32 %v1223_v18  ;;  %v5893_v18 = vld [vmem:[%s8667_s0] ss:$0 sm:$0xff] }
 0x5f3   :  { %v7338_v20 = vpop.eup %7337 }
 0x5f4   :  { %v7340_v21 = vpop.eup %7339  ;;  %v1230_v23 = vsel %vm624_vm1, %v7338_v20, 0.0 }
 0x5f5   :  { %1231 = vadd.xlane.f32.xlu1 %v1230_v23  ;;  %v1227_v24 = vsel %vm624_vm1, %v7340_v21, 0.0 }
 0x5f6   :  { %1228 = vadd.xlane.f32.xlu0 %v1227_v24 }
 0x682   :  { %v1232_v31 = vpop.xlane.xlu1 %1231 }
 0x683   :  { %7341 = vrcp.f32 %v1232_v31  ;;  %v1229_v32 = vpop.xlane.xlu0 %1228 }
 0x684   :  { %7343 = vrcp.f32 %v1229_v32 }
 0x68d   :  { %v7342_v36 = vpop.eup %7341 }
 0x68e   :  { %v7344_v37 = vpop.eup %7343  ;;  %v1236_v39 = vmul.f32 %v7342_v36, %v7338_v20 }
 0x68f   :  { %v1234_v38 = vmul.f32 %v7344_v37, %v7340_v21 }
 0x691   :  { %6462 = vmatprep.mubr.msk.f32.mxu1 %vm624_vm1, %v1234_v38 }
 0x692   :  { %6463 = vmatmul.mubr.msk.f32.vlgmr.msra.gmra.mrb[4].mxu1 %vm624_vm1, %v1236_v39 }
 0x693   :  { %6495 = vmatprep.mubr.msk.f32.mxu1 %vm7568_vm2, %v7565_v53  ;;  %6985 = vmatpush3.bf16.msra.mxu1 %v6984_v2 }
 0x694   :  { %6986 = vmatprep.subr.bf16.mxu1 %v7567_v1 }
 0x765   :  { %v6464_v40 = vpop.f32.mrb[4].mxu1 }
 0x766   :  { %v1311_v42 = vpop.f32.mrb[5].mxu1 }
 0x767   :  { %6473 = vmatprep.mubr.msk.f32.mxu0 %vm223_vm0, %v1311_v42 }
 0x768   :  { %6474 = vmatmul.mubr.msk.f32.vlgmr.msra.gmra.mrb[8].mxu0 %vm223_vm0, %v6464_v40 }
 0x769   :  { %6978 = vmatpush3.bf16.msra.mxu0 %v6975_v22 }
 0x76a   :  { %6980 = vmatprep.subr.bf16.mxu0 %v6979_v17 }
 0x76d   :  { %6982 = vmatpush3.bf16.msra.mxu0 %v6979_v17 }
 0x76e   :  { %6989 = vmatprep.subr.bf16.mxu0 %v7567_v1 }
 0x83b   :  { %v6475_v48 = vpop.f32.mrb[8].mxu0 }
 0x83c   :  { %v1411_v51 = vadd.f32 %v6475_v48, %v5885_v47  ;;  %v1405_v52 = vpop.f32.mrb[9].mxu0 }
 0x83d   :  { %v1406_v57 = vadd.f32 %v5885_v47, %v1405_v52 }
 0x83e   :  { %v1415_v50 = vadd.f32 %v1411_v51, %v7775_v46  ;;  %v7967_v46 = vld [vmem:[%s7587_s9] sm:$0xff] }
 0x83f   :  { %v1414_v58 = vadd.f32 %v1406_v57, %v7767_v41  ;;  %v6987_v41 = vpack.c.bf16 %v1557_v3, %v1556_v0  ;;  %v5888_v57 = vld [vmem:[%s8668_s5] ss:$0 sm:$0xff]  ;;  %v1655_v0 = vld [vmem:[%s8670_s17 + $0x8] sm:$0xff] }
 0x840   :  { %v1421_v60 = vsel %vm223_vm0, %v1415_v50, 0.0 }
 0x841   :  { %1422 = vadd.xlane.f32.xlu1 %v1421_v60  ;;  %v1418_v61 = vsel %vm223_vm0, %v1414_v58, 0.0  ;;  %6988 = vmatpush3.bf16.msra.mxu1 %v6987_v41  ;;  %v6990_v41 = vpack.c.bf16 %v1655_v0, %v1654_v63 }
 0x842   :  { %1419 = vadd.xlane.f32.xlu0 %v1418_v61  ;;  %v5889_v61 = vld [vmem:[%s8669_s13] ss:$0 sm:$0xff] }
 0x844   :  { %6496 = vmatmul.mubr.msk.f32.vlgmr.msra.gmra.mrb[8].mxu1 %vm223_vm0, %v7967_v46 }
 0x845   :  { %6498 = vmatprep.mubr.msk.f32.mxu1 %vm7568_vm2, %v7565_v53 }
 0x848   :  { %6499 = vmatmul.mubr.msk.f32.gmra.mrb[10].mxu1 %vm223_vm0, %v7974_v4 }
 0x849   :  { %6501 = vmatprep.mubr.msk.f32.mxu1 %vm7568_vm2, %v7565_v53 }
 0x84c   :  { %6502 = vmatmul.mubr.msk.f32.gmra.mrb[12].mxu1 %vm223_vm0, %v7983_v14 }
 0x8ce   :  { %v1423_v6 = vpop.xlane.xlu1 %1422 }
 0x8cf   :  { %v1425_v7 = vmul.f32 0.03125, %v1423_v6  ;;  %v1420_v33 = vpop.xlane.xlu0 %1419 }
 0x8d0   :  { %v1424_v8 = vmul.f32 0.03125, %v1420_v33  ;;  %v1657_v33 = vld [vmem:[%s8670_s17 + $0x18] sm:$0xff] }
 0x8d1   :  { %v1427_v10 = vsub.f32 %v1415_v50, %v1425_v7  ;;  %v1656_v7 = vld [vmem:[%s8670_s17 + $0x10] sm:$0xff] }
 0x8d2   :  { %v1426_v34 = vsub.f32 %v1414_v58, %v1424_v8  ;;  %v6993_v8 = vpack.c.bf16 %v1657_v33, %v1656_v7 }
 0x8d3   :  { %v1429_v11 = vmul.f32 %v1427_v10, %v1427_v10 }
 0x8d4   :  { %v1428_v5 = vmul.f32 %v1426_v34, %v1426_v34 }
 0x8d5   :  { %v1433_v12 = vsel %vm223_vm0, %v1429_v11, 0.0 }
 0x8d6   :  { %1434 = vadd.xlane.f32.xlu1 %v1433_v12  ;;  %v1430_v13 = vsel %vm223_vm0, %v1428_v5, 0.0 }
 0x8d7   :  { %1431 = vadd.xlane.f32.xlu0 %v1430_v13 }
 0x917   :  { %v1640_v20 = vpop.f32.mrb[8].mxu1 }
 0x918   :  { %v1641_v21 = vadd.f32 %v5893_v18, %v1640_v20  ;;  %v6497_v23 = vpop.f32.mrb[9].mxu1 }
 0x91a   :  { %v1868_v25 = vmul.f32 %v7811_v55, %v1641_v21  ;;  %v1747_v30 = vmul.f32 %v7806_v54, %v1641_v21  ;;  %v2150_v32 = vmul.f32 %v7814_v56, %v1641_v21  ;;  %v2353_v11 = vmul.f32 %v7817_v59, %v1641_v21  ;;  %v5897_v21 = vld [vmem:[%s8672_s10] ss:$0 sm:$0xff] }
 0x91b   :  { %v1645_v24 = vpop.f32.mrb[10].mxu1 }
 0x91c   :  { %v1646_v26 = vadd.f32 %v5893_v18, %v1645_v24  ;;  %v6500_v27 = vpop.f32.mrb[11].mxu1 }
 0x91e   :  { %v1869_v28 = vmul.f32 %v7811_v55, %v1646_v26  ;;  %v1748_v31 = vmul.f32 %v7806_v54, %v1646_v26  ;;  %v2151_v36 = vmul.f32 %v7814_v56, %v1646_v26  ;;  %v2354_v5 = vmul.f32 %v7817_v59, %v1646_v26 }
 0x920   :  { %v7001_v29 = vpack.c.bf16 %v1869_v28, %v1868_v25  ;;  %v6995_v37 = vpack.c.bf16 %v1748_v31, %v1747_v30  ;;  %v7999_v38 = vpack.c.bf16 %v2151_v36, %v2150_v32  ;;  %v8044_v12 = vpack.c.bf16 %v2354_v5, %v2353_v11 }
 0x922   :  { %6997 = vmatprep.subr.msk.bf16.mxu1 %vm7829_vm11, %v6995_v37 }
 0x923   :  { %7000 = vmatpush3.bf16.xpose.msk.msra.mxu1 %vm7829_vm11, %v6995_v37 }
 0x963   :  { %v1435_v39 = vpop.xlane.xlu1 %1434 }
 0x964   :  { %v1437_v40 = vmul.f32 0.03125, %v1435_v39  ;;  %v1432_v42 = vpop.xlane.xlu0 %1431 }
 0x965   :  { %v1436_v47 = vmul.f32 0.03125, %v1432_v42 }
 0x966   :  { %v1439_v48 = vadd.f32 1e-05, %v1437_v40 }
 0x967   :  { %v1438_v51 = vadd.f32 1e-05, %v1436_v47 }
 0x968   :  { %7345 = vrsqrt.f32 %v1439_v48 }
 0x969   :  { %7347 = vrsqrt.f32 %v1438_v51 }
 0x972   :  { %v7346_v52 = vpop.eup %7345 }
 0x973   :  { %v7348_v50 = vpop.eup %7347  ;;  %v1443_v58 = vmul.f32 %v7346_v52, %v1427_v10  ;;  %v1650_v10 = vpop.f32.mrb[12].mxu1 }
 0x974   :  { %v1442_v60 = vmul.f32 %v7348_v50, %v1426_v34  ;;  %v8036_v34 = vadd.f32 %v5893_v18, %v1650_v10  ;;  %v8108_v50 = vsel %vm211_vm5, 0.0, %v7566_v43 }
 0x975   :  { %v1451_v62 = vmul.f32 %v5888_v57, %v1443_v58  ;;  %v8111_v58 = vsel %vm202_vm6, 0.0, %v7566_v43 }
 0x976   :  { %v1450_v2 = vmul.f32 %v5888_v57, %v1442_v60  ;;  %v1749_v13 = vmul.f32 %v7806_v54, %v8036_v34  ;;  %v2152_v27 = vmul.f32 %v7814_v56, %v8036_v34 }
 0x977   :  { %v8011_v6 = vadd.f32 %v5889_v61, %v1451_v62 }
 0x978   :  { %v8009_v3 = vadd.f32 %v5889_v61, %v1450_v2  ;;  %6525 = vmatprep.subr.msk.mxu1 %vm223_vm0, %v1749_v13 }
 0x979   :  { %6526 = vmatpush3.xpose.msk.msra.mxu1 %vm223_vm0, %v1749_v13 }
 0x97a   :  { %6484 = vmatprep.mubr.msk.f32.mxu0 %vm223_vm0, %v8009_v3 }
 0x97b   :  { %6485 = vmatmul.mubr.msk.f32.vlgmr.msra.gmra.mrb[10].mxu0 %vm223_vm0, %v8011_v6 }
 0x97c   :  { %6991 = vmatpush3.bf16.msra.mxu0 %v6990_v41  ;;  %6512 = vmatprep.mubr.msk.f32.mxu0 %vm7568_vm2, %v7565_v53 }
 0x97d   :  { %6992 = vmatprep.subr.bf16.mxu0 %v7567_v1 }
 0x980   :  { %6994 = vmatpush3.bf16.msra.mxu0 %v6993_v8 }
 0x981   :  { %7003 = vmatprep.subr.msk.bf16.mxu0 %vm7829_vm11, %v7001_v29 }
 0x983   :  { %6513 = vmatmul.mubr.msk.f32.vlgmr.msra.gmra.mrb[12].mxu0 %vm223_vm0, %v7967_v46  ;;  %v6503_v46 = vpop.f32.mrb[13].mxu1 }
 0x984   :  { %6515 = vmatprep.mubr.msk.f32.mxu0 %vm7568_vm2, %v7565_v53 }
 0x987   :  { %6516 = vmatmul.mubr.msk.f32.gmra.mrb[14].mxu0 %vm223_vm0, %v7974_v4  ;;  %v1870_v4 = vmul.f32 %v7811_v55, %v8036_v34 }
 0x988   :  { %6518 = vmatprep.mubr.msk.f32.mxu0 %vm7568_vm2, %v7565_v53 }
 0x989   :  { %7006 = vmatpush3.bf16.xpose.msk.msra.mxu0 %vm7829_vm11, %v7001_v29 }
 0x98a   :  { %6534 = vmatprep.subr.msk.mxu0 %vm223_vm0, %v1870_v4 }
 0x98b   :  { %6519 = vmatmul.mubr.msk.f32.gmra.mrb[16].mxu0 %vm223_vm0, %v7983_v14  ;;  %v5890_v14 = vld [vmem:[%s8671_s7] ss:$0 sm:$0xff] }
 0x991   :  { %6535 = vmatpush3.xpose.msk.msra.mxu0 %vm223_vm0, %v1870_v4 }
 0x992   :  { %7017 = vmatprep.subr.msk.bf16.mxu0 %vm7829_vm11, %v7999_v38 }
 0xa4e   :  { %v6486_v19 = vpop.f32.mrb[10].mxu0 }
 0xa4f   :  { %v1549_v15 = vadd.f32 %v6486_v19, %v5890_v14  ;;  %v1543_v22 = vpop.f32.mrb[11].mxu0 }
 0xa50   :  { %v1544_v16 = vadd.f32 %v5890_v14, %v1543_v22 }
 0xa51   :  { %v8054_v35 = vmul.f32 0.35355338, %v1549_v15 }
 0xa52   :  { %v8056_v17 = vmul.f32 0.35355338, %v1544_v16 }
 0xa53   :  { %v1746_v23 = vmul.f32 %v7806_v54, %v8054_v35  ;;  %v1867_v24 = vmul.f32 %v7811_v55, %v8054_v35  ;;  %v2149_v51 = vmul.f32 %v7814_v56, %v8054_v35 }
 0xa54   :  { %v1745_v18 = vmul.f32 %v7806_v54, %v8056_v17  ;;  %v1866_v20 = vmul.f32 %v7811_v55, %v8056_v17  ;;  %v2148_v25 = vmul.f32 %v7814_v56, %v8056_v17 }
 0xa56   :  { %6527 = vmatprep.mubr.msk.f32.mxu1 %vm223_vm0, %v1745_v18  ;;  %6536 = vmatprep.mubr.msk.f32.mxu0 %vm223_vm0, %v1866_v20  ;;  %v1731_v26 = vpop.f32.mrb[12].mxu0 }
 0xa57   :  { %6528 = vmatmul.mubr.msk.f32.vlgmr.msra.gmra.mrb[14].mxu1 %vm223_vm0, %v1746_v23  ;;  %6537 = vmatmul.mubr.msk.f32.vlgmr.msra.gmra.mrb[18].mxu0 %vm223_vm0, %v1867_v24  ;;  %v8075_v28 = vadd.f32 %v5897_v21, %v1731_v26  ;;  %v6514_v29 = vpop.f32.mrb[13].mxu0 }
 0xa58   :  { %7020 = vmatpush3.bf16.xpose.msk.msra.mxu0 %vm7829_vm11, %v7999_v38  ;;  %6563 = vmatprep.mubr.msk.f32.mxu0 %vm223_vm0, %v2148_v25 }
 0xa59   :  { %6561 = vmatprep.subr.msk.mxu0 %vm223_vm0, %v2152_v27  ;;  %v1983_v36 = vmul.f32 %v7811_v55, %v8075_v28  ;;  %v1863_v38 = vmul.f32 %v7806_v54, %v8075_v28 }
 0xa5a   :  { %v1736_v30 = vpop.f32.mrb[14].mxu0 }
 0xa5b   :  { %v8082_v31 = vadd.f32 %v5897_v21, %v1736_v30  ;;  %v6517_v32 = vpop.f32.mrb[15].mxu0 }
 0xa5d   :  { %v1984_v37 = vmul.f32 %v7811_v55, %v8082_v31  ;;  %v1864_v47 = vmul.f32 %v7806_v54, %v8082_v31 }
 0xa5e   :  { %v1741_v39 = vpop.f32.mrb[16].mxu0 }
 0xa5f   :  { %v8088_v40 = vadd.f32 %v5897_v21, %v1741_v39  ;;  %v7007_v42 = vpack.c.bf16 %v1984_v37, %v1983_v36  ;;  %v6520_v48 = vpop.f32.mrb[17].mxu0  ;;  %v8100_v57 = vpack.c.bf16 %v1864_v47, %v1863_v38 }
 0xa60   :  { %6562 = vmatpush3.xpose.msk.msra.mxu0 %vm223_vm0, %v2152_v27 }
 0xa61   :  { %7008 = vmatprep.subr.bf16.mxu1 %v7007_v42  ;;  %v1985_v52 = vmul.f32 %v7811_v55, %v8088_v40 }
 0xa62   :  { %7010 = vmatpush3.bf16.msra.mxu1 %v7007_v42 }
 0xa63   :  { %6564 = vmatmul.mubr.msk.f32.vlgmr.msra.gmra.mrb[20].mxu0 %vm223_vm0, %v2149_v51  ;;  %6543 = vmatprep.subr.mxu1 %v1985_v52 }
 0xa66   :  { %6544 = vmatpush3.msra.mxu1 %v1985_v52 }
 0xa67   :  { %7012 = vmatprep.subr.bf16.mxu1 %v8100_v57 }
 0xb2a   :  { %v6529_v60 = vpop.f32.mrb[14].mxu1  ;;  %v6538_v61 = vpop.f32.mrb[18].mxu0 }
 0xb2b   :  { %v1958_v62 = vadd.f32 %v6538_v61, %v8108_v50  ;;  %v1831_v63 = vpop.f32.mrb[15].mxu1  ;;  %v1952_v0 = vpop.f32.mrb[19].mxu0  ;;  %v1837_v41 = vadd.f32 %v6529_v60, %v8108_v50 }
 0xb2c   :  { %v1953_v2 = vadd.f32 %v1952_v0, %v8111_v58  ;;  %v1832_v33 = vadd.f32 %v1831_v63, %v8111_v58 }
 0xb2d   :  { %v1964_v7 = vsel %vm1840_vm7, %v1958_v62, -inf  ;;  %v1844_v43 = vsel %vm1840_vm7, %v1837_v41, -inf }
 0xb2e   :  { %1965 = vmax.xlane.f32.xlu1 %v1964_v7  ;;  %v1961_v8 = vsel %vm1840_vm7, %v1953_v2, -inf  ;;  %v1841_v10 = vsel %vm1840_vm7, %v1832_v33, -inf }
 0xb2f   :  { %1962 = vmax.xlane.f32.xlu0 %v1961_v8 }
 0xb32   :  { %1845 = vmax.xlane.f32.xlu1 %v1844_v43 }
 0xb33   :  { %1842 = vmax.xlane.f32.xlu0 %v1841_v10 }
 0xb36   :  { %v6565_v46 = vpop.f32.mrb[20].mxu0 }
 0xb37   :  { %v2240_v11 = vadd.f32 %v6565_v46, %v8108_v50  ;;  %v2234_v5 = vpop.f32.mrb[21].mxu0 }
 0xb38   :  { %v2235_v4 = vadd.f32 %v2234_v5, %v8111_v58 }
 0xb39   :  { %v2246_v13 = vsel %vm1840_vm7, %v2240_v11, -inf }
 0xb3a   :  { %2247 = vmax.xlane.f32.xlu1 %v2246_v13  ;;  %v2243_v14 = vsel %vm1840_vm7, %v2235_v4, -inf }
 0xb3b   :  { %2244 = vmax.xlane.f32.xlu0 %v2243_v14  ;;  %v1865_v14 = vmul.f32 %v7806_v54, %v8088_v40 }
 0xbbb   :  { %v1966_v19 = vpop.xlane.xlu1 %1965 }
 0xbbc   :  { %v1968_v15 = vsub.f32 %v1958_v62, %v1966_v19  ;;  %v1963_v22 = vpop.xlane.xlu0 %1962  ;;  %v2265_v19 = vmul.f32 %v7814_v56, %v8075_v28 }
 0xbbd   :  { %v1967_v16 = vsub.f32 %v1953_v2, %v1963_v22 }
 0xbbe   :  { %v1971_v18 = vmul.f32 1.442695, %v1968_v15  ;;  %v2266_v15 = vmul.f32 %v7814_v56, %v8082_v31 }
 0xbbf   :  { %v1969_v20 = vmul.f32 1.442695, %v1967_v16  ;;  %v1846_v21 = vpop.xlane.xlu1 %1845 }
 0xbc0   :  { %7349 = vpow2.f32 %v1971_v18  ;;  %v1848_v23 = vsub.f32 %v1837_v41, %v1846_v21  ;;  %v1843_v24 = vpop.xlane.xlu0 %1842  ;;  %v7021_v18 = vpack.c.bf16 %v2266_v15, %v2265_v19 }
 0xbc1   :  { %7351 = vpow2.f32 %v1969_v20  ;;  %v1847_v25 = vsub.f32 %v1832_v33, %v1843_v24 }
 0xbc2   :  { %v1851_v26 = vmul.f32 1.442695, %v1848_v23  ;;  %v2267_v23 = vmul.f32 %v7814_v56, %v8088_v40 }
 0xbc3   :  { %v1849_v27 = vmul.f32 1.442695, %v1847_v25 }
 0xbc4   :  { %7353 = vpow2.f32 %v1851_v26  ;;  %v2351_v26 = vmul.f32 %v7817_v59, %v8056_v17 }
 0xbc5   :  { %7355 = vpow2.f32 %v1849_v27  ;;  %v2355_v27 = vmul.f32 %v7817_v59, %v8036_v34  ;;  %v2470_v34 = vmul.f32 %v7817_v59, %v8088_v40 }
 0xbc7   :  { %v2248_v29 = vpop.xlane.xlu1 %2247 }
 0xbc8   :  { %v2250_v30 = vsub.f32 %v2240_v11, %v2248_v29  ;;  %v2245_v32 = vpop.xlane.xlu0 %2244  ;;  %v2468_v29 = vmul.f32 %v7817_v59, %v8075_v28 }
 0xbc9   :  { %v2249_v36 = vsub.f32 %v2235_v4, %v2245_v32  ;;  %v2352_v32 = vmul.f32 %v7817_v59, %v8054_v35 }
 0xbca   :  { %v7350_v37 = vpop.eup %7349  ;;  %v2253_v39 = vmul.f32 1.442695, %v2250_v30  ;;  %v2469_v30 = vmul.f32 %v7817_v59, %v8082_v31 }
 0xbcb   :  { %v7352_v42 = vpop.eup %7351  ;;  %v2251_v38 = vmul.f32 1.442695, %v2249_v36  ;;  %v1976_v47 = vsel %vm1840_vm7, %v7350_v37, 0.0 }
 0xbcc   :  { %7357 = vpow2.f32 %v2253_v39  ;;  %1977 = vadd.xlane.f32.xlu1 %v1976_v47  ;;  %v1973_v48 = vsel %vm1840_vm7, %v7352_v42, 0.0  ;;  %v7031_v17 = vpack.c.bf16 %v2469_v30, %v2468_v29 }
 0xbcd   :  { %7359 = vpow2.f32 %v2251_v38  ;;  %1974 = vadd.xlane.f32.xlu0 %v1973_v48 }
 0xbce   :  { %v7354_v51 = vpop.eup %7353 }
 0xbcf   :  { %v7356_v52 = vpop.eup %7355  ;;  %v1856_v60 = vsel %vm1840_vm7, %v7354_v51, 0.0 }
 0xbd0   :  { %1857 = vadd.xlane.f32.xlu1 %v1856_v60  ;;  %v1853_v61 = vsel %vm1840_vm7, %v7356_v52, 0.0 }
 0xbd1   :  { %1854 = vadd.xlane.f32.xlu0 %v1853_v61 }
 0xbd6   :  { %v7358_v62 = vpop.eup %7357 }
 0xbd7   :  { %v7360_v63 = vpop.eup %7359  ;;  %v2258_v0 = vsel %vm1840_vm7, %v7358_v62, 0.0 }
 0xbd8   :  { %2259 = vadd.xlane.f32.xlu1 %v2258_v0  ;;  %v2255_v2 = vsel %vm1840_vm7, %v7360_v63, 0.0  ;;  %v2556_v0 = vld [vmem:[%s8673_s11 + $0x10] sm:$0xff] }
 0xbd9   :  { %2256 = vadd.xlane.f32.xlu0 %v2255_v2 }
 0xc59   :  { %v1978_v41 = vpop.xlane.xlu1 %1977 }
 0xc5a   :  { %7361 = vrcp.f32 %v1978_v41  ;;  %v1975_v7 = vpop.xlane.xlu0 %1974  ;;  %v2557_v41 = vld [vmem:[%s8673_s11 + $0x18] sm:$0xff] }
 0xc5b   :  { %7363 = vrcp.f32 %v1975_v7  ;;  %v7039_v7 = vpack.c.bf16 %v2557_v41, %v2556_v0  ;;  %v2803_v41 = vld [vmem:[%s8678_s23 + $0x8] sm:$0xff] }
 0xc5d   :  { %v1858_v8 = vpop.xlane.xlu1 %1857 }
 0xc5e   :  { %v1855_v33 = vpop.xlane.xlu0 %1854 }
 0xc5f   :  { %7365 = vrcp.f32 %v1855_v33 }
 0xc60   :  { %7367 = vrcp.f32 %v1858_v8 }
 0xc64   :  { %v7362_v43 = vpop.eup %7361 }
 0xc65   :  { %v7364_v10 = vpop.eup %7363  ;;  %v1982_v5 = vmul.f32 %v7362_v43, %v7350_v37  ;;  %v2260_v4 = vpop.xlane.xlu1 %2259 }
 0xc66   :  { %v2257_v46 = vpop.xlane.xlu0 %2256  ;;  %v1980_v11 = vmul.f32 %v7364_v10, %v7352_v42 }
 0xc67   :  { %7369 = vrcp.f32 %v2257_v46 }
 0xc68   :  { %6545 = vmatprep.mubr.msk.f32.mxu1 %vm1840_vm7, %v1980_v11  ;;  %7371 = vrcp.f32 %v2260_v4 }
 0xc69   :  { %v7366_v13 = vpop.eup %7365  ;;  %6546 = vmatmul.mubr.msk.f32.vlgmr.msra.gmra.mrb[16].mxu1 %vm1840_vm7, %v1982_v5 }
 0xc6a   :  { %7014 = vmatpush3.bf16.msra.mxu1 %v8100_v57  ;;  %v1860_v22 = vmul.f32 %v7366_v13, %v7356_v52  ;;  %v7368_v16 = vpop.eup %7367  ;;  %v5929_v13 = vld [vmem:[%s8674_s15] ss:$0 sm:$0xff] }
 0xc6b   :  { %6552 = vmatprep.subr.mxu1 %v1865_v14  ;;  %v1862_v20 = vmul.f32 %v7368_v16, %v7354_v51 }
 0xc6c   :  { %6554 = vmatprep.mubr.msk.f32.mxu1 %vm1840_vm7, %v1860_v22 }
 0xc6e   :  { %6553 = vmatpush3.msra.mxu1 %v1865_v14 }
 0xc6f   :  { %7022 = vmatprep.subr.bf16.mxu1 %v7021_v18 }
 0xc71   :  { %v7370_v21 = vpop.eup %7369  ;;  %6555 = vmatmul.mubr.msk.f32.vlgmr.msra.gmra.mrb[16].mxu1 %vm1840_vm7, %v1862_v20 }
 0xc72   :  { %7024 = vmatpush3.bf16.msra.mxu1 %v7021_v18  ;;  %v2262_v24 = vmul.f32 %v7370_v21, %v7360_v63  ;;  %v7372_v25 = vpop.eup %7371  ;;  %v2555_v63 = vld [vmem:[%s8673_s11 + $0x8] sm:$0xff] }
 0xc73   :  { %6570 = vmatprep.subr.mxu1 %v2267_v23  ;;  %v2264_v57 = vmul.f32 %v7372_v25, %v7358_v62  ;;  %v2554_v62 = vld [vmem:[%s8673_s11] sm:$0xff] }
 0xc74   :  { %6572 = vmatprep.mubr.msk.f32.mxu1 %vm1840_vm7, %v2262_v24  ;;  %v7035_v2 = vpack.c.bf16 %v2555_v63, %v2554_v62 }
 0xc76   :  { %6571 = vmatpush3.msra.mxu1 %v2267_v23  ;;  %7036 = vmatprep.subr.bf16.mxu0 %v7035_v2 }
 0xc77   :  { %7027 = vmatprep.subr.msk.bf16.mxu1 %vm7829_vm11, %v8044_v12  ;;  %7038 = vmatpush3.bf16.msra.mxu0 %v7035_v2  ;;  %v2802_v2 = vld [vmem:[%s8678_s23] sm:$0xff] }
 0xc78   :  { %7040 = vmatprep.subr.bf16.mxu0 %v7039_v7 }
 0xc79   :  { %6573 = vmatmul.mubr.msk.f32.vlgmr.msra.gmra.mrb[16].mxu1 %vm1840_vm7, %v2264_v57 }
 0xc7a   :  { %6581 = vmatprep.mubr.msk.f32.mxu1 %vm223_vm0, %v2351_v26 }
 0xc7b   :  { %7042 = vmatpush3.bf16.msra.mxu0 %v7039_v7  ;;  %v7051_v7 = vpack.c.bf16 %v2803_v41, %v2802_v2 }
 0xc7d   :  { %7030 = vmatpush3.bf16.xpose.msk.msra.mxu1 %vm7829_vm11, %v8044_v12 }
 0xc7e   :  { %6579 = vmatprep.subr.msk.mxu1 %vm223_vm0, %v2355_v27 }
 0xc85   :  { %6580 = vmatpush3.xpose.msk.msra.mxu1 %vm223_vm0, %v2355_v27 }
 0xc86   :  { %7032 = vmatprep.subr.bf16.mxu1 %v7031_v17 }
 0xc88   :  { %6582 = vmatmul.mubr.msk.f32.vlgmr.msra.gmra.mrb[18].mxu1 %vm223_vm0, %v2352_v32  ;;  %v2693_v32 = vld [vmem:[%s8675_s16 + $0x8] sm:$0xff] }
 0xc89   :  { %7034 = vmatpush3.bf16.msra.mxu1 %v7031_v17  ;;  %v2692_v17 = vld [vmem:[%s8675_s16] sm:$0xff] }
 0xc8a   :  { %6588 = vmatprep.subr.mxu1 %v2470_v34 }
 0xc8d   :  { %6589 = vmatpush3.msra.mxu1 %v2470_v34  ;;  %v7043_v34 = vpack.c.bf16 %v2693_v32, %v2692_v17 }
 0xc8f   :  { %7044 = vmatprep.subr.bf16.mxu0 %v7043_v34 }
 0xd5b   :  { %v6583_v12 = vpop.f32.mrb[18].mxu1 }
 0xd5c   :  { %v2443_v28 = vadd.f32 %v6583_v12, %v8108_v50  ;;  %v2437_v36 = vpop.f32.mrb[19].mxu1  ;;  %v2694_v12 = vld [vmem:[%s8675_s16 + $0x10] sm:$0xff] }
 0xd5d   :  { %v2438_v31 = vadd.f32 %v2437_v36, %v8111_v58 }
 0xd5e   :  { %v2449_v37 = vsel %vm1840_vm7, %v2443_v28, -inf }
 0xd5f   :  { %2450 = vmax.xlane.f32.xlu1 %v2449_v37  ;;  %v2446_v35 = vsel %vm1840_vm7, %v2438_v31, -inf }
 0xd60   :  { %2447 = vmax.xlane.f32.xlu0 %v2446_v35 }
 0xdec   :  { %v2451_v39 = vpop.xlane.xlu1 %2450 }
 0xded   :  { %v2453_v40 = vsub.f32 %v2443_v28, %v2451_v39  ;;  %v2448_v42 = vpop.xlane.xlu0 %2447  ;;  %v2695_v28 = vld [vmem:[%s8675_s16 + $0x18] sm:$0xff] }
 0xdee   :  { %v2452_v38 = vsub.f32 %v2438_v31, %v2448_v42  ;;  %v7047_v36 = vpack.c.bf16 %v2695_v28, %v2694_v12 }
 0xdef   :  { %v2456_v47 = vmul.f32 1.442695, %v2453_v40 }
 0xdf0   :  { %v2454_v48 = vmul.f32 1.442695, %v2452_v38 }
 0xdf1   :  { %7373 = vpow2.f32 %v2456_v47  ;;  %v5932_v47 = vld [vmem:[%s8676_s18] ss:$0 sm:$0xff] }
 0xdf2   :  { %7375 = vpow2.f32 %v2454_v48 }
 0xdfb   :  { %v7374_v51 = vpop.eup %7373 }
 0xdfc   :  { %v7376_v52 = vpop.eup %7375  ;;  %v2461_v60 = vsel %vm1840_vm7, %v7374_v51, 0.0 }
 0xdfd   :  { %2462 = vadd.xlane.f32.xlu1 %v2461_v60  ;;  %v2458_v61 = vsel %vm1840_vm7, %v7376_v52, 0.0  ;;  %v5933_v60 = vld [vmem:[%s8677_s22] ss:$0 sm:$0xff] }
 0xdfe   :  { %2459 = vadd.xlane.f32.xlu0 %v2458_v61 }
 0xe8a   :  { %v2463_v33 = vpop.xlane.xlu1 %2462 }
 0xe8b   :  { %7377 = vrcp.f32 %v2463_v33  ;;  %v2460_v8 = vpop.xlane.xlu0 %2459  ;;  %v2804_v33 = vld [vmem:[%s8678_s23 + $0x10] sm:$0xff] }
 0xe8c   :  { %7379 = vrcp.f32 %v2460_v8  ;;  %v2805_v8 = vld [vmem:[%s8678_s23 + $0x18] sm:$0xff] }
 0xe95   :  { %v7378_v43 = vpop.eup %7377 }
 0xe96   :  { %v7380_v10 = vpop.eup %7379  ;;  %v2467_v11 = vmul.f32 %v7378_v43, %v7374_v51  ;;  %v2806_v43 = vld [vmem:[%s8678_s23 + $0x20] sm:$0xff] }
 0xe97   :  { %v2465_v46 = vmul.f32 %v7380_v10, %v7376_v52  ;;  %v7055_v10 = vpack.c.bf16 %v2805_v8, %v2804_v33  ;;  %v5943_v33 = vld [vmem:[%s7602_s21 + $0x28] sm:$0xff] }
 0xe99   :  { %6590 = vmatprep.mubr.msk.f32.mxu1 %vm1840_vm7, %v2465_v46  ;;  %v2807_v46 = vld [vmem:[%s8678_s23 + $0x28] sm:$0xff] }
 0xe9a   :  { %6591 = vmatmul.mubr.msk.f32.vlgmr.msra.gmra.mrb[16].mxu1 %vm1840_vm7, %v2467_v11  ;;  %v7059_v11 = vpack.c.bf16 %v2807_v46, %v2806_v43  ;;  %v5958_v43 = vld [vmem:[%s7622_s8 + $0x20] sm:$0xff] }
 0xf6d   :  { %v6592_v5 = vpop.f32.mrb[16].mxu1 }
 0xf6e   :  { %v2543_v4 = vpop.f32.mrb[17].mxu1 }
 0xf6f   :  { %6601 = vmatprep.mubr.msk.f32.mxu0 %vm223_vm0, %v2543_v4  ;;  %v2809_v4 = vld [vmem:[%s8678_s23 + $0x38] sm:$0xff] }
 0xf70   :  { %6602 = vmatmul.mubr.msk.f32.vlgmr.msra.gmra.mrb[22].mxu0 %vm223_vm0, %v6592_v5  ;;  %v2808_v5 = vld [vmem:[%s8678_s23 + $0x30] sm:$0xff] }
 0xf71   :  { %7046 = vmatpush3.bf16.msra.mxu0 %v7043_v34 }
 0xf72   :  { %7048 = vmatprep.subr.bf16.mxu0 %v7047_v36 }
 0xf75   :  { %7050 = vmatpush3.bf16.msra.mxu0 %v7047_v36  ;;  %v5937_v36 = vld [vmem:[%s8680_s28] ss:$0 sm:$0xff] }
 0xf76   :  { %7052 = vmatprep.subr.bf16.mxu0 %v7051_v7 }
0x1043   :  { %v6603_v14 = vpop.f32.mrb[22].mxu0 }
0x1044   :  { %v2643_v19 = vadd.f32 %v6603_v14, %v5929_v13  ;;  %v2637_v15 = vpop.f32.mrb[23].mxu0  ;;  %v5934_v14 = vld [vmem:[%s8679_s26] ss:$0 sm:$0xff] }
0x1045   :  { %v2638_v22 = vadd.f32 %v5929_v13, %v2637_v15  ;;  %v7063_v13 = vpack.c.bf16 %v2809_v4, %v2808_v5  ;;  %v5945_v5 = vld [vmem:[%s7602_s21 + $0x38] sm:$0xff]  ;;  %v5960_v4 = vld [vmem:[%s7622_s8 + $0x30] sm:$0xff] }
0x1046   :  { %v2647_v16 = vadd.f32 %v2643_v19, %v8011_v6 }
0x1047   :  { %v2646_v18 = vadd.f32 %v2638_v22, %v8009_v3 }
0x1048   :  { %v2653_v20 = vsel %vm223_vm0, %v2647_v16, 0.0 }
0x1049   :  { %2654 = vadd.xlane.f32.xlu1 %v2653_v20  ;;  %v2650_v21 = vsel %vm223_vm0, %v2646_v18, 0.0 }
0x104a   :  { %2651 = vadd.xlane.f32.xlu0 %v2650_v21 }
0x10d6   :  { %v2655_v23 = vpop.xlane.xlu1 %2654 }
0x10d7   :  { %v2657_v24 = vmul.f32 0.03125, %v2655_v23  ;;  %v2652_v25 = vpop.xlane.xlu0 %2651 }
0x10d8   :  { %v2656_v57 = vmul.f32 0.03125, %v2652_v25 }
0x10d9   :  { %v2659_v26 = vsub.f32 %v2647_v16, %v2657_v24 }
0x10da   :  { %v2658_v27 = vsub.f32 %v2646_v18, %v2656_v57 }
0x10db   :  { %v2661_v29 = vmul.f32 %v2659_v26, %v2659_v26 }
0x10dc   :  { %v2660_v6 = vmul.f32 %v2658_v27, %v2658_v27 }
0x10dd   :  { %v2665_v3 = vsel %vm223_vm0, %v2661_v29, 0.0 }
0x10de   :  { %2666 = vadd.xlane.f32.xlu1 %v2665_v3  ;;  %v2662_v30 = vsel %vm223_vm0, %v2660_v6, 0.0 }
0x10df   :  { %2663 = vadd.xlane.f32.xlu0 %v2662_v30 }
0x116b   :  { %v2667_v31 = vpop.xlane.xlu1 %2666 }
0x116c   :  { %v2669_v37 = vmul.f32 0.03125, %v2667_v31  ;;  %v2664_v35 = vpop.xlane.xlu0 %2663 }
0x116d   :  { %v2668_v39 = vmul.f32 0.03125, %v2664_v35 }
0x116e   :  { %v2671_v40 = vadd.f32 1e-05, %v2669_v37 }
0x116f   :  { %v2670_v42 = vadd.f32 1e-05, %v2668_v39 }
0x1170   :  { %7381 = vrsqrt.f32 %v2671_v40 }
0x1171   :  { %7383 = vrsqrt.f32 %v2670_v42 }
0x117a   :  { %v7382_v38 = vpop.eup %7381 }
0x117b   :  { %v7384_v48 = vpop.eup %7383  ;;  %v2675_v51 = vmul.f32 %v7382_v38, %v2659_v26 }
0x117c   :  { %v2674_v52 = vmul.f32 %v7384_v48, %v2658_v27 }
0x117d   :  { %v2683_v61 = vmul.f32 %v5932_v47, %v2675_v51 }
0x117e   :  { %v2682_v62 = vmul.f32 %v5932_v47, %v2674_v52 }
0x117f   :  { %v2691_v0 = vadd.f32 %v5933_v60, %v2683_v61 }
0x1180   :  { %v2690_v63 = vadd.f32 %v5933_v60, %v2682_v62 }
0x1182   :  { %6612 = vmatprep.mubr.msk.f32.mxu0 %vm223_vm0, %v2690_v63 }
0x1183   :  { %6613 = vmatmul.mubr.msk.f32.vlgmr.msra.gmra.mrb[24].mxu0 %vm223_vm0, %v2691_v0 }
0x1184   :  { %7054 = vmatpush3.bf16.msra.mxu0 %v7051_v7  ;;  %v5942_v7 = vld [vmem:[%s7602_s21 + $0x20] sm:$0xff] }
0x1185   :  { %7056 = vmatprep.subr.bf16.mxu0 %v7055_v10  ;;  %v7067_v8 = vpack.c.bf16 %v5943_v33, %v5942_v7 }
0x1187   :  { %7068 = vmatprep.subr.bf16.mxu1 %v7067_v8 }
0x1188   :  { %7058 = vmatpush3.bf16.msra.mxu0 %v7055_v10  ;;  %v5959_v10 = vld [vmem:[%s7622_s8 + $0x28] sm:$0xff]  ;;  %7070 = vmatpush3.bf16.msra.mxu1 %v7067_v8 }
0x1189   :  { %7060 = vmatprep.subr.bf16.mxu0 %v7059_v11  ;;  %v7083_v46 = vpack.c.bf16 %v5959_v10, %v5958_v43 }
0x118c   :  { %7062 = vmatpush3.bf16.msra.mxu0 %v7059_v11  ;;  %v5944_v11 = vld [vmem:[%s7602_s21 + $0x30] sm:$0xff] }
0x118d   :  { %7064 = vmatprep.subr.bf16.mxu0 %v7063_v13 }
0x1190   :  { %7066 = vmatpush3.bf16.msra.mxu0 %v7063_v13  ;;  %v7071_v13 = vpack.c.bf16 %v5945_v5, %v5944_v11 }
0x1191   :  { %7084 = vmatprep.subr.bf16.mxu0 %v7083_v46 }
0x1192   :  { %7072 = vmatprep.subr.bf16.mxu1 %v7071_v13 }
0x1193   :  { %7074 = vmatpush3.bf16.msra.mxu1 %v7071_v13 }
0x1256   :  { %v6614_v19 = vpop.f32.mrb[24].mxu0 }
0x1257   :  { %v2781_v15 = vadd.f32 %v6614_v19, %v5934_v14  ;;  %v2775_v22 = vpop.f32.mrb[25].mxu0 }
0x1258   :  { %v2776_v16 = vadd.f32 %v5934_v14, %v2775_v22  ;;  %v5961_v14 = vld [vmem:[%s7622_s8 + $0x38] sm:$0xff]  ;;  %v5951_v22 = vld [vmem:[%s7612_s29 + $0x28] sm:$0xff] }
0x1259   :  { %v2787_v18 = vmul.f32 0.044715, %v2781_v15  ;;  %v2785_v34 = vmul.f32 0.5, %v2781_v15  ;;  %v7087_v19 = vpack.c.bf16 %v5961_v14, %v5960_v4 }
0x125a   :  { %v2786_v20 = vmul.f32 0.044715, %v2776_v16  ;;  %v2784_v17 = vmul.f32 0.5, %v2776_v16 }
0x125b   :  { %v2789_v21 = vmul.f32 %v2787_v18, %v2781_v15 }
0x125c   :  { %v2788_v23 = vmul.f32 %v2786_v20, %v2776_v16 }
0x125d   :  { %v2791_v24 = vmul.f32 %v2789_v21, %v2781_v15 }
0x125e   :  { %v2790_v25 = vmul.f32 %v2788_v23, %v2776_v16 }
0x125f   :  { %v2793_v57 = vadd.f32 %v2791_v24, %v2781_v15  ;;  %v5950_v15 = vld [vmem:[%s7612_s29 + $0x20] sm:$0xff] }
0x1260   :  { %v2792_v26 = vadd.f32 %v2790_v25, %v2776_v16  ;;  %v7075_v16 = vpack.c.bf16 %v5951_v22, %v5950_v15 }
0x1261   :  { %v2795_v27 = vmul.f32 0.7978846, %v2793_v57 }
0x1262   :  { %v2794_v29 = vmul.f32 0.7978846, %v2792_v26  ;;  %7076 = vmatprep.subr.bf16.mxu1 %v7075_v16  ;;  %v5940_v26 = vld [vmem:[%s8681_s1] ss:$0 sm:$0xff] }
0x1263   :  { %7385 = vtanh.f32 %v2795_v27 }
0x1264   :  { %7387 = vtanh.f32 %v2794_v29 }
0x126d   :  { %v7386_v6 = vpop.eup %7385 }
0x126e   :  { %v7388_v3 = vpop.eup %7387  ;;  %v2799_v30 = vadd.f32 1.0, %v7386_v6 }
0x126f   :  { %v2798_v32 = vadd.f32 1.0, %v7388_v3  ;;  %v5941_v3 = vld [vmem:[%s8682_s2] ss:$0 sm:$0xff] }
0x1270   :  { %v2801_v28 = vmul.f32 %v2799_v30, %v2785_v34  ;;  %v5953_v34 = vld [vmem:[%s7612_s29 + $0x38] sm:$0xff] }
0x1271   :  { %v2800_v12 = vmul.f32 %v2798_v32, %v2784_v17  ;;  %v5952_v32 = vld [vmem:[%s7612_s29 + $0x30] sm:$0xff] }
0x1273   :  { %6631 = vmatprep.mubr.msk.f32.mxu0 %vm2817_vm4, %v2800_v12 }
0x1274   :  { %6632 = vmatmul.mubr.msk.f32.vlgmr.msra.gmra.mrb[26].mxu0 %vm2817_vm4, %v2801_v28 }
0x1275   :  { %7086 = vmatpush3.bf16.msra.mxu0 %v7083_v46 }
0x1276   :  { %7088 = vmatprep.subr.bf16.mxu0 %v7087_v19 }
0x1279   :  { %7090 = vmatpush3.bf16.msra.mxu0 %v7087_v19 }
0x1347   :  { %v6633_v31 = vpop.f32.mrb[26].mxu0 }
0x1348   :  { %v2896_v37 = vadd.f32 %v6633_v31, %v5937_v36  ;;  %v2890_v35 = vpop.f32.mrb[27].mxu0  ;;  %v5963_v31 = vld [vmem:[%s7627_s14 + $0x1] ss:$0 sm:$0xff] }
0x1349   :  { %v2891_v39 = vadd.f32 %v5937_v36, %v2890_v35  ;;  %v7079_v36 = vpack.c.bf16 %v5953_v34, %v5952_v32 }
0x134a   :  { %v2900_v40 = vadd.f32 %v2896_v37, %v2691_v0  ;;  %v5947_v37 = vld [vmem:[%s7607_s25 + $0x1] ss:$0 sm:$0xff] }
0x134b   :  { %v2899_v42 = vadd.f32 %v2891_v39, %v2690_v63 }
0x134c   :  { %v2906_v38 = vsel %vm223_vm0, %v2900_v40, 0.0 }
0x134d   :  { %2907 = vadd.xlane.f32.xlu1 %v2906_v38  ;;  %v2903_v47 = vsel %vm223_vm0, %v2899_v42, 0.0 }
0x134e   :  { %2904 = vadd.xlane.f32.xlu0 %v2903_v47 }
0x13da   :  { %v2908_v48 = vpop.xlane.xlu1 %2907 }
0x13db   :  { %v2910_v51 = vmul.f32 0.03125, %v2908_v48  ;;  %v2905_v52 = vpop.xlane.xlu0 %2904 }
0x13dc   :  { %v2909_v60 = vmul.f32 0.03125, %v2905_v52 }
0x13dd   :  { %v2912_v61 = vsub.f32 %v2900_v40, %v2910_v51 }
0x13de   :  { %v2911_v62 = vsub.f32 %v2899_v42, %v2909_v60 }
0x13df   :  { %v2914_v2 = vmul.f32 %v2912_v61, %v2912_v61 }
0x13e0   :  { %v2913_v63 = vmul.f32 %v2911_v62, %v2911_v62 }
0x13e1   :  { %v2918_v0 = vsel %vm223_vm0, %v2914_v2, 0.0 }
0x13e2   :  { %2919 = vadd.xlane.f32.xlu1 %v2918_v0  ;;  %v2915_v41 = vsel %vm223_vm0, %v2913_v63, 0.0  ;;  %v5955_v0 = vld [vmem:[%s7617_s3 + $0x1] ss:$0 sm:$0xff] }
0x13e3   :  { %2916 = vadd.xlane.f32.xlu0 %v2915_v41 }
0x146f   :  { %v2920_v18 = vpop.xlane.xlu1 %2919 }
0x1470   :  { %v2922_v20 = vmul.f32 0.03125, %v2920_v18  ;;  %v2917_v21 = vpop.xlane.xlu0 %2916 }
0x1471   :  { %v2921_v23 = vmul.f32 0.03125, %v2917_v21 }
0x1472   :  { %v2924_v24 = vadd.f32 1e-05, %v2922_v20 }
0x1473   :  { %v2923_v25 = vadd.f32 1e-05, %v2921_v23 }
0x1474   :  { %7389 = vrsqrt.f32 %v2924_v24 }
0x1475   :  { %7391 = vrsqrt.f32 %v2923_v25 }
0x147e   :  { %v7390_v57 = vpop.eup %7389 }
0x147f   :  { %v7392_v27 = vpop.eup %7391  ;;  %v2928_v29 = vmul.f32 %v7390_v57, %v2912_v61 }
0x1480   :  { %v2927_v6 = vmul.f32 %v7392_v27, %v2911_v62 }
0x1481   :  { %v2936_v30 = vmul.f32 %v5940_v26, %v2928_v29 }
0x1482   :  { %v2935_v17 = vmul.f32 %v5940_v26, %v2927_v6 }
0x1483   :  { %v8229_v28 = vadd.f32 %v5941_v3, %v2936_v30 }
0x1484   :  { %v8227_v12 = vadd.f32 %v5941_v3, %v2935_v17 }
0x1486   :  { %6642 = vmatprep.mubr.msk.f32.mxu1 %vm223_vm0, %v8227_v12  ;;  %6664 = vmatprep.mubr.msk.f32.mxu0 %vm223_vm0, %v8227_v12 }
0x1487   :  { %6643 = vmatmul.mubr.msk.f32.vlgmr.msra.gmra.mrb[20].mxu1 %vm223_vm0, %v8229_v28  ;;  %6665 = vmatmul.mubr.msk.f32.vlgmr.msra.gmra.mrb[28].mxu0 %vm223_vm0, %v8229_v28 }
0x1488   :  { %7078 = vmatpush3.bf16.msra.mxu1 %v7075_v16  ;;  %6653 = vmatprep.mubr.msk.f32.mxu1 %vm223_vm0, %v8227_v12 }
0x1489   :  { %7080 = vmatprep.subr.bf16.mxu1 %v7079_v36 }
0x148c   :  { %7082 = vmatpush3.bf16.msra.mxu1 %v7079_v36 }
0x148f   :  { %6654 = vmatmul.mubr.msk.f32.vlgmr.msra.gmra.mrb[22].mxu1 %vm223_vm0, %v8229_v28 }
0x155a   :  { %v6644_v35 = vpop.f32.mrb[20].mxu1  ;;  %v6666_v39 = vpop.f32.mrb[28].mxu0 }
0x155b   :  { %v3214_v40 = vadd.f32 %v6666_v39, %v5963_v31  ;;  %v3030_v42 = vpop.f32.mrb[21].mxu1  ;;  %v3208_v38 = vpop.f32.mrb[29].mxu0  ;;  %v3036_v24 = vadd.f32 %v6644_v35, %v5947_v37 }
0x155c   :  { %v3031_v47 = vadd.f32 %v5947_v37, %v3030_v42  ;;  %v3209_v48 = vadd.f32 %v5963_v31, %v3208_v38 }
0x155d   :  { %v3446_v51 = vmul.f32 %v7811_v55, %v3214_v40  ;;  %v3331_v52 = vmul.f32 %v7806_v54, %v3214_v40  ;;  %v3723_v60 = vmul.f32 %v7814_v56, %v3214_v40  ;;  %v3921_v11 = vmul.f32 %v7817_v59, %v3214_v40 }
0x155e   :  { %v8248_v61 = vmul.f32 0.35355338, %v3031_v47  ;;  %v3445_v62 = vmul.f32 %v7811_v55, %v3209_v48  ;;  %v3330_v2 = vmul.f32 %v7806_v54, %v3209_v48  ;;  %v3722_v63 = vmul.f32 %v7814_v56, %v3209_v48 }
0x155f   :  { %v3920_v10 = vmul.f32 %v7817_v59, %v3209_v48  ;;  %v8286_v29 = vmul.f32 0.35355338, %v3036_v24 }
0x1560   :  { %v3217_v41 = vmul.f32 %v7806_v54, %v8248_v61  ;;  %v3332_v7 = vmul.f32 %v7811_v55, %v8248_v61  ;;  %v7103_v33 = vpack.c.bf16 %v3446_v51, %v3445_v62  ;;  %v8258_v8 = vpack.c.bf16 %v3331_v52, %v3330_v2 }
0x1561   :  { %v8260_v43 = vpack.c.bf16 %v3723_v60, %v3722_v63  ;;  %v8266_v14 = vpack.c.bf16 %v3921_v11, %v3920_v10  ;;  %v3218_v6 = vmul.f32 %v7806_v54, %v8286_v29  ;;  %v3333_v3 = vmul.f32 %v7811_v55, %v8286_v29 }
0x1562   :  { %v6655_v46 = vpop.f32.mrb[22].mxu1  ;;  %6671 = vmatprep.mubr.msk.f32.mxu1 %vm223_vm0, %v3217_v41  ;;  %6678 = vmatprep.mubr.msk.f32.mxu0 %vm223_vm0, %v3332_v7  ;;  %v3609_v30 = vmul.f32 %v7814_v56, %v8248_v61  ;;  %v3610_v17 = vmul.f32 %v7814_v56, %v8286_v29 }
0x1563   :  { %v3126_v5 = vadd.f32 %v6655_v46, %v5955_v0  ;;  %v3120_v4 = vpop.f32.mrb[23].mxu1 }
0x1564   :  { %v3121_v13 = vadd.f32 %v5955_v0, %v3120_v4 }
0x1565   :  { %v3220_v19 = vmul.f32 %v7806_v54, %v3126_v5  ;;  %v3335_v15 = vmul.f32 %v7811_v55, %v3126_v5  ;;  %v3612_v22 = vmul.f32 %v7814_v56, %v3126_v5  ;;  %v3810_v16 = vmul.f32 %v7817_v59, %v3126_v5 }
0x1566   :  { %v3219_v18 = vmul.f32 %v7806_v54, %v3121_v13  ;;  %v3334_v20 = vmul.f32 %v7811_v55, %v3121_v13  ;;  %v3611_v21 = vmul.f32 %v7814_v56, %v3121_v13  ;;  %v3809_v23 = vmul.f32 %v7817_v59, %v3121_v13 }
0x1568   :  { %v7091_v25 = vpack.c.bf16 %v3220_v19, %v3219_v18  ;;  %v7097_v57 = vpack.c.bf16 %v3335_v15, %v3334_v20  ;;  %v7111_v26 = vpack.c.bf16 %v3612_v22, %v3611_v21  ;;  %v8276_v27 = vpack.c.bf16 %v3810_v16, %v3809_v23 }
0x156a   :  { %7093 = vmatprep.subr.msk.bf16.mxu1 %vm7829_vm11, %v7091_v25  ;;  %7099 = vmatprep.subr.msk.bf16.mxu0 %vm7829_vm11, %v7097_v57 }
0x156b   :  { %7096 = vmatpush3.bf16.xpose.msk.msra.mxu1 %vm7829_vm11, %v7091_v25  ;;  %7102 = vmatpush3.bf16.xpose.msk.msra.mxu0 %vm7829_vm11, %v7097_v57 }
0x156c   :  { %7104 = vmatprep.subr.bf16.mxu1 %v7103_v33  ;;  %7113 = vmatprep.subr.msk.bf16.mxu0 %vm7829_vm11, %v7111_v26 }
0x1572   :  { %6672 = vmatmul.mubr.msk.f32.vlgmr.msra.gmra.mrb[24].mxu1 %vm223_vm0, %v3218_v6  ;;  %6679 = vmatmul.mubr.msk.f32.vlgmr.msra.gmra.mrb[30].mxu0 %vm223_vm0, %v3333_v3 }
0x1573   :  { %7106 = vmatpush3.bf16.msra.mxu1 %v7103_v33  ;;  %7116 = vmatpush3.bf16.xpose.msk.msra.mxu0 %vm7829_vm11, %v7111_v26 }
0x1574   :  { %6699 = vmatprep.mubr.msk.f32.mxu0 %vm223_vm0, %v3609_v30  ;;  %7108 = vmatprep.subr.bf16.mxu1 %v8258_v8 }
0x157a   :  { %6700 = vmatmul.mubr.msk.f32.vlgmr.msra.gmra.mrb[32].mxu0 %vm223_vm0, %v3610_v17 }
0x1645   :  { %v6673_v32 = vpop.f32.mrb[24].mxu1  ;;  %v6680_v34 = vpop.f32.mrb[30].mxu0 }
0x1646   :  { %v3420_v36 = vadd.f32 %v6680_v34, %v7893_v44  ;;  %v3299_v31 = vpop.f32.mrb[25].mxu1  ;;  %v3414_v37 = vpop.f32.mrb[31].mxu0  ;;  %v3305_v39 = vadd.f32 %v6673_v32, %v7893_v44 }
0x1647   :  { %v3415_v35 = vadd.f32 %v3414_v37, %v7896_v45  ;;  %v3300_v42 = vadd.f32 %v3299_v31, %v7896_v45 }
0x1648   :  { %v3426_v40 = vsel %vm624_vm1, %v3420_v36, -inf  ;;  %v3311_v47 = vsel %vm624_vm1, %v3305_v39, -inf }
0x1649   :  { %3427 = vmax.xlane.f32.xlu1 %v3426_v40  ;;  %v3423_v38 = vsel %vm624_vm1, %v3415_v35, -inf  ;;  %v3308_v51 = vsel %vm624_vm1, %v3300_v42, -inf }
0x164a   :  { %3424 = vmax.xlane.f32.xlu0 %v3423_v38 }
0x164d   :  { %v6701_v48 = vpop.f32.mrb[32].mxu0  ;;  %3312 = vmax.xlane.f32.xlu1 %v3311_v47 }
0x164e   :  { %v3697_v52 = vadd.f32 %v6701_v48, %v7893_v44  ;;  %v3691_v60 = vpop.f32.mrb[33].mxu0  ;;  %3309 = vmax.xlane.f32.xlu0 %v3308_v51 }
0x164f   :  { %v3692_v62 = vadd.f32 %v3691_v60, %v7896_v45 }
0x1650   :  { %v3703_v2 = vsel %vm624_vm1, %v3697_v52, -inf }
0x1651   :  { %3704 = vmax.xlane.f32.xlu1 %v3703_v2  ;;  %v3700_v63 = vsel %vm624_vm1, %v3692_v62, -inf }
0x1652   :  { %3701 = vmax.xlane.f32.xlu0 %v3700_v63 }
0x16d6   :  { %v3428_v0 = vpop.xlane.xlu1 %3427 }
0x16d7   :  { %v3430_v41 = vsub.f32 %v3420_v36, %v3428_v0  ;;  %v3425_v7 = vpop.xlane.xlu0 %3424 }
0x16d8   :  { %v3429_v33 = vsub.f32 %v3415_v35, %v3425_v7 }
0x16d9   :  { %v3433_v10 = vmul.f32 1.442695, %v3430_v41 }
0x16da   :  { %v3431_v46 = vmul.f32 1.442695, %v3429_v33  ;;  %v3313_v11 = vpop.xlane.xlu1 %3312  ;;  %v3807_v33 = vmul.f32 %v7817_v59, %v8248_v61 }
0x16db   :  { %7393 = vpow2.f32 %v3433_v10  ;;  %v3315_v5 = vsub.f32 %v3305_v39, %v3313_v11  ;;  %v3310_v4 = vpop.xlane.xlu0 %3309 }
0x16dc   :  { %7395 = vpow2.f32 %v3431_v46  ;;  %v3314_v13 = vsub.f32 %v3300_v42, %v3310_v4 }
0x16dd   :  { %v3318_v19 = vmul.f32 1.442695, %v3315_v5 }
0x16de   :  { %v3316_v15 = vmul.f32 1.442695, %v3314_v13  ;;  %v3705_v22 = vpop.xlane.xlu1 %3704 }
0x16df   :  { %7397 = vpow2.f32 %v3318_v19  ;;  %v3707_v16 = vsub.f32 %v3697_v52, %v3705_v22  ;;  %v3702_v18 = vpop.xlane.xlu0 %3701 }
0x16e0   :  { %7399 = vpow2.f32 %v3316_v15  ;;  %v3706_v20 = vsub.f32 %v3692_v62, %v3702_v18  ;;  %v5990_v18 = vld [vmem:[%s7632_s19 + $0x20] sm:$0xff] }
0x16e1   :  { %v3710_v21 = vmul.f32 1.442695, %v3707_v16 }
0x16e2   :  { %v3708_v23 = vmul.f32 1.442695, %v3706_v20  ;;  %v5991_v20 = vld [vmem:[%s7632_s19 + $0x28] sm:$0xff] }
0x16e3   :  { %7401 = vpow2.f32 %v3710_v21  ;;  %v5992_v21 = vld [vmem:[%s7632_s19 + $0x30] sm:$0xff] }
0x16e4   :  { %7403 = vpow2.f32 %v3708_v23  ;;  %v7131_v23 = vpack.c.bf16 %v5991_v20, %v5990_v18 }
0x16e5   :  { %v7394_v24 = vpop.eup %7393 }
0x16e6   :  { %v7396_v25 = vpop.eup %7395  ;;  %v3438_v57 = vsel %vm624_vm1, %v7394_v24, 0.0  ;;  %7132 = vmatprep.subr.bf16.mxu0 %v7131_v23 }
0x16e7   :  { %3439 = vadd.xlane.f32.xlu1 %v3438_v57  ;;  %v3435_v26 = vsel %vm624_vm1, %v7396_v25, 0.0  ;;  %7134 = vmatpush3.bf16.msra.mxu0 %v7131_v23 }
0x16e8   :  { %3436 = vadd.xlane.f32.xlu0 %v3435_v26 }
0x16e9   :  { %v7398_v6 = vpop.eup %7397 }
0x16ea   :  { %v7400_v3 = vpop.eup %7399  ;;  %v3323_v30 = vsel %vm624_vm1, %v7398_v6, 0.0 }
0x16eb   :  { %3324 = vadd.xlane.f32.xlu1 %v3323_v30  ;;  %v3320_v17 = vsel %vm624_vm1, %v7400_v3, 0.0 }
0x16ec   :  { %3321 = vadd.xlane.f32.xlu0 %v3320_v17 }
0x16ed   :  { %v7402_v32 = vpop.eup %7401 }
0x16ee   :  { %v7404_v34 = vpop.eup %7403  ;;  %v3715_v36 = vsel %vm624_vm1, %v7402_v32, 0.0 }
0x16ef   :  { %3716 = vadd.xlane.f32.xlu1 %v3715_v36  ;;  %v3712_v31 = vsel %vm624_vm1, %v7404_v34, 0.0  ;;  %v5995_v36 = vld [vmem:[%s7637_s24 + $0x1] ss:$0 sm:$0xff] }
0x16f0   :  { %3713 = vadd.xlane.f32.xlu0 %v3712_v31 }
0x1774   :  { %v3440_v37 = vpop.xlane.xlu1 %3439 }
0x1775   :  { %7405 = vrcp.f32 %v3440_v37  ;;  %v3437_v35 = vpop.xlane.xlu0 %3436 }
0x1776   :  { %7407 = vrcp.f32 %v3437_v35 }
0x1778   :  { %v3325_v40 = vpop.xlane.xlu1 %3324 }
0x1779   :  { %v3322_v39 = vpop.xlane.xlu0 %3321 }
0x177a   :  { %7409 = vrcp.f32 %v3322_v39 }
0x177b   :  { %7411 = vrcp.f32 %v3325_v40 }
0x177c   :  { %v3717_v52 = vpop.xlane.xlu1 %3716 }
0x177d   :  { %v3714_v42 = vpop.xlane.xlu0 %3713 }
0x177e   :  { %7413 = vrcp.f32 %v3714_v42 }
0x177f   :  { %v7406_v38 = vpop.eup %7405  ;;  %7415 = vrcp.f32 %v3717_v52  ;;  %v6012_v52 = vld [vmem:[%s7662_s27 + $0x30] sm:$0xff] }
0x1780   :  { %v7408_v47 = vpop.eup %7407  ;;  %v3444_v51 = vmul.f32 %v7406_v38, %v7394_v24  ;;  %v5993_v24 = vld [vmem:[%s7632_s19 + $0x38] sm:$0xff] }
0x1781   :  { %v3442_v48 = vmul.f32 %v7408_v47, %v7396_v25  ;;  %v7135_v25 = vpack.c.bf16 %v5993_v24, %v5992_v21 }
0x1783   :  { %6685 = vmatprep.mubr.msk.f32.mxu1 %vm624_vm1, %v3442_v48  ;;  %7136 = vmatprep.subr.bf16.mxu0 %v7135_v25  ;;  %v6010_v48 = vld [vmem:[%s7662_s27 + $0x20] sm:$0xff] }
0x1784   :  { %v7410_v60 = vpop.eup %7409  ;;  %6686 = vmatmul.mubr.msk.f32.vlgmr.msra.gmra.mrb[26].mxu1 %vm624_vm1, %v3444_v51  ;;  %7138 = vmatpush3.bf16.msra.mxu0 %v7135_v25  ;;  %v6011_v51 = vld [vmem:[%s7662_s27 + $0x28] sm:$0xff] }
0x1785   :  { %7110 = vmatpush3.bf16.msra.mxu1 %v8258_v8  ;;  %v3327_v62 = vmul.f32 %v7410_v60, %v7400_v3  ;;  %v7412_v2 = vpop.eup %7411  ;;  %v7148_v60 = vpack.c.bf16 %v6011_v51, %v6010_v48  ;;  %v6001_v51 = vld [vmem:[%s8669_s13 + $0x1] ss:$0 sm:$0xff] }
0x1786   :  { %7118 = vmatprep.subr.bf16.mxu1 %v8260_v43  ;;  %v3329_v0 = vmul.f32 %v7412_v2, %v7398_v6 }
0x1787   :  { %6692 = vmatprep.mubr.msk.f32.mxu1 %vm624_vm1, %v3327_v62  ;;  %v6013_v62 = vld [vmem:[%s7662_s27 + $0x38] sm:$0xff] }
0x1788   :  { %v7414_v63 = vpop.eup %7413  ;;  %v7151_v2 = vpack.c.bf16 %v6013_v62, %v6012_v52  ;;  %v6020_v62 = vld [vmem:[%s8670_s17 + $0x28] sm:$0xff] }
0x1789   :  { %v3719_v41 = vmul.f32 %v7414_v63, %v7404_v34  ;;  %v7416_v8 = vpop.eup %7415  ;;  %v8388_v63 = vld [vmem:[%s7587_s9 + $0x10] sm:$0xff] }
0x178a   :  { %v3721_v7 = vmul.f32 %v7416_v8, %v7402_v32 }
0x178c   :  { %6693 = vmatmul.mubr.msk.f32.vlgmr.msra.gmra.mrb[26].mxu1 %vm624_vm1, %v3329_v0 }
0x178d   :  { %7120 = vmatpush3.bf16.msra.mxu1 %v8260_v43  ;;  %6706 = vmatprep.mubr.msk.f32.mxu1 %vm624_vm1, %v3719_v41  ;;  %v3808_v43 = vmul.f32 %v7817_v59, %v8286_v29 }
0x178e   :  { %7123 = vmatprep.subr.msk.bf16.mxu1 %vm7829_vm11, %v8276_v27 }
0x1794   :  { %6707 = vmatmul.mubr.msk.f32.vlgmr.msra.gmra.mrb[26].mxu1 %vm624_vm1, %v3721_v7 }
0x1795   :  { %6713 = vmatprep.mubr.msk.f32.mxu1 %vm223_vm0, %v3807_v33 }
0x1796   :  { %7126 = vmatpush3.bf16.xpose.msk.msra.mxu1 %vm7829_vm11, %v8276_v27 }
0x1797   :  { %7128 = vmatprep.subr.bf16.mxu1 %v8266_v14 }
0x179d   :  { %6714 = vmatmul.mubr.msk.f32.vlgmr.msra.gmra.mrb[28].mxu1 %vm223_vm0, %v3808_v43 }
0x179e   :  { %7130 = vmatpush3.bf16.msra.mxu1 %v8266_v14 }
0x179f   :  { %7147 = vmatprep.subr.bf16.mxu1 %v7567_v1 }
0x1870   :  { %v6715_v61 = vpop.f32.mrb[28].mxu1 }
0x1871   :  { %v3895_v10 = vadd.f32 %v6715_v61, %v7893_v44  ;;  %v3889_v46 = vpop.f32.mrb[29].mxu1 }
0x1872   :  { %v3890_v11 = vadd.f32 %v3889_v46, %v7896_v45 }
0x1873   :  { %v3901_v5 = vsel %vm624_vm1, %v3895_v10, -inf }
0x1874   :  { %3902 = vmax.xlane.f32.xlu1 %v3901_v5  ;;  %v3898_v27 = vsel %vm624_vm1, %v3890_v11, -inf  ;;  %v6002_v5 = vld [vmem:[%s7652_s12 + $0x20] sm:$0xff] }
0x1875   :  { %3899 = vmax.xlane.f32.xlu0 %v3898_v27  ;;  %v6003_v27 = vld [vmem:[%s7652_s12 + $0x28] sm:$0xff] }
0x1901   :  { %v3903_v29 = vpop.xlane.xlu1 %3902 }
0x1902   :  { %v3905_v4 = vsub.f32 %v3895_v10, %v3903_v29  ;;  %v3900_v14 = vpop.xlane.xlu0 %3899  ;;  %v6004_v29 = vld [vmem:[%s7652_s12 + $0x30] sm:$0xff] }
0x1903   :  { %v3904_v13 = vsub.f32 %v3890_v11, %v3900_v14  ;;  %v6005_v14 = vld [vmem:[%s7652_s12 + $0x38] sm:$0xff] }
0x1904   :  { %v3908_v19 = vmul.f32 1.442695, %v3905_v4  ;;  %v7139_v4 = vpack.c.bf16 %v6003_v27, %v6002_v5 }
0x1905   :  { %v3906_v15 = vmul.f32 1.442695, %v3904_v13  ;;  %v7143_v13 = vpack.c.bf16 %v6005_v14, %v6004_v29 }
0x1906   :  { %7417 = vpow2.f32 %v3908_v19  ;;  %7140 = vmatprep.subr.bf16.mxu0 %v7139_v4  ;;  %v6015_v19 = vld [vmem:[%s8667_s0 + $0x1] ss:$0 sm:$0xff] }
0x1907   :  { %7419 = vpow2.f32 %v3906_v15 }
0x1910   :  { %v7418_v44 = vpop.eup %7417 }
0x1911   :  { %v7420_v45 = vpop.eup %7419  ;;  %v3913_v22 = vsel %vm624_vm1, %v7418_v44, 0.0 }
0x1912   :  { %3914 = vadd.xlane.f32.xlu1 %v3913_v22  ;;  %v3910_v16 = vsel %vm624_vm1, %v7420_v45, 0.0 }
0x1913   :  { %3911 = vadd.xlane.f32.xlu0 %v3910_v16 }
0x199f   :  { %v3915_v57 = vpop.xlane.xlu1 %3914 }
0x19a0   :  { %7421 = vrcp.f32 %v3915_v57  ;;  %v3912_v26 = vpop.xlane.xlu0 %3911 }
0x19a1   :  { %7423 = vrcp.f32 %v3912_v26 }
0x19aa   :  { %v7422_v6 = vpop.eup %7421 }
0x19ab   :  { %v7424_v3 = vpop.eup %7423  ;;  %v3919_v17 = vmul.f32 %v7422_v6, %v7418_v44 }
0x19ac   :  { %v3917_v30 = vmul.f32 %v7424_v3, %v7420_v45 }
0x19ae   :  { %6720 = vmatprep.mubr.msk.f32.mxu1 %vm624_vm1, %v3917_v30 }
0x19af   :  { %6721 = vmatmul.mubr.msk.f32.vlgmr.msra.gmra.mrb[26].mxu1 %vm624_vm1, %v3919_v17 }
0x19b0   :  { %6753 = vmatprep.mubr.msk.f32.mxu1 %vm7568_vm2, %v7565_v53  ;;  %7149 = vmatpush3.bf16.msra.mxu1 %v7148_v60  ;;  %v6019_v60 = vld [vmem:[%s8670_s17 + $0x20] sm:$0xff] }
0x19b1   :  { %7150 = vmatprep.subr.bf16.mxu1 %v7567_v1 }
0x19b4   :  { %7152 = vmatpush3.bf16.msra.mxu1 %v7151_v2 }
0x1a82   :  { %v6722_v32 = vpop.f32.mrb[26].mxu1 }
0x1a83   :  { %v3994_v34 = vpop.f32.mrb[27].mxu1 }
0x1a84   :  { %6731 = vmatprep.mubr.msk.f32.mxu0 %vm223_vm0, %v3994_v34 }
0x1a85   :  { %6732 = vmatmul.mubr.msk.f32.vlgmr.msra.gmra.mrb[34].mxu0 %vm223_vm0, %v6722_v32 }
0x1a86   :  { %7142 = vmatpush3.bf16.msra.mxu0 %v7139_v4 }
0x1a87   :  { %7144 = vmatprep.subr.bf16.mxu0 %v7143_v13 }
0x1a8a   :  { %7146 = vmatpush3.bf16.msra.mxu0 %v7143_v13  ;;  %v6024_v13 = vld [vmem:[%s8672_s10 + $0x1] ss:$0 sm:$0xff] }
0x1a8b   :  { %7153 = vmatprep.subr.bf16.mxu0 %v7567_v1 }
0x1b58   :  { %v6733_v31 = vpop.f32.mrb[34].mxu0 }
0x1b59   :  { %v4096_v37 = vadd.f32 %v6733_v31, %v5995_v36  ;;  %v4090_v35 = vpop.f32.mrb[35].mxu0 }
0x1b5a   :  { %v4091_v39 = vadd.f32 %v5995_v36, %v4090_v35 }
0x1b5b   :  { %v4100_v40 = vadd.f32 %v4096_v37, %v8229_v28  ;;  %v8374_v28 = vld [vmem:[%s7587_s9] sm:$0xff] }
0x1b5c   :  { %v4099_v42 = vadd.f32 %v4091_v39, %v8227_v12  ;;  %6754 = vmatmul.mubr.msk.f32.vlgmr.msra.gmra.mrb[30].mxu1 %vm223_vm0, %v8374_v28  ;;  %v8381_v12 = vld [vmem:[%s7587_s9 + $0x8] sm:$0xff]  ;;  %s7570_s9 = smov [#allocation2]  }
0x1b5d   :  { %v4108_v38 = vsel %vm223_vm0, %v4100_v40, 0.0  ;;  %6756 = vmatprep.mubr.msk.f32.mxu1 %vm7568_vm2, %v7565_v53  ;;  %s5786_s21 = sshll.u32 %s7570_s9, 4  ;;  %s5787_s21 = int_to_ptr.vmem [resolvable:$true] %s5786_s21 }
0x1b5e   :  { %4109 = vadd.xlane.f32.xlu1 %v4108_v38  ;;  %v4105_v47 = vsel %vm223_vm0, %v4099_v42, 0.0  ;;  %s7484_s25 = scalar_lea.vmem %s5787_s21, 256  ;;  %p7489_p1 = scmp.lt.s32.totalorder %s5787_s21, %s5787_s21 }
0x1b5f   :  { %4106 = vadd.xlane.f32.xlu0 %v4105_v47  ;;  %p7485_p0 = scmp.ne.s32.totalorder %s5787_s21, %s7484_s25  ;;  %p7490_p2 = scmp.lt.s32.totalorder %s7484_s25, %s7484_s25 }
0x1b60   :  { %6757 = vmatmul.mubr.msk.f32.gmra.mrb[32].mxu1 %vm223_vm0, %v8381_v12 }
0x1b61   :  { %6759 = vmatprep.mubr.msk.f32.mxu1 %vm7568_vm2, %v7565_v53  ;;  %p7491_p3 = por %p7490_p2, %p7489_p1 }
0x1b63   :  { %p7492_p4 = pnand %p7491_p3, %p7485_p0 }
0x1b64   :  { %6760 = vmatmul.mubr.msk.f32.gmra.mrb[34].mxu1 %vm223_vm0, %v8388_v63 }
0x1beb   :  { %v4110_v0 = vpop.xlane.xlu1 %4109 }
0x1bec   :  { %v4112_v41 = vmul.f32 0.03125, %v4110_v0  ;;  %v4107_v8 = vpop.xlane.xlu0 %4106 }
0x1bed   :  { %v4111_v7 = vmul.f32 0.03125, %v4107_v8 }
0x1bee   :  { %v4114_v33 = vsub.f32 %v4100_v40, %v4112_v41  ;;  %v7154_v41 = vpack.c.bf16 %v6020_v62, %v6019_v60 }
0x1bef   :  { %v4113_v43 = vsub.f32 %v4099_v42, %v4111_v7  ;;  %v6000_v42 = vld [vmem:[%s8668_s5 + $0x1] ss:$0 sm:$0xff]  ;;  %v6021_v7 = vld [vmem:[%s8670_s17 + $0x30] sm:$0xff] }
0x1bf0   :  { %v4116_v61 = vmul.f32 %v4114_v33, %v4114_v33 }
0x1bf1   :  { %v4115_v10 = vmul.f32 %v4113_v43, %v4113_v43 }
0x1bf2   :  { %v4120_v46 = vsel %vm223_vm0, %v4116_v61, 0.0  ;;  %v6022_v61 = vld [vmem:[%s8670_s17 + $0x38] sm:$0xff] }
0x1bf3   :  { %4121 = vadd.xlane.f32.xlu1 %v4120_v46  ;;  %v4117_v11 = vsel %vm223_vm0, %v4115_v10, 0.0 }
0x1bf4   :  { %4118 = vadd.xlane.f32.xlu0 %v4117_v11 }
0x1c2f   :  { %v4322_v15 = vpop.f32.mrb[30].mxu1 }
0x1c30   :  { %v4323_v44 = vadd.f32 %v6015_v19, %v4322_v15  ;;  %v6755_v45 = vpop.f32.mrb[31].mxu1 }
0x1c32   :  { %v4431_v16 = vmul.f32 %v7806_v54, %v4323_v44  ;;  %v4551_v18 = vmul.f32 %v7811_v55, %v4323_v44  ;;  %v4833_v20 = vmul.f32 %v7814_v56, %v4323_v44 }
0x1c33   :  { %v4327_v22 = vpop.f32.mrb[32].mxu1 }
0x1c34   :  { %v4328_v21 = vadd.f32 %v6015_v19, %v4327_v22  ;;  %v6758_v23 = vpop.f32.mrb[33].mxu1 }
0x1c36   :  { %v4432_v24 = vmul.f32 %v7806_v54, %v4328_v21  ;;  %v4552_v25 = vmul.f32 %v7811_v55, %v4328_v21  ;;  %v4834_v57 = vmul.f32 %v7814_v56, %v4328_v21 }
0x1c37   :  { %v4332_v26 = vpop.f32.mrb[34].mxu1 }
0x1c38   :  { %v7165_v6 = vpack.c.bf16 %v4552_v25, %v4551_v18  ;;  %v8406_v3 = vadd.f32 %v6015_v19, %v4332_v26  ;;  %v7159_v30 = vpack.c.bf16 %v4432_v24, %v4431_v16  ;;  %v8408_v17 = vpack.c.bf16 %v4834_v57, %v4833_v20  ;;  %v6761_v32 = vpop.f32.mrb[35].mxu1 }
0x1c3a   :  { %7161 = vmatprep.subr.msk.bf16.mxu1 %vm7829_vm11, %v7159_v30  ;;  %v4835_v22 = vmul.f32 %v7814_v56, %v8406_v3 }
0x1c3b   :  { %7164 = vmatpush3.bf16.xpose.msk.msra.mxu1 %vm7829_vm11, %v7159_v30 }
0x1c80   :  { %v4122_v34 = vpop.xlane.xlu1 %4121 }
0x1c81   :  { %v4124_v36 = vmul.f32 0.03125, %v4122_v34  ;;  %v4119_v31 = vpop.xlane.xlu0 %4118 }
0x1c82   :  { %v4123_v37 = vmul.f32 0.03125, %v4119_v31 }
0x1c83   :  { %v4126_v35 = vadd.f32 1e-05, %v4124_v36 }
0x1c84   :  { %v4125_v39 = vadd.f32 1e-05, %v4123_v37 }
0x1c85   :  { %7425 = vrsqrt.f32 %v4126_v35 }
0x1c86   :  { %7427 = vrsqrt.f32 %v4125_v39 }
0x1c8f   :  { %v7426_v40 = vpop.eup %7425 }
0x1c90   :  { %v7428_v38 = vpop.eup %7427  ;;  %v4130_v47 = vmul.f32 %v7426_v40, %v4114_v33  ;;  %v7157_v33 = vpack.c.bf16 %v6022_v61, %v6021_v7 }
0x1c91   :  { %v4129_v48 = vmul.f32 %v7428_v38, %v4113_v43  ;;  %v4553_v43 = vmul.f32 %v7811_v55, %v8406_v3 }
0x1c92   :  { %v4138_v52 = vmul.f32 %v6000_v42, %v4130_v47 }
0x1c93   :  { %v4137_v2 = vmul.f32 %v6000_v42, %v4129_v48 }
0x1c94   :  { %v8420_v8 = vadd.f32 %v6001_v51, %v4138_v52 }
0x1c95   :  { %v8418_v0 = vadd.f32 %v6001_v51, %v4137_v2 }
0x1c97   :  { %6742 = vmatprep.mubr.msk.f32.mxu0 %vm223_vm0, %v8418_v0 }
0x1c98   :  { %6743 = vmatmul.mubr.msk.f32.vlgmr.msra.gmra.mrb[36].mxu0 %vm223_vm0, %v8420_v8 }
0x1c99   :  { %7155 = vmatpush3.bf16.msra.mxu0 %v7154_v41  ;;  %6770 = vmatprep.mubr.msk.f32.mxu0 %vm7568_vm2, %v7565_v53 }
0x1c9a   :  { %7156 = vmatprep.subr.bf16.mxu0 %v7567_v1  ;;  %v5036_v1 = vmul.f32 %v7817_v59, %v4323_v44 }
0x1c9d   :  { %7158 = vmatpush3.bf16.msra.mxu0 %v7157_v33 }
0x1c9e   :  { %7167 = vmatprep.subr.msk.bf16.mxu0 %vm7829_vm11, %v7165_v6 }
0x1ca0   :  { %6771 = vmatmul.mubr.msk.f32.vlgmr.msra.gmra.mrb[38].mxu0 %vm223_vm0, %v8374_v28  ;;  %v5037_v28 = vmul.f32 %v7817_v59, %v4328_v21 }
0x1ca1   :  { %6773 = vmatprep.mubr.msk.f32.mxu0 %vm7568_vm2, %v7565_v53 }
0x1ca4   :  { %6774 = vmatmul.mubr.msk.f32.gmra.mrb[40].mxu0 %vm223_vm0, %v8381_v12  ;;  %v4433_v12 = vmul.f32 %v7806_v54, %v8406_v3 }
0x1ca5   :  { %6776 = vmatprep.mubr.msk.f32.mxu0 %vm7568_vm2, %v7565_v53  ;;  %v8454_v53 = vpack.c.bf16 %v5037_v28, %v5036_v1 }
0x1ca6   :  { %7170 = vmatpush3.bf16.xpose.msk.msra.mxu0 %vm7829_vm11, %v7165_v6  ;;  %6783 = vmatprep.subr.msk.mxu1 %vm223_vm0, %v4433_v12 }
0x1ca7   :  { %6792 = vmatprep.subr.msk.mxu0 %vm223_vm0, %v4553_v43  ;;  %6784 = vmatpush3.xpose.msk.msra.mxu1 %vm223_vm0, %v4433_v12 }
0x1ca8   :  { %6777 = vmatmul.mubr.msk.f32.gmra.mrb[42].mxu0 %vm223_vm0, %v8388_v63  ;;  %v6007_v63 = vld [vmem:[%s8671_s7 + $0x1] ss:$0 sm:$0xff] }
0x1cae   :  { %6793 = vmatpush3.xpose.msk.msra.mxu0 %vm223_vm0, %v4553_v43 }
0x1caf   :  { %7181 = vmatprep.subr.msk.bf16.mxu0 %vm7829_vm11, %v8408_v17 }
0x1d6b   :  { %v6744_v10 = vpop.f32.mrb[36].mxu0 }
0x1d6c   :  { %v4238_v46 = vadd.f32 %v6744_v10, %v6007_v63  ;;  %v4232_v11 = vpop.f32.mrb[37].mxu0 }
0x1d6d   :  { %v4233_v5 = vadd.f32 %v6007_v63, %v4232_v11 }
0x1d6e   :  { %v8461_v27 = vmul.f32 0.35355338, %v4238_v46 }
0x1d6f   :  { %v8463_v29 = vmul.f32 0.35355338, %v4233_v5 }
0x1d70   :  { %v4430_v19 = vmul.f32 %v7806_v54, %v8461_v27  ;;  %v4550_v15 = vmul.f32 %v7811_v55, %v8461_v27  ;;  %v4832_v34 = vmul.f32 %v7814_v56, %v8461_v27 }
0x1d71   :  { %v4429_v4 = vmul.f32 %v7806_v54, %v8463_v29  ;;  %v4549_v14 = vmul.f32 %v7811_v55, %v8463_v29  ;;  %v4831_v44 = vmul.f32 %v7814_v56, %v8463_v29 }
0x1d73   :  { %6785 = vmatprep.mubr.msk.f32.mxu1 %vm223_vm0, %v4429_v4  ;;  %6794 = vmatprep.mubr.msk.f32.mxu0 %vm223_vm0, %v4549_v14  ;;  %v4415_v45 = vpop.f32.mrb[38].mxu0 }
0x1d74   :  { %6786 = vmatmul.mubr.msk.f32.vlgmr.msra.gmra.mrb[36].mxu1 %vm223_vm0, %v4430_v19  ;;  %6795 = vmatmul.mubr.msk.f32.vlgmr.msra.gmra.mrb[44].mxu0 %vm223_vm0, %v4550_v15  ;;  %v8482_v16 = vadd.f32 %v6024_v13, %v4415_v45  ;;  %v6772_v18 = vpop.f32.mrb[39].mxu0 }
0x1d75   :  { %7184 = vmatpush3.bf16.xpose.msk.msra.mxu0 %vm7829_vm11, %v8408_v17  ;;  %6821 = vmatprep.mubr.msk.f32.mxu0 %vm223_vm0, %v4831_v44 }
0x1d76   :  { %6819 = vmatprep.subr.msk.mxu0 %vm223_vm0, %v4835_v22  ;;  %v4666_v24 = vmul.f32 %v7811_v55, %v8482_v16  ;;  %v4546_v30 = vmul.f32 %v7806_v54, %v8482_v16 }
0x1d77   :  { %v4420_v20 = vpop.f32.mrb[40].mxu0 }
0x1d78   :  { %v8489_v21 = vadd.f32 %v6024_v13, %v4420_v20  ;;  %v6775_v23 = vpop.f32.mrb[41].mxu0 }
0x1d7a   :  { %v4667_v25 = vmul.f32 %v7811_v55, %v8489_v21  ;;  %v4547_v17 = vmul.f32 %v7806_v54, %v8489_v21 }
0x1d7b   :  { %v4425_v57 = vpop.f32.mrb[42].mxu0 }
0x1d7c   :  { %v8495_v26 = vadd.f32 %v6024_v13, %v4425_v57  ;;  %v7171_v6 = vpack.c.bf16 %v4667_v25, %v4666_v24  ;;  %v6778_v32 = vpop.f32.mrb[43].mxu0  ;;  %v8507_v31 = vpack.c.bf16 %v4547_v17, %v4546_v30 }
0x1d7d   :  { %6820 = vmatpush3.xpose.msk.msra.mxu0 %vm223_vm0, %v4835_v22 }
0x1d7e   :  { %7172 = vmatprep.subr.bf16.mxu1 %v7171_v6  ;;  %v4668_v36 = vmul.f32 %v7811_v55, %v8495_v26  ;;  %v5153_v9 = vmul.f32 %v7817_v59, %v8495_v26 }
0x1d7f   :  { %7174 = vmatpush3.bf16.msra.mxu1 %v7171_v6 }
0x1d80   :  { %6822 = vmatmul.mubr.msk.f32.vlgmr.msra.gmra.mrb[46].mxu0 %vm223_vm0, %v4832_v34  ;;  %6801 = vmatprep.subr.mxu1 %v4668_v36 }
0x1d83   :  { %6802 = vmatpush3.msra.mxu1 %v4668_v36 }
0x1d84   :  { %7176 = vmatprep.subr.bf16.mxu1 %v8507_v31 }
0x1e47   :  { %v6787_v37 = vpop.f32.mrb[36].mxu1  ;;  %v6796_v35 = vpop.f32.mrb[44].mxu0 }
0x1e48   :  { %v4641_v39 = vadd.f32 %v6796_v35, %v8108_v50  ;;  %v4515_v40 = vpop.f32.mrb[37].mxu1  ;;  %v4635_v42 = vpop.f32.mrb[45].mxu0  ;;  %v4521_v47 = vadd.f32 %v6787_v37, %v8108_v50 }
0x1e49   :  { %v4636_v38 = vadd.f32 %v4635_v42, %v8111_v58  ;;  %v4516_v48 = vadd.f32 %v4515_v40, %v8111_v58 }
0x1e4a   :  { %v4647_v55 = vsel %vm1840_vm7, %v4641_v39, -inf  ;;  %v4527_v52 = vsel %vm1840_vm7, %v4521_v47, -inf }
0x1e4b   :  { %4648 = vmax.xlane.f32.xlu1 %v4647_v55  ;;  %v4644_v51 = vsel %vm1840_vm7, %v4636_v38, -inf  ;;  %v4524_v60 = vsel %vm1840_vm7, %v4516_v48, -inf }
0x1e4c   :  { %4645 = vmax.xlane.f32.xlu0 %v4644_v51 }
0x1e4f   :  { %4528 = vmax.xlane.f32.xlu1 %v4527_v52 }
0x1e50   :  { %4525 = vmax.xlane.f32.xlu0 %v4524_v60 }
0x1e53   :  { %v6823_v62 = vpop.f32.mrb[46].mxu0 }
0x1e54   :  { %v4923_v2 = vadd.f32 %v6823_v62, %v8108_v50  ;;  %v4917_v41 = vpop.f32.mrb[47].mxu0  ;;  %v4548_v62 = vmul.f32 %v7806_v54, %v8495_v26  ;;  %v4950_v54 = vmul.f32 %v7814_v56, %v8495_v26 }
0x1e55   :  { %v4918_v7 = vadd.f32 %v4917_v41, %v8111_v58  ;;  %v4949_v41 = vmul.f32 %v7814_v56, %v8489_v21 }
0x1e56   :  { %v4929_v61 = vsel %vm1840_vm7, %v4923_v2, -inf }
0x1e57   :  { %4930 = vmax.xlane.f32.xlu1 %v4929_v61  ;;  %v4926_v33 = vsel %vm1840_vm7, %v4918_v7, -inf }
0x1e58   :  { %4927 = vmax.xlane.f32.xlu0 %v4926_v33 }
0x1ed8   :  { %v4649_v43 = vpop.xlane.xlu1 %4648 }
0x1ed9   :  { %v4651_v1 = vsub.f32 %v4641_v39, %v4649_v43  ;;  %v4646_v28 = vpop.xlane.xlu0 %4645 }
0x1eda   :  { %v4650_v12 = vsub.f32 %v4636_v38, %v4646_v28 }
0x1edb   :  { %v4654_v63 = vmul.f32 1.442695, %v4651_v1 }
0x1edc   :  { %v4652_v10 = vmul.f32 1.442695, %v4650_v12  ;;  %v4529_v46 = vpop.xlane.xlu1 %4528 }
0x1edd   :  { %7429 = vpow2.f32 %v4654_v63  ;;  %v4531_v11 = vsub.f32 %v4521_v47, %v4529_v46  ;;  %v4526_v5 = vpop.xlane.xlu0 %4525  ;;  %v5034_v63 = vmul.f32 %v7817_v59, %v8463_v29  ;;  %v5152_v46 = vmul.f32 %v7817_v59, %v8489_v21 }
0x1ede   :  { %7431 = vpow2.f32 %v4652_v10  ;;  %v4530_v4 = vsub.f32 %v4516_v48, %v4526_v5  ;;  %v5151_v10 = vmul.f32 %v7817_v59, %v8482_v16 }
0x1edf   :  { %v4534_v14 = vmul.f32 1.442695, %v4531_v11  ;;  %v5035_v11 = vmul.f32 %v7817_v59, %v8461_v27 }
0x1ee0   :  { %v4532_v13 = vmul.f32 1.442695, %v4530_v4  ;;  %v7195_v29 = vpack.c.bf16 %v5152_v46, %v5151_v10 }
0x1ee1   :  { %7433 = vpow2.f32 %v4534_v14 }
0x1ee2   :  { %7435 = vpow2.f32 %v4532_v13 }
0x1ee4   :  { %v4931_v19 = vpop.xlane.xlu1 %4930 }
0x1ee5   :  { %v4933_v15 = vsub.f32 %v4923_v2, %v4931_v19  ;;  %v4928_v44 = vpop.xlane.xlu0 %4927  ;;  %v4948_v2 = vmul.f32 %v7814_v56, %v8482_v16  ;;  %v5038_v56 = vmul.f32 %v7817_v59, %v8406_v3 }
0x1ee6   :  { %v4932_v45 = vsub.f32 %v4918_v7, %v4928_v44 }
0x1ee7   :  { %v7430_v22 = vpop.eup %7429  ;;  %v4936_v18 = vmul.f32 1.442695, %v4933_v15  ;;  %v7185_v33 = vpack.c.bf16 %v4949_v41, %v4948_v2 }
0x1ee8   :  { %v7432_v20 = vpop.eup %7431  ;;  %v4934_v23 = vmul.f32 1.442695, %v4932_v45  ;;  %v4659_v24 = vsel %vm1840_vm7, %v7430_v22, 0.0  ;;  %v6056_v45 = vld [vmem:[%s8673_s11 + $0x20] sm:$0xff] }
0x1ee9   :  { %7437 = vpow2.f32 %v4936_v18  ;;  %4660 = vadd.xlane.f32.xlu1 %v4659_v24  ;;  %v4656_v25 = vsel %vm1840_vm7, %v7432_v20, 0.0  ;;  %v6058_v18 = vld [vmem:[%s8673_s11 + $0x30] sm:$0xff] }
0x1eea   :  { %7439 = vpow2.f32 %v4934_v23  ;;  %4657 = vadd.xlane.f32.xlu0 %v4656_v25  ;;  %v6059_v23 = vld [vmem:[%s8673_s11 + $0x38] sm:$0xff] }
0x1eeb   :  { %v7434_v57 = vpop.eup %7433  ;;  %v7203_v24 = vpack.c.bf16 %v6059_v23, %v6058_v18  ;;  %v6083_v18 = vld [vmem:[%s8678_s23 + $0x78] sm:$0xff]  ;;  %v6073_v23 = vld [vmem:[%s8679_s26 + $0x1] ss:$0 sm:$0xff] }
0x1eec   :  { %v7436_v6 = vpop.eup %7435  ;;  %v4539_v30 = vsel %vm1840_vm7, %v7434_v57, 0.0 }
0x1eed   :  { %4540 = vadd.xlane.f32.xlu1 %v4539_v30  ;;  %v4536_v17 = vsel %vm1840_vm7, %v7436_v6, 0.0 }
0x1eee   :  { %4537 = vadd.xlane.f32.xlu0 %v4536_v17 }
0x1ef3   :  { %v7438_v32 = vpop.eup %7437 }
0x1ef4   :  { %v7440_v34 = vpop.eup %7439  ;;  %v4941_v36 = vsel %vm1840_vm7, %v7438_v32, 0.0 }
0x1ef5   :  { %4942 = vadd.xlane.f32.xlu1 %v4941_v36  ;;  %v4938_v37 = vsel %vm1840_vm7, %v7440_v34, 0.0 }
0x1ef6   :  { %4939 = vadd.xlane.f32.xlu0 %v4938_v37  ;;  %v6061_v37 = vld [vmem:[%s8674_s15 + $0x1] ss:$0 sm:$0xff] }
0x1f76   :  { %v4661_v35 = vpop.xlane.xlu1 %4660 }
0x1f77   :  { %7441 = vrcp.f32 %v4661_v35  ;;  %v4658_v39 = vpop.xlane.xlu0 %4657 }
0x1f78   :  { %7443 = vrcp.f32 %v4658_v39 }
0x1f7a   :  { %v4541_v42 = vpop.xlane.xlu1 %4540 }
0x1f7b   :  { %v4538_v40 = vpop.xlane.xlu0 %4537 }
0x1f7c   :  { %7445 = vrcp.f32 %v4538_v40 }
0x1f7d   :  { %7447 = vrcp.f32 %v4541_v42 }
0x1f81   :  { %v7442_v38 = vpop.eup %7441 }
0x1f82   :  { %v7444_v47 = vpop.eup %7443  ;;  %v4665_v51 = vmul.f32 %v7442_v38, %v7430_v22  ;;  %v4943_v52 = vpop.xlane.xlu1 %4942  ;;  %v6057_v22 = vld [vmem:[%s8673_s11 + $0x28] sm:$0xff] }
0x1f83   :  { %v4940_v55 = vpop.xlane.xlu0 %4939  ;;  %v4663_v48 = vmul.f32 %v7444_v47, %v7432_v20  ;;  %v7199_v20 = vpack.c.bf16 %v6057_v22, %v6056_v45  ;;  %v6082_v22 = vld [vmem:[%s8678_s23 + $0x70] sm:$0xff] }
0x1f84   :  { %7449 = vrcp.f32 %v4940_v55 }
0x1f85   :  { %6803 = vmatprep.mubr.msk.f32.mxu1 %vm1840_vm7, %v4663_v48  ;;  %7451 = vrcp.f32 %v4943_v52  ;;  %7200 = vmatprep.subr.bf16.mxu0 %v7199_v20 }
0x1f86   :  { %v7446_v60 = vpop.eup %7445  ;;  %6804 = vmatmul.mubr.msk.f32.vlgmr.msra.gmra.mrb[38].mxu1 %vm1840_vm7, %v4665_v51  ;;  %7202 = vmatpush3.bf16.msra.mxu0 %v7199_v20  ;;  %v7227_v20 = vpack.c.bf16 %v6083_v18, %v6082_v22 }
0x1f87   :  { %7178 = vmatpush3.bf16.msra.mxu1 %v8507_v31  ;;  %v4543_v7 = vmul.f32 %v7446_v60, %v7436_v6  ;;  %v7448_v61 = vpop.eup %7447  ;;  %7204 = vmatprep.subr.bf16.mxu0 %v7203_v24 }
0x1f88   :  { %6810 = vmatprep.subr.mxu1 %v4548_v62  ;;  %v4545_v43 = vmul.f32 %v7448_v61, %v7434_v57 }
0x1f89   :  { %6812 = vmatprep.mubr.msk.f32.mxu1 %vm1840_vm7, %v4543_v7 }
0x1f8a   :  { %7206 = vmatpush3.bf16.msra.mxu0 %v7203_v24 }
0x1f8b   :  { %6811 = vmatpush3.msra.mxu1 %v4548_v62 }
0x1f8c   :  { %7186 = vmatprep.subr.bf16.mxu1 %v7185_v33 }
0x1f8e   :  { %v7450_v1 = vpop.eup %7449  ;;  %6813 = vmatmul.mubr.msk.f32.vlgmr.msra.gmra.mrb[38].mxu1 %vm1840_vm7, %v4545_v43  ;;  %v6069_v43 = vld [vmem:[%s8675_s16 + $0x28] sm:$0xff] }
0x1f8f   :  { %7188 = vmatpush3.bf16.msra.mxu1 %v7185_v33  ;;  %v4945_v28 = vmul.f32 %v7450_v1, %v7440_v34  ;;  %v7452_v12 = vpop.eup %7451  ;;  %v6068_v33 = vld [vmem:[%s8675_s16 + $0x20] sm:$0xff] }
0x1f90   :  { %6828 = vmatprep.subr.mxu1 %v4950_v54  ;;  %v4947_v31 = vmul.f32 %v7452_v12, %v7438_v32  ;;  %v7207_v1 = vpack.c.bf16 %v6069_v43, %v6068_v33 }
0x1f91   :  { %6830 = vmatprep.mubr.msk.f32.mxu1 %vm1840_vm7, %v4945_v28  ;;  %v6071_v28 = vld [vmem:[%s8675_s16 + $0x38] sm:$0xff] }
0x1f92   :  { %7208 = vmatprep.subr.bf16.mxu0 %v7207_v1 }
0x1f93   :  { %6829 = vmatpush3.msra.mxu1 %v4950_v54  ;;  %v6070_v54 = vld [vmem:[%s8675_s16 + $0x30] sm:$0xff] }
0x1f94   :  { %7191 = vmatprep.subr.msk.bf16.mxu1 %vm7829_vm11, %v8454_v53  ;;  %v7211_v12 = vpack.c.bf16 %v6071_v28, %v6070_v54 }
0x1f96   :  { %6831 = vmatmul.mubr.msk.f32.vlgmr.msra.gmra.mrb[38].mxu1 %vm1840_vm7, %v4947_v31 }
0x1f97   :  { %6839 = vmatprep.mubr.msk.f32.mxu1 %vm223_vm0, %v5034_v63 }
0x1f9a   :  { %7194 = vmatpush3.bf16.xpose.msk.msra.mxu1 %vm7829_vm11, %v8454_v53 }
0x1f9b   :  { %6837 = vmatprep.subr.msk.mxu1 %vm223_vm0, %v5038_v56 }
0x1fa2   :  { %6838 = vmatpush3.xpose.msk.msra.mxu1 %vm223_vm0, %v5038_v56 }
0x1fa3   :  { %7196 = vmatprep.subr.bf16.mxu1 %v7195_v29 }
0x1fa5   :  { %6840 = vmatmul.mubr.msk.f32.vlgmr.msra.gmra.mrb[40].mxu1 %vm223_vm0, %v5035_v11 }
0x1fa6   :  { %7198 = vmatpush3.bf16.msra.mxu1 %v7195_v29 }
0x1fa7   :  { %6846 = vmatprep.subr.mxu1 %v5153_v9 }
0x1faa   :  { %6847 = vmatpush3.msra.mxu1 %v5153_v9  ;;  %v6066_v9 = vld [vmem:[%s8676_s18 + $0x1] ss:$0 sm:$0xff] }
0x2078   :  { %v6841_v3 = vpop.f32.mrb[40].mxu1 }
0x2079   :  { %v5126_v53 = vadd.f32 %v6841_v3, %v8108_v50  ;;  %v5120_v16 = vpop.f32.mrb[41].mxu1 }
0x207a   :  { %v5121_v21 = vadd.f32 %v5120_v16, %v8111_v58 }
0x207b   :  { %v5132_v5 = vsel %vm1840_vm7, %v5126_v53, -inf }
0x207c   :  { %5133 = vmax.xlane.f32.xlu1 %v5132_v5  ;;  %v5129_v27 = vsel %vm1840_vm7, %v5121_v21, -inf }
0x207d   :  { %5130 = vmax.xlane.f32.xlu0 %v5129_v27 }
0x2109   :  { %v5134_v4 = vpop.xlane.xlu1 %5133 }
0x210a   :  { %v5136_v59 = vsub.f32 %v5126_v53, %v5134_v4  ;;  %v5131_v26 = vpop.xlane.xlu0 %5130 }
0x210b   :  { %v5135_v14 = vsub.f32 %v5121_v21, %v5131_v26  ;;  %v6067_v21 = vld [vmem:[%s8677_s22 + $0x1] ss:$0 sm:$0xff] }
0x210c   :  { %v5139_v13 = vmul.f32 1.442695, %v5136_v59  ;;  %v6076_v26 = vld [vmem:[%s8678_s23 + $0x40] sm:$0xff] }
0x210d   :  { %v5137_v19 = vmul.f32 1.442695, %v5135_v14  ;;  %v6077_v14 = vld [vmem:[%s8678_s23 + $0x48] sm:$0xff] }
0x210e   :  { %7453 = vpow2.f32 %v5139_v13  ;;  %v6078_v13 = vld [vmem:[%s8678_s23 + $0x50] sm:$0xff] }
0x210f   :  { %7455 = vpow2.f32 %v5137_v19  ;;  %v7215_v19 = vpack.c.bf16 %v6077_v14, %v6076_v26 }
0x2118   :  { %v7454_v50 = vpop.eup %7453 }
0x2119   :  { %v7456_v58 = vpop.eup %7455  ;;  %v5144_v15 = vsel %vm1840_vm7, %v7454_v50, 0.0 }
0x211a   :  { %5145 = vadd.xlane.f32.xlu1 %v5144_v15  ;;  %v5141_v44 = vsel %vm1840_vm7, %v7456_v58, 0.0  ;;  %v6080_v15 = vld [vmem:[%s8678_s23 + $0x60] sm:$0xff] }
0x211b   :  { %5142 = vadd.xlane.f32.xlu0 %v5141_v44  ;;  %v6081_v44 = vld [vmem:[%s8678_s23 + $0x68] sm:$0xff] }
0x211c   :  { %v7223_v45 = vpack.c.bf16 %v6081_v44, %v6080_v15 }
0x21a7   :  { %v5146_v25 = vpop.xlane.xlu1 %5145 }
0x21a8   :  { %7457 = vrcp.f32 %v5146_v25  ;;  %v5143_v57 = vpop.xlane.xlu0 %5142 }
0x21a9   :  { %7459 = vrcp.f32 %v5143_v57 }
0x21b2   :  { %v7458_v6 = vpop.eup %7457 }
0x21b3   :  { %v7460_v30 = vpop.eup %7459  ;;  %v5150_v32 = vmul.f32 %v7458_v6, %v7454_v50  ;;  %v6079_v50 = vld [vmem:[%s8678_s23 + $0x58] sm:$0xff] }
0x21b4   :  { %v5148_v17 = vmul.f32 %v7460_v30, %v7456_v58  ;;  %v7219_v58 = vpack.c.bf16 %v6079_v50, %v6078_v13  ;;  %v6090_v50 = vld [vmem:[%s8681_s1 + $0x1] ss:$0 sm:$0xff] }
0x21b6   :  { %6848 = vmatprep.mubr.msk.f32.mxu1 %vm1840_vm7, %v5148_v17 }
0x21b7   :  { %6849 = vmatmul.mubr.msk.f32.vlgmr.msra.gmra.mrb[38].mxu1 %vm1840_vm7, %v5150_v32 }
0x228a   :  { %v6850_v34 = vpop.f32.mrb[38].mxu1 }
0x228b   :  { %v5226_v36 = vpop.f32.mrb[39].mxu1 }
0x228c   :  { %6859 = vmatprep.mubr.msk.f32.mxu0 %vm223_vm0, %v5226_v36 }
0x228d   :  { %6860 = vmatmul.mubr.msk.f32.vlgmr.msra.gmra.mrb[48].mxu0 %vm223_vm0, %v6850_v34 }
0x228e   :  { %7210 = vmatpush3.bf16.msra.mxu0 %v7207_v1 }
0x228f   :  { %7212 = vmatprep.subr.bf16.mxu0 %v7211_v12 }
0x2292   :  { %7214 = vmatpush3.bf16.msra.mxu0 %v7211_v12 }
0x2293   :  { %7216 = vmatprep.subr.bf16.mxu0 %v7215_v19 }
0x2360   :  { %v6861_v35 = vpop.f32.mrb[48].mxu0 }
0x2361   :  { %v5328_v39 = vadd.f32 %v6861_v35, %v6061_v37  ;;  %v5322_v40 = vpop.f32.mrb[49].mxu0 }
0x2362   :  { %v5323_v42 = vadd.f32 %v6061_v37, %v5322_v40 }
0x2363   :  { %v5332_v38 = vadd.f32 %v5328_v39, %v8420_v8 }
0x2364   :  { %v5331_v47 = vadd.f32 %v5323_v42, %v8418_v0 }
0x2365   :  { %v5340_v55 = vsel %vm223_vm0, %v5332_v38, 0.0 }
0x2366   :  { %5341 = vadd.xlane.f32.xlu1 %v5340_v55  ;;  %v5337_v48 = vsel %vm223_vm0, %v5331_v47, 0.0 }
0x2367   :  { %5338 = vadd.xlane.f32.xlu0 %v5337_v48 }
0x23f3   :  { %v5342_v51 = vpop.xlane.xlu1 %5341 }
0x23f4   :  { %v5344_v52 = vmul.f32 0.03125, %v5342_v51  ;;  %v5339_v60 = vpop.xlane.xlu0 %5338 }
0x23f5   :  { %v5343_v62 = vmul.f32 0.03125, %v5339_v60 }
0x23f6   :  { %v5346_v2 = vsub.f32 %v5332_v38, %v5344_v52 }
0x23f7   :  { %v5345_v41 = vsub.f32 %v5331_v47, %v5343_v62 }
0x23f8   :  { %v5348_v7 = vmul.f32 %v5346_v2, %v5346_v2 }
0x23f9   :  { %v5347_v8 = vmul.f32 %v5345_v41, %v5345_v41 }
0x23fa   :  { %v5352_v0 = vsel %vm223_vm0, %v5348_v7, 0.0 }
0x23fb   :  { %5353 = vadd.xlane.f32.xlu1 %v5352_v0  ;;  %v5349_v61 = vsel %vm223_vm0, %v5347_v8, 0.0 }
0x23fc   :  { %5350 = vadd.xlane.f32.xlu0 %v5349_v61 }
0x2488   :  { %v5354_v31 = vpop.xlane.xlu1 %5353 }
0x2489   :  { %v5356_v63 = vmul.f32 0.03125, %v5354_v31  ;;  %v5351_v56 = vpop.xlane.xlu0 %5350 }
0x248a   :  { %v5355_v10 = vmul.f32 0.03125, %v5351_v56 }
0x248b   :  { %v5358_v46 = vadd.f32 1e-05, %v5356_v63 }
0x248c   :  { %v5357_v29 = vadd.f32 1e-05, %v5355_v10 }
0x248d   :  { %7461 = vrsqrt.f32 %v5358_v46 }
0x248e   :  { %7463 = vrsqrt.f32 %v5357_v29 }
0x2497   :  { %v7462_v11 = vpop.eup %7461 }
0x2498   :  { %v7464_v3 = vpop.eup %7463  ;;  %v5362_v53 = vmul.f32 %v7462_v11, %v5346_v2  ;;  %v6085_v2 = vld [vmem:[%s8680_s28 + $0x1] ss:$0 sm:$0xff] }
0x2499   :  { %v5361_v16 = vmul.f32 %v7464_v3, %v5345_v41  ;;  %v5638_v3 = vld [vmem:[%s7732_s6 + $0x8] sm:$0xff] }
0x249a   :  { %v5370_v5 = vmul.f32 %v6066_v9, %v5362_v53 }
0x249b   :  { %v5369_v27 = vmul.f32 %v6066_v9, %v5361_v16  ;;  %v5637_v9 = vld [vmem:[%s7732_s6] sm:$0xff]  ;;  %v5639_v16 = vld [vmem:[%s7732_s6 + $0x10] sm:$0xff] }
0x249c   :  { %v5378_v59 = vadd.f32 %v6067_v21, %v5370_v5  ;;  %v7231_v53 = vpack.c.bf16 %v5638_v3, %v5637_v9 }
0x249d   :  { %v5377_v4 = vadd.f32 %v6067_v21, %v5369_v27  ;;  %v5640_v21 = vld [vmem:[%s7732_s6 + $0x18] sm:$0xff] }
0x249e   :  { %v7235_v5 = vpack.c.bf16 %v5640_v21, %v5639_v16  ;;  %7232 = vmatprep.subr.bf16.mxu1 %v7231_v53 }
0x249f   :  { %6870 = vmatprep.mubr.msk.f32.mxu0 %vm223_vm0, %v5377_v4  ;;  %7234 = vmatpush3.bf16.msra.mxu1 %v7231_v53 }
0x24a0   :  { %6871 = vmatmul.mubr.msk.f32.vlgmr.msra.gmra.mrb[50].mxu0 %vm223_vm0, %v5378_v59  ;;  %7236 = vmatprep.subr.bf16.mxu1 %v7235_v5 }
0x24a1   :  { %7218 = vmatpush3.bf16.msra.mxu0 %v7215_v19 }
0x24a2   :  { %7220 = vmatprep.subr.bf16.mxu0 %v7219_v58 }
0x24a3   :  { %7238 = vmatpush3.bf16.msra.mxu1 %v7235_v5 }
0x24a5   :  { %7222 = vmatpush3.bf16.msra.mxu0 %v7219_v58 }
0x24a6   :  { %7224 = vmatprep.subr.bf16.mxu0 %v7223_v45 }
0x24a9   :  { %7226 = vmatpush3.bf16.msra.mxu0 %v7223_v45  ;;  %v6091_v45 = vld [vmem:[%s8682_s2 + $0x1] ss:$0 sm:$0xff] }
0x24aa   :  { %7228 = vmatprep.subr.bf16.mxu0 %v7227_v20 }
0x24ad   :  { %7230 = vmatpush3.bf16.msra.mxu0 %v7227_v20 }
0x2573   :  { %v6872_v24 = vpop.f32.mrb[50].mxu0 }
0x2574   :  { %v5470_v25 = vadd.f32 %v6872_v24, %v6073_v23  ;;  %v5464_v57 = vpop.f32.mrb[51].mxu0  ;;  %v7569_v24 = vmov 0  }
0x2575   :  { %v5465_v6 = vadd.f32 %v6073_v23, %v5464_v57  ;;  %7308 = vset.pattern.permute.xlu1 %v7569_v24  ;;  %7307 = vset.pattern.permute.xlu0 %v7569_v24 }
0x2576   :  { %v5476_v30 = vmul.f32 0.044715, %v5470_v25  ;;  %v5474_v52 = vmul.f32 0.5, %v5470_v25 }
0x2577   :  { %v5475_v17 = vmul.f32 0.044715, %v5465_v6  ;;  %v5473_v48 = vmul.f32 0.5, %v5465_v6 }
0x2578   :  { %v5478_v32 = vmul.f32 %v5476_v30, %v5470_v25  ;;  %v5724_v30 = vld [vmem:[%s7737_s20] sm:$0xff] }
0x2579   :  { %v5477_v34 = vmul.f32 %v5475_v17, %v5465_v6 }
0x257a   :  { %v5480_v36 = vmul.f32 %v5478_v32, %v5470_v25 }
0x257b   :  { %v5479_v37 = vmul.f32 %v5477_v34, %v5465_v6 }
0x257c   :  { %v5482_v35 = vadd.f32 %v5480_v36, %v5470_v25 }
0x257d   :  { %v5481_v39 = vadd.f32 %v5479_v37, %v5465_v6  ;;  %v5725_v6 = vld [vmem:[%s7737_s20 + $0x8] sm:$0xff] }
0x257e   :  { %v5484_v40 = vmul.f32 0.7978846, %v5482_v35 }
0x257f   :  { %v5483_v42 = vmul.f32 0.7978846, %v5481_v39 }
0x2580   :  { %7465 = vtanh.f32 %v5484_v40 }
0x2581   :  { %7467 = vtanh.f32 %v5483_v42 }
0x258a   :  { %v7466_v38 = vpop.eup %7465 }
0x258b   :  { %v7468_v47 = vpop.eup %7467  ;;  %v5488_v55 = vadd.f32 1.0, %v7466_v38 }
0x258c   :  { %v5487_v51 = vadd.f32 1.0, %v7468_v47 }
0x258d   :  { %v5490_v62 = vmul.f32 %v5488_v55, %v5474_v52 }
0x258e   :  { %v5489_v60 = vmul.f32 %v5487_v51, %v5473_v48 }
0x2590   :  { %6889 = vmatprep.mubr.msk.f32.mxu0 %vm2817_vm4, %v5489_v60 }
0x2591   :  { %6890 = vmatmul.mubr.msk.f32.vlgmr.msra.gmra.mrb[52].mxu0 %vm2817_vm4, %v5490_v62 }
0x2664   :  { %v6891_v41 = vpop.f32.mrb[52].mxu0 }
0x2665   :  { %v5586_v7 = vadd.f32 %v6891_v41, %v6085_v2  ;;  %v5580_v8 = vpop.f32.mrb[53].mxu0 }
0x2666   :  { %v5581_v0 = vadd.f32 %v6085_v2, %v5580_v8 }
0x2667   :  { %v5590_v61 = vadd.f32 %v5586_v7, %v5378_v59 }
0x2668   :  { %v5589_v33 = vadd.f32 %v5581_v0, %v5377_v4 }
0x2669   :  { %v5598_v43 = vsel %vm223_vm0, %v5590_v61, 0.0 }
0x266a   :  { %5599 = vadd.xlane.f32.xlu1 %v5598_v43  ;;  %v5595_v1 = vsel %vm223_vm0, %v5589_v33, 0.0 }
0x266b   :  { %5596 = vadd.xlane.f32.xlu0 %v5595_v1 }
0x26f7   :  { %v5600_v54 = vpop.xlane.xlu1 %5599 }
0x26f8   :  { %v5602_v28 = vmul.f32 0.03125, %v5600_v54  ;;  %v5597_v12 = vpop.xlane.xlu0 %5596 }
0x26f9   :  { %v5601_v31 = vmul.f32 0.03125, %v5597_v12 }
0x26fa   :  { %v5604_v63 = vsub.f32 %v5590_v61, %v5602_v28 }
0x26fb   :  { %v5603_v56 = vsub.f32 %v5589_v33, %v5601_v31 }
0x26fc   :  { %v5606_v10 = vmul.f32 %v5604_v63, %v5604_v63 }
0x26fd   :  { %v5605_v46 = vmul.f32 %v5603_v56, %v5603_v56 }
0x26fe   :  { %v5610_v29 = vsel %vm223_vm0, %v5606_v10, 0.0 }
0x26ff   :  { %5611 = vadd.xlane.f32.xlu1 %v5610_v29  ;;  %v5607_v11 = vsel %vm223_vm0, %v5605_v46, 0.0 }
0x2700   :  { %5608 = vadd.xlane.f32.xlu0 %v5607_v11 }
0x278c   :  { %v5612_v27 = vpop.xlane.xlu1 %5611 }
0x278d   :  { %v5614_v4 = vmul.f32 0.03125, %v5612_v27  ;;  %v5609_v59 = vpop.xlane.xlu0 %5608 }
0x278e   :  { %v5613_v26 = vmul.f32 0.03125, %v5609_v59 }
0x278f   :  { %v5616_v14 = vadd.f32 1e-05, %v5614_v4 }
0x2790   :  { %v5615_v13 = vadd.f32 1e-05, %v5613_v26 }
0x2791   :  { %7469 = vrsqrt.f32 %v5616_v14 }
0x2792   :  { %7471 = vrsqrt.f32 %v5615_v13 }
0x279b   :  { %v7470_v19 = vpop.eup %7469 }
0x279c   :  { %v7472_v58 = vpop.eup %7471  ;;  %v5620_v15 = vmul.f32 %v7470_v19, %v5604_v63 }
0x279d   :  { %v5619_v44 = vmul.f32 %v7472_v58, %v5603_v56 }
0x279e   :  { %v5628_v22 = vmul.f32 %v6090_v50, %v5620_v15 }
0x279f   :  { %v5627_v18 = vmul.f32 %v6090_v50, %v5619_v44 }
0x27a0   :  { %v5636_v23 = vadd.f32 %v6091_v45, %v5628_v22 }
0x27a1   :  { %v5635_v20 = vadd.f32 %v6091_v45, %v5627_v18 }
0x27a3   :  { %6900 = vmatprep.mubr.msk.f32.mxu1 %vm223_vm0, %v5635_v20 }
0x27a4   :  { %6901 = vmatmul.mubr.msk.f32.vlgmr.msra.gmra.mrb[42].mxu1 %vm223_vm0, %v5636_v23 }
0x2877   :  { %v6902_v25 = vpop.f32.mrb[42].mxu1 }
0x2878   :  { %5723 = vst [vmem:[#allocation2 + $0x8] sm:$0xff] %v6902_v25  ;;  %5728 = vmax.xlane.f32.xlu1 %v6902_v25  ;;  %v5713_v57 = vpop.f32.mrb[43].mxu1 }
0x2879   :  { %5722 = vst [vmem:[#allocation2] sm:$0xff] %v5713_v57  ;;  %5726 = vmax.xlane.f32.xlu0 %v5713_v57 }
0x2889   :  { %5750 = vperm.xlu1 %7308, %v5725_v6  }
0x288f   :  { %5747 = vperm.xlu0 %7307, %v5724_v30  }
0x2905   :  { %v5729_v17 = vpop.xlane.xlu1 %5728 }
0x2906   :  { %v5731_v32 = vsub.f32 %v6902_v25, %v5729_v17  ;;  %v5727_v34 = vpop.xlane.xlu0 %5726 }
0x2907   :  { %v5730_v36 = vsub.f32 %v5713_v57, %v5727_v34 }
0x2908   :  { %v5734_v37 = vmul.f32 1.442695, %v5731_v32 }
0x2909   :  { %v5732_v35 = vmul.f32 1.442695, %v5730_v36  ;;  %v5751_v38 = vpop.permute.xlu1 %5750 }
0x290a   :  { %7473 = vpow2.f32 %v5734_v37  ;;  %vm5753_vm8 = vcmp.eq.s32.totalorder %v7786_v49, %v5751_v38 }
0x290b   :  { %7475 = vpow2.f32 %v5732_v35  ;;  %v5755_v55 = vsel %vm5753_vm8, %v6902_v25, 0.0 }
0x290e   :  { %v5748_v39 = vpop.permute.xlu0 %5747 }
0x290f   :  { %vm5752_vm0 = vcmp.eq.s32.totalorder %v7786_v49, %v5748_v39 }
0x2910   :  { %v5754_v47 = vsel %vm5752_vm0, %v5713_v57, 0.0 }
0x2914   :  { %v7474_v40 = vpop.eup %7473 }
0x2915   :  { %v7476_v42 = vpop.eup %7475  ;;  %5738 = vadd.xlane.f32.xlu0 %v7474_v40 }
0x2916   :  { %5736 = vadd.xlane.f32.xlu1 %v7476_v42 }
0x291a   :  { %5756 = vadd.xlane.f32.xlu1 %v5754_v47 }
0x291e   :  { %5758 = vadd.xlane.f32.xlu1 %v5755_v55 }
0x29a2   :  { %v5739_v48 = vpop.xlane.xlu0 %5738 }
0x29a3   :  { %7477 = vlog2.f32 %v5739_v48  ;;  %v5737_v51 = vpop.xlane.xlu1 %5736 }
0x29a4   :  { %7479 = vlog2.f32 %v5737_v51 }
0x29a7   :  { %v5757_v52 = vpop.xlane.xlu1 %5756 }
0x29ab   :  { %v5759_v0 = vpop.xlane.xlu1 %5758 }
0x29ad   :  { %v7478_v60 = vpop.eup %7477 }
0x29ae   :  { %v7480_v62 = vpop.eup %7479  ;;  %v5743_v2 = vmul.f32 0.6931472, %v7478_v60 }
0x29af   :  { %v5741_v41 = vmul.f32 0.6931472, %v7480_v62 }
0x29b0   :  { %v5745_v7 = vadd.f32 %v5743_v2, %v5729_v17 }
0x29b1   :  { %v5744_v8 = vadd.f32 %v5741_v41, %v5727_v34 }
0x29b2   :  { %v5761_v61 = vsub.f32 %v5745_v7, %v5759_v0 }
0x29b3   :  { %v5760_v33 = vsub.f32 %v5744_v8, %v5757_v52 }
0x29b4   :  { %v5764_v43 = vsel %vm5762_vm9, %v5761_v61, 0.0 }
0x29b5   :  { %v5763_v49 = vsel %vm5762_vm9, %v5760_v33, 0.0 }
0x29b6   :  { %v5765_v1 = vadd.f32 %v5764_v43, %v5763_v49 }
0x29b8   :  { %5766 = vadd.xlane.f32.xlu1 %v5765_v1 }
0x29b9   :  { %7495 = shalt.err (!%p7492_p4)
}
0x29ba   :  { %s7496_s29 = scalar_lea.hbm %s7742_s30, 256 }
0x29bb   :  { %p7497_p5 = scmp.ne.s32.totalorder %s7742_s30, %s7496_s29  ;;  %p7500_p6 = scmp.lt.u32.totalorder %s7496_s29, %s7742_s30 }
0x29bd   :  { %p7502_p7 = pnand %p7500_p6, %p7497_p5 }
0x29bf   :  { %7505 = shalt.err (!%p7502_p7)
}
0x29c0   :  { %s7571_s3 = smov 128   ;;  %s7572_s8 = smov 8   ;;  %vm5779_vm10 = vcmask 0  }
0x29c1   :  { %5792 = dma.vmem_to_hbm [thread:$0]  %s5787_s21, 256, %s7742_s30, [#allocation3], %s7571_s3, %s7571_s3, %s7572_s8  }
0x29c2   :  { %s7573_s14 = smov [#allocation4]  }
0x29c3   :  { %s5799_s19 = sshll.u32 %s7573_s14, 4  ;;  %s5800_s19 = int_to_ptr.vmem [resolvable:$true] %s5799_s19 }
0x29c4   :  { %s7506_s12 = scalar_lea.vmem %s5800_s19, 16  ;;  %s7510_s20 = scalar_lea.vmem %s5800_s19, 32 }
0x29c5   :  { %p7507_p8 = scmp.ne.s32.totalorder %s5800_s19, %s7506_s12  ;;  %p7511_p9 = scmp.lt.s32.totalorder %s5800_s19, %s5800_s19 }
0x29c6   :  { %p7512_p10 = scmp.lt.s32.totalorder %s7510_s20, %s7506_s12 }
0x29c8   :  { %p7513_p11 = por %p7512_p10, %p7511_p9 }
0x29ca   :  { %p7514_p12 = pnand %p7513_p11, %p7507_p8 }
0x2a45   :  { %v5767_v54 = vpop.xlane.xlu1 %5766 }
0x2a46   :  { %v5768_v28 = vrot.slane %v5767_v54, 4 }
0x2a48   :  { %v5769_v12 = vadd.f32 %v5768_v28, %v5767_v54 }
0x2a4a   :  { %v5770_v31 = vrot.slane %v5769_v12, 2 }
0x2a4c   :  { %v5771_v63 = vadd.f32 %v5770_v31, %v5769_v12 }
0x2a4e   :  { %v5772_v56 = vrot.slane %v5771_v63, 1 }
0x2a50   :  { %v5773_v10 = vadd.f32 %v5772_v56, %v5771_v63 }
0x2a52   :  { %7263 = vpush %v5773_v10 }
0x2a83   :  { %s7264_s24 = spop %7263 }
0x2a84   :  { %s5777_s6 = smul.f32 0.0625, %s7264_s24 }
0x2a86   :  { %v5778_v46 = vstv %s5777_s6 }
0x2a87   :  { %5780 = vst.msk [vmem:[#allocation4] sm:$0x1] %vm5779_vm10, %v5778_v46 }
0x2a88   :  { %7517 = shalt.err (!%p7514_p12)
}
0x2a89   :  { %s7518_s30 = scalar_lea.hbm %s7747_s4, 16 }
0x2a8a   :  { %p7519_p13 = scmp.ne.s32.totalorder %s7747_s4, %s7518_s30  ;;  %p7522_p0 = scmp.lt.u32.totalorder %s7518_s30, %s7747_s4 }
0x2a8c   :  { %p7524_p1 = pnand %p7522_p0, %p7519_p13 }
0x2a8e   :  { %7527 = shalt.err (!%p7524_p1)
}
0x2a8f   :  { %5802 = dma.vmem_to_hbm [thread:$0]  %s5800_s19, 16, %s7747_s4, [#allocation5]  }
0x2a90   :  { %7528 = dma.done.wait [#allocation3], 256  }
0x2a91   :  { %7529 = vsyncadd [#allocation3], 4294967040 }
0x2a92   :  { %7530 = dma.done.wait [#allocation5], 16  }
0x2a93   :  { %7531 = vsyncadd [#allocation5], 4294967280 }
0x2a94   :  { %5809 = vsyncpa [#allocation3], 1 }
0x2a95   :  { %5810 = vsyncpa [#allocation5], 1 }

</bundles_post_ra>
